<compile_context>
chip_gen: v6e
topology: v6e:2x2x1
jax: 0.10.0
libtpu: 0.0.40
codegen_flags: <defaults>
</compile_context>

<pallas_src>
import numpy as np

import jax
import jax.numpy as jnp
from jax.experimental import pallas as pl
from jax.experimental.pallas import tpu as pltpu


# ----------------------------------------------------------------------------
# The single fused kernel (per-sample: one grid step == one sample)
# ----------------------------------------------------------------------------
def _autoencoder_kernel(p1_ref, w1_ref, b1_ref, s2_ref, w2_ref, b2_ref, sp2_ref,
                        s3_ref, w3_ref, b3_ref, wt1_ref, t1_ref, bt1_ref,
                        wt2_ref, t2_ref, bt2_ref, wt3_ref, bt3_ref, o_ref):
    bf16 = jnp.bfloat16

    def mm(a, b):
        return jnp.dot(a, b, preferred_element_type=jnp.float32)

    def lrelu(z):
        return jnp.where(z >= 0.0, z, 0.01 * z)

    # ---- conv1 (1->64, k3, s2, p1) + LeakyReLU + MaxPool(2,2): 32 -> 16 -> 8 ----
    # p1: (9, 256) bf16, rows = (dh,dw) patch tap, cols = pool_slot*64 + pixel.
    # max over pool taps of the raw matmul commutes with the monotone
    # bias+LeakyReLU epilogue.
    c1 = mm(w1_ref[...], p1_ref[0])                               # (64, 256)
    z1 = jnp.maximum(jnp.maximum(c1[:, 0:64], c1[:, 64:128]),
                     jnp.maximum(c1[:, 128:192], c1[:, 192:256]))  # (64, 64)
    a1 = lrelu(z1 + b1_ref[...]).astype(bf16)                     # (64 ch, 64 px)

    # ---- conv2 (64->16, k3, s2, p1) + LeakyReLU + MaxPool(2, s1): 8 -> 4 -> 3 ----
    # In-kernel im2col: gather pixels via the 0/1 selection matrix (exact).
    g2 = mm(a1, s2_ref[...]).astype(bf16)                         # (64, 9*16)
    p2 = jnp.concatenate([g2[:, 16 * t:16 * (t + 1)] for t in range(9)],
                         axis=0)                                  # (576, 16)
    z2 = mm(w2_ref[...], p2)                                      # (16, 16)
    a2c = lrelu(z2 + b2_ref[...]).astype(bf16)                    # (16, 16)
    gp = mm(a2c, sp2_ref[...])                                    # (16, 36)
    a2 = jnp.maximum(jnp.maximum(gp[:, 0:9], gp[:, 9:18]),
                     jnp.maximum(gp[:, 18:27], gp[:, 27:36])).astype(bf16)  # (16, 9)

    # ---- conv3 (16->16, k3, s1, p1) + LeakyReLU: 3 -> 3 ----
    g3 = mm(a2, s3_ref[...]).astype(bf16)                         # (16, 81)
    p3 = jnp.concatenate([g3[:, 9 * t:9 * (t + 1)] for t in range(9)],
                         axis=0)                                  # (144, 9)
    z3 = mm(w3_ref[...], p3)                                      # (16, 9)
    a3 = lrelu(z3 + b3_ref[...]).astype(bf16)                     # (16, 9)

    # ---- convT1 (16->64, k3, s2, p1) + LeakyReLU: 3 -> 5 ----
    # Dense per-tap matmul + in-kernel col2im scatter-add via 0/1 matmuls.
    y1 = mm(wt1_ref[...], a3)                                     # (576, 9)
    z4 = mm(y1[0:64, :].astype(bf16), t1_ref[0])                  # (64, 25)
    for t in range(1, 9):
        z4 = z4 + mm(y1[64 * t:64 * (t + 1), :].astype(bf16), t1_ref[t])
    a4 = lrelu(z4 + bt1_ref[...]).astype(bf16)                    # (64, 25)

    # ---- convT2 (64->16, k4, s3, p1) + LeakyReLU: 5 -> 14 ----
    y2 = mm(wt2_ref[...], a4)                                     # (256, 25)
    z5 = mm(y2[0:16, :].astype(bf16), t2_ref[0])                  # (16, 196)
    for t in range(1, 16):
        z5 = z5 + mm(y2[16 * t:16 * (t + 1), :].astype(bf16), t2_ref[t])
    a5 = lrelu(z5 + bt2_ref[...]).astype(bf16)                    # (16, 196)

    # ---- convT3 (16->1, k2, s2) + tanh: 14 -> 28 ----
    # kernel == stride -> no overlapping taps, so per-tap bias + tanh is exact.
    y3 = mm(wt3_ref[...], a5)                                     # (4, 196)
    o_ref[0] = jnp.tanh(y3 + bt3_ref[...])


# ----------------------------------------------------------------------------
# One-time host packing: weights + 0/1 gather / scatter matrices (all bf16)
# ----------------------------------------------------------------------------
def _build_gather_scatter():
    # conv2 im2col gather: [h*8+w, t*16 + i*4+j], t = dh*3+dw, h = 2i+dh-1.
    s2 = np.zeros((64, 9 * 16), np.float32)
    for dh in range(3):
        for dw in range(3):
            t = dh * 3 + dw
            for i in range(4):
                for j in range(4):
                    h, w = 2 * i + dh - 1, 2 * j + dw - 1
                    if 0 <= h < 8 and 0 <= w < 8:
                        s2[h * 8 + w, t * 16 + i * 4 + j] = 1.0
    # MaxPool(2, stride 1) on 4x4 -> 3x3: [i*4+j, t*9 + pi*3+pj], t = a*2+b.
    sp2 = np.zeros((16, 4 * 9), np.float32)
    for a in range(2):
        for b in range(2):
            t = a * 2 + b
            for pi in range(3):
                for pj in range(3):
                    sp2[(pi + a) * 4 + (pj + b), t * 9 + pi * 3 + pj] = 1.0
    # conv3 im2col gather (3x3, stride 1, pad 1).
    s3 = np.zeros((9, 9 * 9), np.float32)
    for dh in range(3):
        for dw in range(3):
            t = dh * 3 + dw
            for i in range(3):
                for j in range(3):
                    h, w = i + dh - 1, j + dw - 1
                    if 0 <= h < 3 and 0 <= w < 3:
                        s3[h * 3 + w, t * 9 + i * 3 + j] = 1.0
    # convT1 col2im scatter (k3, s2, p1, 3 -> 5): per tap (ih,iw) -> (oh,ow).
    t1 = np.zeros((9, 9, 25), np.float32)
    for kh in range(3):
        for kw in range(3):
            t = kh * 3 + kw
            for ih in range(3):
                for iw in range(3):
                    oh, ow = 2 * ih - 1 + kh, 2 * iw - 1 + kw
                    if 0 <= oh < 5 and 0 <= ow < 5:
                        t1[t, ih * 3 + iw, oh * 5 + ow] = 1.0
    # convT2 col2im scatter (k4, s3, p1, 5 -> 14).
    t2 = np.zeros((16, 25, 196), np.float32)
    for kh in range(4):
        for kw in range(4):
            t = kh * 4 + kw
            for ih in range(5):
                for iw in range(5):
                    oh, ow = 3 * ih - 1 + kh, 3 * iw - 1 + kw
                    if 0 <= oh < 14 and 0 <= ow < 14:
                        t2[t, ih * 5 + iw, oh * 14 + ow] = 1.0
    return s2, sp2, s3, t1, t2


def pack_params(p):
    """One-time re-layout of weights + gather/scatter constants (bf16)."""
    bf = jnp.bfloat16
    s2, sp2, s3, t1, t2 = _build_gather_scatter()

    w1 = p["conv1_w"].reshape(64, 9).astype(bf)                       # [co, dh*3+dw]
    w2 = jnp.transpose(p["conv2_w"], (0, 2, 3, 1)).reshape(16, 576).astype(bf)   # [co, t*64+ci]
    w3 = jnp.transpose(p["conv3_w"], (0, 2, 3, 1)).reshape(16, 144).astype(bf)   # [co, t*16+ci]
    wt1 = jnp.transpose(p["convT1_w"], (2, 3, 1, 0)).reshape(576, 16).astype(bf)  # [t*64+co, ci]
    wt2 = jnp.transpose(p["convT2_w"], (2, 3, 1, 0)).reshape(256, 64).astype(bf)  # [t*16+co, ci]
    wt3 = jnp.transpose(p["convT3_w"], (2, 3, 1, 0)).reshape(4, 16).astype(bf)    # [kh*2+kw, ci]

    f32 = jnp.float32
    return {
        "w1": w1, "b1": p["conv1_b"].reshape(64, 1).astype(f32),
        "s2": jnp.asarray(s2, bf), "w2": w2,
        "b2": p["conv2_b"].reshape(16, 1).astype(f32),
        "sp2": jnp.asarray(sp2, bf),
        "s3": jnp.asarray(s3, bf), "w3": w3,
        "b3": p["conv3_b"].reshape(16, 1).astype(f32),
        "wt1": wt1, "t1": jnp.asarray(t1, bf),
        "bt1": p["convT1_b"].reshape(64, 1).astype(f32),
        "wt2": wt2, "t2": jnp.asarray(t2, bf),
        "bt2": p["convT2_b"].reshape(16, 1).astype(f32),
        "wt3": wt3, "bt3": p["convT3_b"].reshape(1, 1).astype(f32),
    }


# ----------------------------------------------------------------------------
# Forward: input prep (XLA, one tiny fusion) -> one pallas_call -> pixel shuffle
# ----------------------------------------------------------------------------
def _const_spec(arr):
    zeros = (0,) * arr.ndim
    return pl.BlockSpec(arr.shape, lambda i, _z=zeros: _z)


def autoencoder_forward(x_nchw, pk):
    n = x_nchw.shape[0]
    x = x_nchw[:, 0].astype(jnp.float32)                          # (n, 32, 32)
    xpad = jnp.pad(x, ((0, 0), (1, 1), (1, 1)))                   # (n, 34, 34)

    # conv1 im2col fused with the MaxPool(2,2) tap layout:
    # p1[n, dh*3+dw, (a*2+b)*64 + ph*8+pw] = xpad[n, 4ph+2a+dh, 4pw+2b+dw]
    taps = []
    for dh in range(3):
        for dw in range(3):
            slots = []
            for a in range(2):
                for b in range(2):
                    h0, w0 = 2 * a + dh, 2 * b + dw
                    slots.append(xpad[:, h0:h0 + 29:4, w0:w0 + 29:4])
            taps.append(jnp.stack(slots, axis=1).reshape(n, 256))
    p1 = jnp.stack(taps, axis=1).astype(jnp.bfloat16)             # (n, 9, 256)

    y3 = pl.pallas_call(
        _autoencoder_kernel,
        out_shape=jax.ShapeDtypeStruct((n, 4, 196), jnp.float32),
        grid=(n,),
        in_specs=[
            pl.BlockSpec((1, 9, 256), lambda i: (i, 0, 0)),
            _const_spec(pk["w1"]), _const_spec(pk["b1"]),
            _const_spec(pk["s2"]), _const_spec(pk["w2"]), _const_spec(pk["b2"]),
            _const_spec(pk["sp2"]),
            _const_spec(pk["s3"]), _const_spec(pk["w3"]), _const_spec(pk["b3"]),
            _const_spec(pk["wt1"]), _const_spec(pk["t1"]), _const_spec(pk["bt1"]),
            _const_spec(pk["wt2"]), _const_spec(pk["t2"]), _const_spec(pk["bt2"]),
            _const_spec(pk["wt3"]), _const_spec(pk["bt3"]),
        ],
        out_specs=pl.BlockSpec((1, 4, 196), lambda i: (i, 0, 0)),
        compiler_params=pltpu.CompilerParams(
            dimension_semantics=("parallel",)),
    )(p1, pk["w1"], pk["b1"], pk["s2"], pk["w2"], pk["b2"], pk["sp2"],
      pk["s3"], pk["w3"], pk["b3"], pk["wt1"], pk["t1"], pk["bt1"],
      pk["wt2"], pk["t2"], pk["bt2"], pk["wt3"], pk["bt3"])

    # convT3 pixel-shuffle (k == stride, no overlap): (n,4,196) -> (n,1,28,28)
    out = (y3.reshape(n, 2, 2, 14, 14)
             .transpose(0, 3, 1, 4, 2)
             .reshape(n, 28, 28))
    return out[:, None, :, :]


# ----------------------------------------------------------------------------
# Parameters (deterministic synthetic init, PyTorch-like uniform(-1/sqrt(fan),..))
# ----------------------------------------------------------------------------
def init_params(key):
    def uni(k, shape, fan_in):
        bound = 1.0 / jnp.sqrt(jnp.float32(fan_in))
        return jax.random.uniform(k, shape, jnp.float32, -bound, bound)

    names_shapes = {
        "conv1":  ((64, 1, 3, 3),  1 * 9),
        "conv2":  ((16, 64, 3, 3), 64 * 9),
        "conv3":  ((16, 16, 3, 3), 16 * 9),
        "convT1": ((16, 64, 3, 3), 64 * 9),   # (Cin, Cout, kh, kw)
        "convT2": ((64, 16, 4, 4), 16 * 16),
        "convT3": ((16, 1, 2, 2),  1 * 4),
    }
    params = {}
    keys = jax.random.split(key, 2 * len(names_shapes))
    for i, (name, (wshape, fan)) in enumerate(names_shapes.items()):
        bshape = (wshape[1],) if name.startswith("convT") else (wshape[0],)
        params[name + "_w"] = uni(keys[2 * i], wshape, fan)
        params[name + "_b"] = uni(keys[2 * i + 1], bshape, fan)
    return params


# ----------------------------------------------------------------------------
# Pure-JAX reference (f32) for a tolerance check
# ----------------------------------------------------------------------------
def _reference_forward(x_nchw, params):
    dn = ("NHWC", "HWIO", "NHWC")

    def conv(x, w, b, s, p):
        k = jnp.transpose(w, (2, 3, 1, 0))
        y = jax.lax.conv_general_dilated(x, k, (s, s), [(p, p), (p, p)],
                                         dimension_numbers=dn)
        return y + b.reshape(1, 1, 1, -1)

    def convT(x, w, b, s, p):
        kh = w.shape[2]
        k = jnp.transpose(jnp.flip(w, (2, 3)), (2, 3, 0, 1))
        y = jax.lax.conv_general_dilated(x, k, (1, 1),
                                         [(kh - 1 - p, kh - 1 - p)] * 2,
                                         lhs_dilation=(s, s),
                                         dimension_numbers=dn)
        return y + b.reshape(1, 1, 1, -1)

    def lrelu(x):
        return jnp.where(x >= 0, x, 0.01 * x)

    def pool(x, k, s):
        return jax.lax.reduce_window(x, -jnp.inf, jax.lax.max,
                                     (1, k, k, 1), (1, s, s, 1), "VALID")

    x = jnp.transpose(x_nchw, (0, 2, 3, 1)).astype(jnp.float32)
    x = pool(lrelu(conv(x, params["conv1_w"], params["conv1_b"], 2, 1)), 2, 2)
    x = pool(lrelu(conv(x, params["conv2_w"], params["conv2_b"], 2, 1)), 2, 1)
    x = lrelu(conv(x, params["conv3_w"], params["conv3_b"], 1, 1))
    x = lrelu(convT(x, params["convT1_w"], params["convT1_b"], 2, 1))
    x = lrelu(convT(x, params["convT2_w"], params["convT2_b"], 3, 1))
    x = jnp.tanh(convT(x, params["convT3_w"], params["convT3_b"], 2, 0))
    return jnp.transpose(x, (0, 3, 1, 2))


if __name__ == "__main__":
    key = jax.random.PRNGKey(0)
    k_params, k_x = jax.random.split(key)
    params = init_params(k_params)
    packed = pack_params(params)                                  # one-time pack
    x = jax.random.normal(k_x, (2, 1, 32, 32), jnp.float32)       # N=2, C=1, 32x32

    fwd = jax.jit(autoencoder_forward)
    out = jax.block_until_ready(fwd(x, packed))

    assert out.shape == (2, 1, 28, 28), out.shape
    assert out.dtype == jnp.float32
    assert bool(jnp.all(jnp.abs(out) <= 1.0))                     # tanh output range

    ref = _reference_forward(x, params)                           # f32 reference
    err = float(jnp.max(jnp.abs(out - ref)))
    assert err < 6e-2, f"max abs diff vs f32 reference: {err}"

    print("KERNEL_OK")
</pallas_src>

<mosaic_0001>
module attributes {stable_mosaic.version = 11 : i64} {
  func.func @_autoencoder_kernel(%arg0: i32, %arg1: memref<1x9x256xbf16, #tpu.memory_space<vmem>>, %arg2: memref<64x9xbf16, #tpu.memory_space<vmem>>, %arg3: memref<64x1xf32, #tpu.memory_space<vmem>>, %arg4: memref<64x144xbf16, #tpu.memory_space<vmem>>, %arg5: memref<16x576xbf16, #tpu.memory_space<vmem>>, %arg6: memref<16x1xf32, #tpu.memory_space<vmem>>, %arg7: memref<16x36xbf16, #tpu.memory_space<vmem>>, %arg8: memref<9x81xbf16, #tpu.memory_space<vmem>>, %arg9: memref<16x144xbf16, #tpu.memory_space<vmem>>, %arg10: memref<16x1xf32, #tpu.memory_space<vmem>>, %arg11: memref<576x16xbf16, #tpu.memory_space<vmem>>, %arg12: memref<9x9x25xbf16, #tpu.memory_space<vmem>>, %arg13: memref<64x1xf32, #tpu.memory_space<vmem>>, %arg14: memref<256x64xbf16, #tpu.memory_space<vmem>>, %arg15: memref<16x25x196xbf16, #tpu.memory_space<vmem>>, %arg16: memref<16x1xf32, #tpu.memory_space<vmem>>, %arg17: memref<4x16xbf16, #tpu.memory_space<vmem>>, %arg18: memref<1x1xf32, #tpu.memory_space<vmem>>, %arg19: memref<1x4x196xf32, #tpu.memory_space<vmem>>) attributes {dimension_semantics = [#tpu.dimension_semantics<parallel>], iteration_bounds = array<i64: 2>, scalar_prefetch = 0 : i64, scratch_operands = 0 : i64, tpu.core_type = #tpu.core_type<tc>, window_params = [{transform_indices = @transform_0, window_bounds = array<i64: 1, 9, 256>}, {pipeline_mode = #tpu.pipeline_mode<synchronous>, transform_indices = @transform_1, window_bounds = array<i64: 64, 9>}, {pipeline_mode = #tpu.pipeline_mode<synchronous>, transform_indices = @transform_2, window_bounds = array<i64: 64, 1>}, {pipeline_mode = #tpu.pipeline_mode<synchronous>, transform_indices = @transform_3, window_bounds = array<i64: 64, 144>}, {pipeline_mode = #tpu.pipeline_mode<synchronous>, transform_indices = @transform_4, window_bounds = array<i64: 16, 576>}, {pipeline_mode = #tpu.pipeline_mode<synchronous>, transform_indices = @transform_5, window_bounds = array<i64: 16, 1>}, {pipeline_mode = #tpu.pipeline_mode<synchronous>, transform_indices = @transform_6, window_bounds = array<i64: 16, 36>}, {pipeline_mode = #tpu.pipeline_mode<synchronous>, transform_indices = @transform_7, window_bounds = array<i64: 9, 81>}, {pipeline_mode = #tpu.pipeline_mode<synchronous>, transform_indices = @transform_8, window_bounds = array<i64: 16, 144>}, {pipeline_mode = #tpu.pipeline_mode<synchronous>, transform_indices = @transform_9, window_bounds = array<i64: 16, 1>}, {pipeline_mode = #tpu.pipeline_mode<synchronous>, transform_indices = @transform_10, window_bounds = array<i64: 576, 16>}, {pipeline_mode = #tpu.pipeline_mode<synchronous>, transform_indices = @transform_11, window_bounds = array<i64: 9, 9, 25>}, {pipeline_mode = #tpu.pipeline_mode<synchronous>, transform_indices = @transform_12, window_bounds = array<i64: 64, 1>}, {pipeline_mode = #tpu.pipeline_mode<synchronous>, transform_indices = @transform_13, window_bounds = array<i64: 256, 64>}, {pipeline_mode = #tpu.pipeline_mode<synchronous>, transform_indices = @transform_14, window_bounds = array<i64: 16, 25, 196>}, {pipeline_mode = #tpu.pipeline_mode<synchronous>, transform_indices = @transform_15, window_bounds = array<i64: 16, 1>}, {pipeline_mode = #tpu.pipeline_mode<synchronous>, transform_indices = @transform_16, window_bounds = array<i64: 4, 16>}, {pipeline_mode = #tpu.pipeline_mode<synchronous>, transform_indices = @transform_17, window_bounds = array<i64: 1, 1>}, {transform_indices = @transform_18, window_bounds = array<i64: 1, 4, 196>}]} {
    %c0 = arith.constant 0 : index
    %c0_0 = arith.constant 0 : index
    %0 = vector.load %arg2[%c0, %c0_0] : memref<64x9xbf16, #tpu.memory_space<vmem>>, vector<64x9xbf16>
    %c0_1 = arith.constant 0 : index
    %c0_2 = arith.constant 0 : index
    %c0_3 = arith.constant 0 : index
    %1 = vector.load %arg1[%c0_1, %c0_2, %c0_3] : memref<1x9x256xbf16, #tpu.memory_space<vmem>>, vector<1x9x256xbf16>
    %2 = vector.shape_cast %1 : vector<1x9x256xbf16> to vector<9x256xbf16>
    %cst = arith.constant dense<0.000000e+00> : vector<64x256xf32>
    %3 = tpu.matmul %0, %2, %cst {dimension_numbers = #tpu.dot_dimension_numbers<[1], [0], [0], [1], [0, 0, 1, 1], [], []>} : vector<64x9xbf16>, vector<9x256xbf16>, vector<64x256xf32> -> vector<64x256xf32>
    %4 = vector.extract_strided_slice %3 {offsets = [0, 0], sizes = [64, 64], strides = [1, 1]} : vector<64x256xf32> to vector<64x64xf32>
    %5 = vector.extract_strided_slice %3 {offsets = [0, 64], sizes = [64, 64], strides = [1, 1]} : vector<64x256xf32> to vector<64x64xf32>
    %6 = arith.maximumf %4, %5 : vector<64x64xf32>
    %7 = vector.extract_strided_slice %3 {offsets = [0, 128], sizes = [64, 64], strides = [1, 1]} : vector<64x256xf32> to vector<64x64xf32>
    %8 = vector.extract_strided_slice %3 {offsets = [0, 192], sizes = [64, 64], strides = [1, 1]} : vector<64x256xf32> to vector<64x64xf32>
    %9 = arith.maximumf %7, %8 : vector<64x64xf32>
    %10 = arith.maximumf %6, %9 : vector<64x64xf32>
    %c0_4 = arith.constant 0 : index
    %c0_5 = arith.constant 0 : index
    %11 = vector.load %arg3[%c0_4, %c0_5] : memref<64x1xf32, #tpu.memory_space<vmem>>, vector<64x1xf32>
    %12 = vector.broadcast %11 : vector<64x1xf32> to vector<64x64xf32>
    %13 = arith.addf %10, %12 : vector<64x64xf32>
    %cst_6 = arith.constant 0.000000e+00 : f32
    %14 = vector.broadcast %cst_6 : f32 to vector<64x64xf32>
    %15 = arith.cmpf oge, %13, %14 : vector<64x64xf32>
    %cst_7 = arith.constant 0.00999999977 : f32
    %16 = vector.broadcast %cst_7 : f32 to vector<64x64xf32>
    %17 = arith.mulf %16, %13 : vector<64x64xf32>
    %18 = arith.select %15, %13, %17 : vector<64x64xi1>, vector<64x64xf32>
    %19 = arith.truncf %18 : vector<64x64xf32> to vector<64x64xbf16>
    %c0_8 = arith.constant 0 : index
    %c0_9 = arith.constant 0 : index
    %20 = vector.load %arg4[%c0_8, %c0_9] : memref<64x144xbf16, #tpu.memory_space<vmem>>, vector<64x144xbf16>
    %cst_10 = arith.constant dense<0.000000e+00> : vector<64x144xf32>
    %21 = tpu.matmul %19, %20, %cst_10 {dimension_numbers = #tpu.dot_dimension_numbers<[1], [0], [0], [1], [0, 0, 1, 1], [], []>} : vector<64x64xbf16>, vector<64x144xbf16>, vector<64x144xf32> -> vector<64x144xf32>
    %22 = arith.truncf %21 : vector<64x144xf32> to vector<64x144xbf16>
    %23 = vector.extract_strided_slice %22 {offsets = [0, 0], sizes = [64, 16], strides = [1, 1]} : vector<64x144xbf16> to vector<64x16xbf16>
    %24 = vector.extract_strided_slice %22 {offsets = [0, 16], sizes = [64, 16], strides = [1, 1]} : vector<64x144xbf16> to vector<64x16xbf16>
    %25 = vector.extract_strided_slice %22 {offsets = [0, 32], sizes = [64, 16], strides = [1, 1]} : vector<64x144xbf16> to vector<64x16xbf16>
    %26 = vector.extract_strided_slice %22 {offsets = [0, 48], sizes = [64, 16], strides = [1, 1]} : vector<64x144xbf16> to vector<64x16xbf16>
    %27 = vector.extract_strided_slice %22 {offsets = [0, 64], sizes = [64, 16], strides = [1, 1]} : vector<64x144xbf16> to vector<64x16xbf16>
    %28 = vector.extract_strided_slice %22 {offsets = [0, 80], sizes = [64, 16], strides = [1, 1]} : vector<64x144xbf16> to vector<64x16xbf16>
    %29 = vector.extract_strided_slice %22 {offsets = [0, 96], sizes = [64, 16], strides = [1, 1]} : vector<64x144xbf16> to vector<64x16xbf16>
    %30 = vector.extract_strided_slice %22 {offsets = [0, 112], sizes = [64, 16], strides = [1, 1]} : vector<64x144xbf16> to vector<64x16xbf16>
    %31 = vector.extract_strided_slice %22 {offsets = [0, 128], sizes = [64, 16], strides = [1, 1]} : vector<64x144xbf16> to vector<64x16xbf16>
    %32 = tpu.concatenate %23, %24, %25, %26, %27, %28, %29, %30, %31 in 0 : vector<64x16xbf16>, vector<64x16xbf16>, vector<64x16xbf16>, vector<64x16xbf16>, vector<64x16xbf16>, vector<64x16xbf16>, vector<64x16xbf16>, vector<64x16xbf16>, vector<64x16xbf16> -> vector<576x16xbf16>
    %c0_11 = arith.constant 0 : index
    %c0_12 = arith.constant 0 : index
    %33 = vector.load %arg5[%c0_11, %c0_12] : memref<16x576xbf16, #tpu.memory_space<vmem>>, vector<16x576xbf16>
    %cst_13 = arith.constant dense<0.000000e+00> : vector<16x16xf32>
    %34 = tpu.matmul %33, %32, %cst_13 {dimension_numbers = #tpu.dot_dimension_numbers<[1], [0], [0], [1], [0, 0, 1, 1], [], []>} : vector<16x576xbf16>, vector<576x16xbf16>, vector<16x16xf32> -> vector<16x16xf32>
    %c0_14 = arith.constant 0 : index
    %c0_15 = arith.constant 0 : index
    %35 = vector.load %arg6[%c0_14, %c0_15] : memref<16x1xf32, #tpu.memory_space<vmem>>, vector<16x1xf32>
    %36 = vector.broadcast %35 : vector<16x1xf32> to vector<16x16xf32>
    %37 = arith.addf %34, %36 : vector<16x16xf32>
    %cst_16 = arith.constant 0.000000e+00 : f32
    %38 = vector.broadcast %cst_16 : f32 to vector<16x16xf32>
    %39 = arith.cmpf oge, %37, %38 : vector<16x16xf32>
    %cst_17 = arith.constant 0.00999999977 : f32
    %40 = vector.broadcast %cst_17 : f32 to vector<16x16xf32>
    %41 = arith.mulf %40, %37 : vector<16x16xf32>
    %42 = arith.select %39, %37, %41 : vector<16x16xi1>, vector<16x16xf32>
    %43 = arith.truncf %42 : vector<16x16xf32> to vector<16x16xbf16>
    %c0_18 = arith.constant 0 : index
    %c0_19 = arith.constant 0 : index
    %44 = vector.load %arg7[%c0_18, %c0_19] : memref<16x36xbf16, #tpu.memory_space<vmem>>, vector<16x36xbf16>
    %cst_20 = arith.constant dense<0.000000e+00> : vector<16x36xf32>
    %45 = tpu.matmul %43, %44, %cst_20 {dimension_numbers = #tpu.dot_dimension_numbers<[1], [0], [0], [1], [0, 0, 1, 1], [], []>} : vector<16x16xbf16>, vector<16x36xbf16>, vector<16x36xf32> -> vector<16x36xf32>
    %46 = vector.extract_strided_slice %45 {offsets = [0, 0], sizes = [16, 9], strides = [1, 1]} : vector<16x36xf32> to vector<16x9xf32>
    %47 = vector.extract_strided_slice %45 {offsets = [0, 9], sizes = [16, 9], strides = [1, 1]} : vector<16x36xf32> to vector<16x9xf32>
    %48 = arith.maximumf %46, %47 : vector<16x9xf32>
    %49 = vector.extract_strided_slice %45 {offsets = [0, 18], sizes = [16, 9], strides = [1, 1]} : vector<16x36xf32> to vector<16x9xf32>
    %50 = vector.extract_strided_slice %45 {offsets = [0, 27], sizes = [16, 9], strides = [1, 1]} : vector<16x36xf32> to vector<16x9xf32>
    %51 = arith.maximumf %49, %50 : vector<16x9xf32>
    %52 = arith.maximumf %48, %51 : vector<16x9xf32>
    %53 = arith.truncf %52 : vector<16x9xf32> to vector<16x9xbf16>
    %c0_21 = arith.constant 0 : index
    %c0_22 = arith.constant 0 : index
    %54 = vector.load %arg8[%c0_21, %c0_22] : memref<9x81xbf16, #tpu.memory_space<vmem>>, vector<9x81xbf16>
    %cst_23 = arith.constant dense<0.000000e+00> : vector<16x81xf32>
    %55 = tpu.matmul %53, %54, %cst_23 {dimension_numbers = #tpu.dot_dimension_numbers<[1], [0], [0], [1], [0, 0, 1, 1], [], []>} : vector<16x9xbf16>, vector<9x81xbf16>, vector<16x81xf32> -> vector<16x81xf32>
    %56 = arith.truncf %55 : vector<16x81xf32> to vector<16x81xbf16>
    %57 = vector.extract_strided_slice %56 {offsets = [0, 0], sizes = [16, 9], strides = [1, 1]} : vector<16x81xbf16> to vector<16x9xbf16>
    %58 = vector.extract_strided_slice %56 {offsets = [0, 9], sizes = [16, 9], strides = [1, 1]} : vector<16x81xbf16> to vector<16x9xbf16>
    %59 = vector.extract_strided_slice %56 {offsets = [0, 18], sizes = [16, 9], strides = [1, 1]} : vector<16x81xbf16> to vector<16x9xbf16>
    %60 = vector.extract_strided_slice %56 {offsets = [0, 27], sizes = [16, 9], strides = [1, 1]} : vector<16x81xbf16> to vector<16x9xbf16>
    %61 = vector.extract_strided_slice %56 {offsets = [0, 36], sizes = [16, 9], strides = [1, 1]} : vector<16x81xbf16> to vector<16x9xbf16>
    %62 = vector.extract_strided_slice %56 {offsets = [0, 45], sizes = [16, 9], strides = [1, 1]} : vector<16x81xbf16> to vector<16x9xbf16>
    %63 = vector.extract_strided_slice %56 {offsets = [0, 54], sizes = [16, 9], strides = [1, 1]} : vector<16x81xbf16> to vector<16x9xbf16>
    %64 = vector.extract_strided_slice %56 {offsets = [0, 63], sizes = [16, 9], strides = [1, 1]} : vector<16x81xbf16> to vector<16x9xbf16>
    %65 = vector.extract_strided_slice %56 {offsets = [0, 72], sizes = [16, 9], strides = [1, 1]} : vector<16x81xbf16> to vector<16x9xbf16>
    %66 = tpu.concatenate %57, %58, %59, %60, %61, %62, %63, %64, %65 in 0 : vector<16x9xbf16>, vector<16x9xbf16>, vector<16x9xbf16>, vector<16x9xbf16>, vector<16x9xbf16>, vector<16x9xbf16>, vector<16x9xbf16>, vector<16x9xbf16>, vector<16x9xbf16> -> vector<144x9xbf16>
    %c0_24 = arith.constant 0 : index
    %c0_25 = arith.constant 0 : index
    %67 = vector.load %arg9[%c0_24, %c0_25] : memref<16x144xbf16, #tpu.memory_space<vmem>>, vector<16x144xbf16>
    %cst_26 = arith.constant dense<0.000000e+00> : vector<16x9xf32>
    %68 = tpu.matmul %67, %66, %cst_26 {dimension_numbers = #tpu.dot_dimension_numbers<[1], [0], [0], [1], [0, 0, 1, 1], [], []>} : vector<16x144xbf16>, vector<144x9xbf16>, vector<16x9xf32> -> vector<16x9xf32>
    %c0_27 = arith.constant 0 : index
    %c0_28 = arith.constant 0 : index
    %69 = vector.load %arg10[%c0_27, %c0_28] : memref<16x1xf32, #tpu.memory_space<vmem>>, vector<16x1xf32>
    %70 = vector.broadcast %69 : vector<16x1xf32> to vector<16x9xf32>
    %71 = arith.addf %68, %70 : vector<16x9xf32>
    %cst_29 = arith.constant 0.000000e+00 : f32
    %72 = vector.broadcast %cst_29 : f32 to vector<16x9xf32>
    %73 = arith.cmpf oge, %71, %72 : vector<16x9xf32>
    %cst_30 = arith.constant 0.00999999977 : f32
    %74 = vector.broadcast %cst_30 : f32 to vector<16x9xf32>
    %75 = arith.mulf %74, %71 : vector<16x9xf32>
    %76 = arith.select %73, %71, %75 : vector<16x9xi1>, vector<16x9xf32>
    %77 = arith.truncf %76 : vector<16x9xf32> to vector<16x9xbf16>
    %c0_31 = arith.constant 0 : index
    %c0_32 = arith.constant 0 : index
    %78 = vector.load %arg11[%c0_31, %c0_32] : memref<576x16xbf16, #tpu.memory_space<vmem>>, vector<576x16xbf16>
    %cst_33 = arith.constant dense<0.000000e+00> : vector<576x9xf32>
    %79 = tpu.matmul %78, %77, %cst_33 {dimension_numbers = #tpu.dot_dimension_numbers<[1], [0], [0], [1], [0, 0, 1, 1], [], []>} : vector<576x16xbf16>, vector<16x9xbf16>, vector<576x9xf32> -> vector<576x9xf32>
    %80 = vector.extract_strided_slice %79 {offsets = [0, 0], sizes = [64, 9], strides = [1, 1]} : vector<576x9xf32> to vector<64x9xf32>
    %81 = arith.truncf %80 : vector<64x9xf32> to vector<64x9xbf16>
    %c0_34 = arith.constant 0 : index
    %c0_35 = arith.constant 0 : index
    %c0_36 = arith.constant 0 : index
    %82 = vector.load %arg12[%c0_34, %c0_35, %c0_36] : memref<9x9x25xbf16, #tpu.memory_space<vmem>>, vector<1x9x25xbf16>
    %83 = vector.shape_cast %82 : vector<1x9x25xbf16> to vector<9x25xbf16>
    %cst_37 = arith.constant dense<0.000000e+00> : vector<64x25xf32>
    %84 = tpu.matmul %81, %83, %cst_37 {dimension_numbers = #tpu.dot_dimension_numbers<[1], [0], [0], [1], [0, 0, 1, 1], [], []>} : vector<64x9xbf16>, vector<9x25xbf16>, vector<64x25xf32> -> vector<64x25xf32>
    %85 = vector.extract_strided_slice %79 {offsets = [64, 0], sizes = [64, 9], strides = [1, 1]} : vector<576x9xf32> to vector<64x9xf32>
    %86 = arith.truncf %85 : vector<64x9xf32> to vector<64x9xbf16>
    %c1 = arith.constant 1 : index
    %c0_38 = arith.constant 0 : index
    %c0_39 = arith.constant 0 : index
    %87 = vector.load %arg12[%c1, %c0_38, %c0_39] : memref<9x9x25xbf16, #tpu.memory_space<vmem>>, vector<1x9x25xbf16>
    %88 = vector.shape_cast %87 : vector<1x9x25xbf16> to vector<9x25xbf16>
    %cst_40 = arith.constant dense<0.000000e+00> : vector<64x25xf32>
    %89 = tpu.matmul %86, %88, %cst_40 {dimension_numbers = #tpu.dot_dimension_numbers<[1], [0], [0], [1], [0, 0, 1, 1], [], []>} : vector<64x9xbf16>, vector<9x25xbf16>, vector<64x25xf32> -> vector<64x25xf32>
    %90 = arith.addf %84, %89 : vector<64x25xf32>
    %91 = vector.extract_strided_slice %79 {offsets = [128, 0], sizes = [64, 9], strides = [1, 1]} : vector<576x9xf32> to vector<64x9xf32>
    %92 = arith.truncf %91 : vector<64x9xf32> to vector<64x9xbf16>
    %c2 = arith.constant 2 : index
    %c0_41 = arith.constant 0 : index
    %c0_42 = arith.constant 0 : index
    %93 = vector.load %arg12[%c2, %c0_41, %c0_42] : memref<9x9x25xbf16, #tpu.memory_space<vmem>>, vector<1x9x25xbf16>
    %94 = vector.shape_cast %93 : vector<1x9x25xbf16> to vector<9x25xbf16>
    %cst_43 = arith.constant dense<0.000000e+00> : vector<64x25xf32>
    %95 = tpu.matmul %92, %94, %cst_43 {dimension_numbers = #tpu.dot_dimension_numbers<[1], [0], [0], [1], [0, 0, 1, 1], [], []>} : vector<64x9xbf16>, vector<9x25xbf16>, vector<64x25xf32> -> vector<64x25xf32>
    %96 = arith.addf %90, %95 : vector<64x25xf32>
    %97 = vector.extract_strided_slice %79 {offsets = [192, 0], sizes = [64, 9], strides = [1, 1]} : vector<576x9xf32> to vector<64x9xf32>
    %98 = arith.truncf %97 : vector<64x9xf32> to vector<64x9xbf16>
    %c3 = arith.constant 3 : index
    %c0_44 = arith.constant 0 : index
    %c0_45 = arith.constant 0 : index
    %99 = vector.load %arg12[%c3, %c0_44, %c0_45] : memref<9x9x25xbf16, #tpu.memory_space<vmem>>, vector<1x9x25xbf16>
    %100 = vector.shape_cast %99 : vector<1x9x25xbf16> to vector<9x25xbf16>
    %cst_46 = arith.constant dense<0.000000e+00> : vector<64x25xf32>
    %101 = tpu.matmul %98, %100, %cst_46 {dimension_numbers = #tpu.dot_dimension_numbers<[1], [0], [0], [1], [0, 0, 1, 1], [], []>} : vector<64x9xbf16>, vector<9x25xbf16>, vector<64x25xf32> -> vector<64x25xf32>
    %102 = arith.addf %96, %101 : vector<64x25xf32>
    %103 = vector.extract_strided_slice %79 {offsets = [256, 0], sizes = [64, 9], strides = [1, 1]} : vector<576x9xf32> to vector<64x9xf32>
    %104 = arith.truncf %103 : vector<64x9xf32> to vector<64x9xbf16>
    %c4 = arith.constant 4 : index
    %c0_47 = arith.constant 0 : index
    %c0_48 = arith.constant 0 : index
    %105 = vector.load %arg12[%c4, %c0_47, %c0_48] : memref<9x9x25xbf16, #tpu.memory_space<vmem>>, vector<1x9x25xbf16>
    %106 = vector.shape_cast %105 : vector<1x9x25xbf16> to vector<9x25xbf16>
    %cst_49 = arith.constant dense<0.000000e+00> : vector<64x25xf32>
    %107 = tpu.matmul %104, %106, %cst_49 {dimension_numbers = #tpu.dot_dimension_numbers<[1], [0], [0], [1], [0, 0, 1, 1], [], []>} : vector<64x9xbf16>, vector<9x25xbf16>, vector<64x25xf32> -> vector<64x25xf32>
    %108 = arith.addf %102, %107 : vector<64x25xf32>
    %109 = vector.extract_strided_slice %79 {offsets = [320, 0], sizes = [64, 9], strides = [1, 1]} : vector<576x9xf32> to vector<64x9xf32>
    %110 = arith.truncf %109 : vector<64x9xf32> to vector<64x9xbf16>
    %c5 = arith.constant 5 : index
    %c0_50 = arith.constant 0 : index
    %c0_51 = arith.constant 0 : index
    %111 = vector.load %arg12[%c5, %c0_50, %c0_51] : memref<9x9x25xbf16, #tpu.memory_space<vmem>>, vector<1x9x25xbf16>
    %112 = vector.shape_cast %111 : vector<1x9x25xbf16> to vector<9x25xbf16>
    %cst_52 = arith.constant dense<0.000000e+00> : vector<64x25xf32>
    %113 = tpu.matmul %110, %112, %cst_52 {dimension_numbers = #tpu.dot_dimension_numbers<[1], [0], [0], [1], [0, 0, 1, 1], [], []>} : vector<64x9xbf16>, vector<9x25xbf16>, vector<64x25xf32> -> vector<64x25xf32>
    %114 = arith.addf %108, %113 : vector<64x25xf32>
    %115 = vector.extract_strided_slice %79 {offsets = [384, 0], sizes = [64, 9], strides = [1, 1]} : vector<576x9xf32> to vector<64x9xf32>
    %116 = arith.truncf %115 : vector<64x9xf32> to vector<64x9xbf16>
    %c6 = arith.constant 6 : index
    %c0_53 = arith.constant 0 : index
    %c0_54 = arith.constant 0 : index
    %117 = vector.load %arg12[%c6, %c0_53, %c0_54] : memref<9x9x25xbf16, #tpu.memory_space<vmem>>, vector<1x9x25xbf16>
    %118 = vector.shape_cast %117 : vector<1x9x25xbf16> to vector<9x25xbf16>
    %cst_55 = arith.constant dense<0.000000e+00> : vector<64x25xf32>
    %119 = tpu.matmul %116, %118, %cst_55 {dimension_numbers = #tpu.dot_dimension_numbers<[1], [0], [0], [1], [0, 0, 1, 1], [], []>} : vector<64x9xbf16>, vector<9x25xbf16>, vector<64x25xf32> -> vector<64x25xf32>
    %120 = arith.addf %114, %119 : vector<64x25xf32>
    %121 = vector.extract_strided_slice %79 {offsets = [448, 0], sizes = [64, 9], strides = [1, 1]} : vector<576x9xf32> to vector<64x9xf32>
    %122 = arith.truncf %121 : vector<64x9xf32> to vector<64x9xbf16>
    %c7 = arith.constant 7 : index
    %c0_56 = arith.constant 0 : index
    %c0_57 = arith.constant 0 : index
    %123 = vector.load %arg12[%c7, %c0_56, %c0_57] : memref<9x9x25xbf16, #tpu.memory_space<vmem>>, vector<1x9x25xbf16>
    %124 = vector.shape_cast %123 : vector<1x9x25xbf16> to vector<9x25xbf16>
    %cst_58 = arith.constant dense<0.000000e+00> : vector<64x25xf32>
    %125 = tpu.matmul %122, %124, %cst_58 {dimension_numbers = #tpu.dot_dimension_numbers<[1], [0], [0], [1], [0, 0, 1, 1], [], []>} : vector<64x9xbf16>, vector<9x25xbf16>, vector<64x25xf32> -> vector<64x25xf32>
    %126 = arith.addf %120, %125 : vector<64x25xf32>
    %127 = vector.extract_strided_slice %79 {offsets = [512, 0], sizes = [64, 9], strides = [1, 1]} : vector<576x9xf32> to vector<64x9xf32>
    %128 = arith.truncf %127 : vector<64x9xf32> to vector<64x9xbf16>
    %c8 = arith.constant 8 : index
    %c0_59 = arith.constant 0 : index
    %c0_60 = arith.constant 0 : index
    %129 = vector.load %arg12[%c8, %c0_59, %c0_60] : memref<9x9x25xbf16, #tpu.memory_space<vmem>>, vector<1x9x25xbf16>
    %130 = vector.shape_cast %129 : vector<1x9x25xbf16> to vector<9x25xbf16>
    %cst_61 = arith.constant dense<0.000000e+00> : vector<64x25xf32>
    %131 = tpu.matmul %128, %130, %cst_61 {dimension_numbers = #tpu.dot_dimension_numbers<[1], [0], [0], [1], [0, 0, 1, 1], [], []>} : vector<64x9xbf16>, vector<9x25xbf16>, vector<64x25xf32> -> vector<64x25xf32>
    %132 = arith.addf %126, %131 : vector<64x25xf32>
    %c0_62 = arith.constant 0 : index
    %c0_63 = arith.constant 0 : index
    %133 = vector.load %arg13[%c0_62, %c0_63] : memref<64x1xf32, #tpu.memory_space<vmem>>, vector<64x1xf32>
    %134 = vector.broadcast %133 : vector<64x1xf32> to vector<64x25xf32>
    %135 = arith.addf %132, %134 : vector<64x25xf32>
    %cst_64 = arith.constant 0.000000e+00 : f32
    %136 = vector.broadcast %cst_64 : f32 to vector<64x25xf32>
    %137 = arith.cmpf oge, %135, %136 : vector<64x25xf32>
    %cst_65 = arith.constant 0.00999999977 : f32
    %138 = vector.broadcast %cst_65 : f32 to vector<64x25xf32>
    %139 = arith.mulf %138, %135 : vector<64x25xf32>
    %140 = arith.select %137, %135, %139 : vector<64x25xi1>, vector<64x25xf32>
    %141 = arith.truncf %140 : vector<64x25xf32> to vector<64x25xbf16>
    %c0_66 = arith.constant 0 : index
    %c0_67 = arith.constant 0 : index
    %142 = vector.load %arg14[%c0_66, %c0_67] : memref<256x64xbf16, #tpu.memory_space<vmem>>, vector<256x64xbf16>
    %cst_68 = arith.constant dense<0.000000e+00> : vector<256x25xf32>
    %143 = tpu.matmul %142, %141, %cst_68 {dimension_numbers = #tpu.dot_dimension_numbers<[1], [0], [0], [1], [0, 0, 1, 1], [], []>} : vector<256x64xbf16>, vector<64x25xbf16>, vector<256x25xf32> -> vector<256x25xf32>
    %144 = vector.extract_strided_slice %143 {offsets = [0, 0], sizes = [16, 25], strides = [1, 1]} : vector<256x25xf32> to vector<16x25xf32>
    %145 = arith.truncf %144 : vector<16x25xf32> to vector<16x25xbf16>
    %c0_69 = arith.constant 0 : index
    %c0_70 = arith.constant 0 : index
    %c0_71 = arith.constant 0 : index
    %146 = vector.load %arg15[%c0_69, %c0_70, %c0_71] : memref<16x25x196xbf16, #tpu.memory_space<vmem>>, vector<1x25x196xbf16>
    %147 = vector.shape_cast %146 : vector<1x25x196xbf16> to vector<25x196xbf16>
    %cst_72 = arith.constant dense<0.000000e+00> : vector<16x196xf32>
    %148 = tpu.matmul %145, %147, %cst_72 {dimension_numbers = #tpu.dot_dimension_numbers<[1], [0], [0], [1], [0, 0, 1, 1], [], []>} : vector<16x25xbf16>, vector<25x196xbf16>, vector<16x196xf32> -> vector<16x196xf32>
    %149 = vector.extract_strided_slice %143 {offsets = [16, 0], sizes = [16, 25], strides = [1, 1]} : vector<256x25xf32> to vector<16x25xf32>
    %150 = arith.truncf %149 : vector<16x25xf32> to vector<16x25xbf16>
    %c1_73 = arith.constant 1 : index
    %c0_74 = arith.constant 0 : index
    %c0_75 = arith.constant 0 : index
    %151 = vector.load %arg15[%c1_73, %c0_74, %c0_75] : memref<16x25x196xbf16, #tpu.memory_space<vmem>>, vector<1x25x196xbf16>
    %152 = vector.shape_cast %151 : vector<1x25x196xbf16> to vector<25x196xbf16>
    %cst_76 = arith.constant dense<0.000000e+00> : vector<16x196xf32>
    %153 = tpu.matmul %150, %152, %cst_76 {dimension_numbers = #tpu.dot_dimension_numbers<[1], [0], [0], [1], [0, 0, 1, 1], [], []>} : vector<16x25xbf16>, vector<25x196xbf16>, vector<16x196xf32> -> vector<16x196xf32>
    %154 = arith.addf %148, %153 : vector<16x196xf32>
    %155 = vector.extract_strided_slice %143 {offsets = [32, 0], sizes = [16, 25], strides = [1, 1]} : vector<256x25xf32> to vector<16x25xf32>
    %156 = arith.truncf %155 : vector<16x25xf32> to vector<16x25xbf16>
    %c2_77 = arith.constant 2 : index
    %c0_78 = arith.constant 0 : index
    %c0_79 = arith.constant 0 : index
    %157 = vector.load %arg15[%c2_77, %c0_78, %c0_79] : memref<16x25x196xbf16, #tpu.memory_space<vmem>>, vector<1x25x196xbf16>
    %158 = vector.shape_cast %157 : vector<1x25x196xbf16> to vector<25x196xbf16>
    %cst_80 = arith.constant dense<0.000000e+00> : vector<16x196xf32>
    %159 = tpu.matmul %156, %158, %cst_80 {dimension_numbers = #tpu.dot_dimension_numbers<[1], [0], [0], [1], [0, 0, 1, 1], [], []>} : vector<16x25xbf16>, vector<25x196xbf16>, vector<16x196xf32> -> vector<16x196xf32>
    %160 = arith.addf %154, %159 : vector<16x196xf32>
    %161 = vector.extract_strided_slice %143 {offsets = [48, 0], sizes = [16, 25], strides = [1, 1]} : vector<256x25xf32> to vector<16x25xf32>
    %162 = arith.truncf %161 : vector<16x25xf32> to vector<16x25xbf16>
    %c3_81 = arith.constant 3 : index
    %c0_82 = arith.constant 0 : index
    %c0_83 = arith.constant 0 : index
    %163 = vector.load %arg15[%c3_81, %c0_82, %c0_83] : memref<16x25x196xbf16, #tpu.memory_space<vmem>>, vector<1x25x196xbf16>
    %164 = vector.shape_cast %163 : vector<1x25x196xbf16> to vector<25x196xbf16>
    %cst_84 = arith.constant dense<0.000000e+00> : vector<16x196xf32>
    %165 = tpu.matmul %162, %164, %cst_84 {dimension_numbers = #tpu.dot_dimension_numbers<[1], [0], [0], [1], [0, 0, 1, 1], [], []>} : vector<16x25xbf16>, vector<25x196xbf16>, vector<16x196xf32> -> vector<16x196xf32>
    %166 = arith.addf %160, %165 : vector<16x196xf32>
    %167 = vector.extract_strided_slice %143 {offsets = [64, 0], sizes = [16, 25], strides = [1, 1]} : vector<256x25xf32> to vector<16x25xf32>
    %168 = arith.truncf %167 : vector<16x25xf32> to vector<16x25xbf16>
    %c4_85 = arith.constant 4 : index
    %c0_86 = arith.constant 0 : index
    %c0_87 = arith.constant 0 : index
    %169 = vector.load %arg15[%c4_85, %c0_86, %c0_87] : memref<16x25x196xbf16, #tpu.memory_space<vmem>>, vector<1x25x196xbf16>
    %170 = vector.shape_cast %169 : vector<1x25x196xbf16> to vector<25x196xbf16>
    %cst_88 = arith.constant dense<0.000000e+00> : vector<16x196xf32>
    %171 = tpu.matmul %168, %170, %cst_88 {dimension_numbers = #tpu.dot_dimension_numbers<[1], [0], [0], [1], [0, 0, 1, 1], [], []>} : vector<16x25xbf16>, vector<25x196xbf16>, vector<16x196xf32> -> vector<16x196xf32>
    %172 = arith.addf %166, %171 : vector<16x196xf32>
    %173 = vector.extract_strided_slice %143 {offsets = [80, 0], sizes = [16, 25], strides = [1, 1]} : vector<256x25xf32> to vector<16x25xf32>
    %174 = arith.truncf %173 : vector<16x25xf32> to vector<16x25xbf16>
    %c5_89 = arith.constant 5 : index
    %c0_90 = arith.constant 0 : index
    %c0_91 = arith.constant 0 : index
    %175 = vector.load %arg15[%c5_89, %c0_90, %c0_91] : memref<16x25x196xbf16, #tpu.memory_space<vmem>>, vector<1x25x196xbf16>
    %176 = vector.shape_cast %175 : vector<1x25x196xbf16> to vector<25x196xbf16>
    %cst_92 = arith.constant dense<0.000000e+00> : vector<16x196xf32>
    %177 = tpu.matmul %174, %176, %cst_92 {dimension_numbers = #tpu.dot_dimension_numbers<[1], [0], [0], [1], [0, 0, 1, 1], [], []>} : vector<16x25xbf16>, vector<25x196xbf16>, vector<16x196xf32> -> vector<16x196xf32>
    %178 = arith.addf %172, %177 : vector<16x196xf32>
    %179 = vector.extract_strided_slice %143 {offsets = [96, 0], sizes = [16, 25], strides = [1, 1]} : vector<256x25xf32> to vector<16x25xf32>
    %180 = arith.truncf %179 : vector<16x25xf32> to vector<16x25xbf16>
    %c6_93 = arith.constant 6 : index
    %c0_94 = arith.constant 0 : index
    %c0_95 = arith.constant 0 : index
    %181 = vector.load %arg15[%c6_93, %c0_94, %c0_95] : memref<16x25x196xbf16, #tpu.memory_space<vmem>>, vector<1x25x196xbf16>
    %182 = vector.shape_cast %181 : vector<1x25x196xbf16> to vector<25x196xbf16>
    %cst_96 = arith.constant dense<0.000000e+00> : vector<16x196xf32>
    %183 = tpu.matmul %180, %182, %cst_96 {dimension_numbers = #tpu.dot_dimension_numbers<[1], [0], [0], [1], [0, 0, 1, 1], [], []>} : vector<16x25xbf16>, vector<25x196xbf16>, vector<16x196xf32> -> vector<16x196xf32>
    %184 = arith.addf %178, %183 : vector<16x196xf32>
    %185 = vector.extract_strided_slice %143 {offsets = [112, 0], sizes = [16, 25], strides = [1, 1]} : vector<256x25xf32> to vector<16x25xf32>
    %186 = arith.truncf %185 : vector<16x25xf32> to vector<16x25xbf16>
    %c7_97 = arith.constant 7 : index
    %c0_98 = arith.constant 0 : index
    %c0_99 = arith.constant 0 : index
    %187 = vector.load %arg15[%c7_97, %c0_98, %c0_99] : memref<16x25x196xbf16, #tpu.memory_space<vmem>>, vector<1x25x196xbf16>
    %188 = vector.shape_cast %187 : vector<1x25x196xbf16> to vector<25x196xbf16>
    %cst_100 = arith.constant dense<0.000000e+00> : vector<16x196xf32>
    %189 = tpu.matmul %186, %188, %cst_100 {dimension_numbers = #tpu.dot_dimension_numbers<[1], [0], [0], [1], [0, 0, 1, 1], [], []>} : vector<16x25xbf16>, vector<25x196xbf16>, vector<16x196xf32> -> vector<16x196xf32>
    %190 = arith.addf %184, %189 : vector<16x196xf32>
    %191 = vector.extract_strided_slice %143 {offsets = [128, 0], sizes = [16, 25], strides = [1, 1]} : vector<256x25xf32> to vector<16x25xf32>
    %192 = arith.truncf %191 : vector<16x25xf32> to vector<16x25xbf16>
    %c8_101 = arith.constant 8 : index
    %c0_102 = arith.constant 0 : index
    %c0_103 = arith.constant 0 : index
    %193 = vector.load %arg15[%c8_101, %c0_102, %c0_103] : memref<16x25x196xbf16, #tpu.memory_space<vmem>>, vector<1x25x196xbf16>
    %194 = vector.shape_cast %193 : vector<1x25x196xbf16> to vector<25x196xbf16>
    %cst_104 = arith.constant dense<0.000000e+00> : vector<16x196xf32>
    %195 = tpu.matmul %192, %194, %cst_104 {dimension_numbers = #tpu.dot_dimension_numbers<[1], [0], [0], [1], [0, 0, 1, 1], [], []>} : vector<16x25xbf16>, vector<25x196xbf16>, vector<16x196xf32> -> vector<16x196xf32>
    %196 = arith.addf %190, %195 : vector<16x196xf32>
    %197 = vector.extract_strided_slice %143 {offsets = [144, 0], sizes = [16, 25], strides = [1, 1]} : vector<256x25xf32> to vector<16x25xf32>
    %198 = arith.truncf %197 : vector<16x25xf32> to vector<16x25xbf16>
    %c9 = arith.constant 9 : index
    %c0_105 = arith.constant 0 : index
    %c0_106 = arith.constant 0 : index
    %199 = vector.load %arg15[%c9, %c0_105, %c0_106] : memref<16x25x196xbf16, #tpu.memory_space<vmem>>, vector<1x25x196xbf16>
    %200 = vector.shape_cast %199 : vector<1x25x196xbf16> to vector<25x196xbf16>
    %cst_107 = arith.constant dense<0.000000e+00> : vector<16x196xf32>
    %201 = tpu.matmul %198, %200, %cst_107 {dimension_numbers = #tpu.dot_dimension_numbers<[1], [0], [0], [1], [0, 0, 1, 1], [], []>} : vector<16x25xbf16>, vector<25x196xbf16>, vector<16x196xf32> -> vector<16x196xf32>
    %202 = arith.addf %196, %201 : vector<16x196xf32>
    %203 = vector.extract_strided_slice %143 {offsets = [160, 0], sizes = [16, 25], strides = [1, 1]} : vector<256x25xf32> to vector<16x25xf32>
    %204 = arith.truncf %203 : vector<16x25xf32> to vector<16x25xbf16>
    %c10 = arith.constant 10 : index
    %c0_108 = arith.constant 0 : index
    %c0_109 = arith.constant 0 : index
    %205 = vector.load %arg15[%c10, %c0_108, %c0_109] : memref<16x25x196xbf16, #tpu.memory_space<vmem>>, vector<1x25x196xbf16>
    %206 = vector.shape_cast %205 : vector<1x25x196xbf16> to vector<25x196xbf16>
    %cst_110 = arith.constant dense<0.000000e+00> : vector<16x196xf32>
    %207 = tpu.matmul %204, %206, %cst_110 {dimension_numbers = #tpu.dot_dimension_numbers<[1], [0], [0], [1], [0, 0, 1, 1], [], []>} : vector<16x25xbf16>, vector<25x196xbf16>, vector<16x196xf32> -> vector<16x196xf32>
    %208 = arith.addf %202, %207 : vector<16x196xf32>
    %209 = vector.extract_strided_slice %143 {offsets = [176, 0], sizes = [16, 25], strides = [1, 1]} : vector<256x25xf32> to vector<16x25xf32>
    %210 = arith.truncf %209 : vector<16x25xf32> to vector<16x25xbf16>
    %c11 = arith.constant 11 : index
    %c0_111 = arith.constant 0 : index
    %c0_112 = arith.constant 0 : index
    %211 = vector.load %arg15[%c11, %c0_111, %c0_112] : memref<16x25x196xbf16, #tpu.memory_space<vmem>>, vector<1x25x196xbf16>
    %212 = vector.shape_cast %211 : vector<1x25x196xbf16> to vector<25x196xbf16>
    %cst_113 = arith.constant dense<0.000000e+00> : vector<16x196xf32>
    %213 = tpu.matmul %210, %212, %cst_113 {dimension_numbers = #tpu.dot_dimension_numbers<[1], [0], [0], [1], [0, 0, 1, 1], [], []>} : vector<16x25xbf16>, vector<25x196xbf16>, vector<16x196xf32> -> vector<16x196xf32>
    %214 = arith.addf %208, %213 : vector<16x196xf32>
    %215 = vector.extract_strided_slice %143 {offsets = [192, 0], sizes = [16, 25], strides = [1, 1]} : vector<256x25xf32> to vector<16x25xf32>
    %216 = arith.truncf %215 : vector<16x25xf32> to vector<16x25xbf16>
    %c12 = arith.constant 12 : index
    %c0_114 = arith.constant 0 : index
    %c0_115 = arith.constant 0 : index
    %217 = vector.load %arg15[%c12, %c0_114, %c0_115] : memref<16x25x196xbf16, #tpu.memory_space<vmem>>, vector<1x25x196xbf16>
    %218 = vector.shape_cast %217 : vector<1x25x196xbf16> to vector<25x196xbf16>
    %cst_116 = arith.constant dense<0.000000e+00> : vector<16x196xf32>
    %219 = tpu.matmul %216, %218, %cst_116 {dimension_numbers = #tpu.dot_dimension_numbers<[1], [0], [0], [1], [0, 0, 1, 1], [], []>} : vector<16x25xbf16>, vector<25x196xbf16>, vector<16x196xf32> -> vector<16x196xf32>
    %220 = arith.addf %214, %219 : vector<16x196xf32>
    %221 = vector.extract_strided_slice %143 {offsets = [208, 0], sizes = [16, 25], strides = [1, 1]} : vector<256x25xf32> to vector<16x25xf32>
    %222 = arith.truncf %221 : vector<16x25xf32> to vector<16x25xbf16>
    %c13 = arith.constant 13 : index
    %c0_117 = arith.constant 0 : index
    %c0_118 = arith.constant 0 : index
    %223 = vector.load %arg15[%c13, %c0_117, %c0_118] : memref<16x25x196xbf16, #tpu.memory_space<vmem>>, vector<1x25x196xbf16>
    %224 = vector.shape_cast %223 : vector<1x25x196xbf16> to vector<25x196xbf16>
    %cst_119 = arith.constant dense<0.000000e+00> : vector<16x196xf32>
    %225 = tpu.matmul %222, %224, %cst_119 {dimension_numbers = #tpu.dot_dimension_numbers<[1], [0], [0], [1], [0, 0, 1, 1], [], []>} : vector<16x25xbf16>, vector<25x196xbf16>, vector<16x196xf32> -> vector<16x196xf32>
    %226 = arith.addf %220, %225 : vector<16x196xf32>
    %227 = vector.extract_strided_slice %143 {offsets = [224, 0], sizes = [16, 25], strides = [1, 1]} : vector<256x25xf32> to vector<16x25xf32>
    %228 = arith.truncf %227 : vector<16x25xf32> to vector<16x25xbf16>
    %c14 = arith.constant 14 : index
    %c0_120 = arith.constant 0 : index
    %c0_121 = arith.constant 0 : index
    %229 = vector.load %arg15[%c14, %c0_120, %c0_121] : memref<16x25x196xbf16, #tpu.memory_space<vmem>>, vector<1x25x196xbf16>
    %230 = vector.shape_cast %229 : vector<1x25x196xbf16> to vector<25x196xbf16>
    %cst_122 = arith.constant dense<0.000000e+00> : vector<16x196xf32>
    %231 = tpu.matmul %228, %230, %cst_122 {dimension_numbers = #tpu.dot_dimension_numbers<[1], [0], [0], [1], [0, 0, 1, 1], [], []>} : vector<16x25xbf16>, vector<25x196xbf16>, vector<16x196xf32> -> vector<16x196xf32>
    %232 = arith.addf %226, %231 : vector<16x196xf32>
    %233 = vector.extract_strided_slice %143 {offsets = [240, 0], sizes = [16, 25], strides = [1, 1]} : vector<256x25xf32> to vector<16x25xf32>
    %234 = arith.truncf %233 : vector<16x25xf32> to vector<16x25xbf16>
    %c15 = arith.constant 15 : index
    %c0_123 = arith.constant 0 : index
    %c0_124 = arith.constant 0 : index
    %235 = vector.load %arg15[%c15, %c0_123, %c0_124] : memref<16x25x196xbf16, #tpu.memory_space<vmem>>, vector<1x25x196xbf16>
    %236 = vector.shape_cast %235 : vector<1x25x196xbf16> to vector<25x196xbf16>
    %cst_125 = arith.constant dense<0.000000e+00> : vector<16x196xf32>
    %237 = tpu.matmul %234, %236, %cst_125 {dimension_numbers = #tpu.dot_dimension_numbers<[1], [0], [0], [1], [0, 0, 1, 1], [], []>} : vector<16x25xbf16>, vector<25x196xbf16>, vector<16x196xf32> -> vector<16x196xf32>
    %238 = arith.addf %232, %237 : vector<16x196xf32>
    %c0_126 = arith.constant 0 : index
    %c0_127 = arith.constant 0 : index
    %239 = vector.load %arg16[%c0_126, %c0_127] : memref<16x1xf32, #tpu.memory_space<vmem>>, vector<16x1xf32>
    %240 = vector.broadcast %239 : vector<16x1xf32> to vector<16x196xf32>
    %241 = arith.addf %238, %240 : vector<16x196xf32>
    %cst_128 = arith.constant 0.000000e+00 : f32
    %242 = vector.broadcast %cst_128 : f32 to vector<16x196xf32>
    %243 = arith.cmpf oge, %241, %242 : vector<16x196xf32>
    %cst_129 = arith.constant 0.00999999977 : f32
    %244 = vector.broadcast %cst_129 : f32 to vector<16x196xf32>
    %245 = arith.mulf %244, %241 : vector<16x196xf32>
    %246 = arith.select %243, %241, %245 : vector<16x196xi1>, vector<16x196xf32>
    %247 = arith.truncf %246 : vector<16x196xf32> to vector<16x196xbf16>
    %c0_130 = arith.constant 0 : index
    %c0_131 = arith.constant 0 : index
    %248 = vector.load %arg17[%c0_130, %c0_131] : memref<4x16xbf16, #tpu.memory_space<vmem>>, vector<4x16xbf16>
    %cst_132 = arith.constant dense<0.000000e+00> : vector<4x196xf32>
    %249 = tpu.matmul %248, %247, %cst_132 {dimension_numbers = #tpu.dot_dimension_numbers<[1], [0], [0], [1], [0, 0, 1, 1], [], []>} : vector<4x16xbf16>, vector<16x196xbf16>, vector<4x196xf32> -> vector<4x196xf32>
    %c0_133 = arith.constant 0 : index
    %c0_134 = arith.constant 0 : index
    %250 = vector.load %arg18[%c0_133, %c0_134] : memref<1x1xf32, #tpu.memory_space<vmem>>, vector<1x1xf32>
    %251 = vector.broadcast %250 : vector<1x1xf32> to vector<4x196xf32>
    %252 = arith.addf %249, %251 : vector<4x196xf32>
    %253 = math.tanh %252 : vector<4x196xf32>
    %c0_135 = arith.constant 0 : index
    %c0_136 = arith.constant 0 : index
    %c0_137 = arith.constant 0 : index
    %254 = vector.load %arg19[%c0_135, %c0_136, %c0_137] : memref<1x4x196xf32, #tpu.memory_space<vmem>>, vector<1x4x196xf32>
    %255 = vector.shape_cast %254 : vector<1x4x196xf32> to vector<4x196xf32>
    %256 = vector.shape_cast %253 : vector<4x196xf32> to vector<1x4x196xf32>
    tpu.vector_store %arg19[%c0_135, %c0_136, %c0_137], %256 {strides = array<i32>} : memref<1x4x196xf32, #tpu.memory_space<vmem>>, vector<1x4x196xf32>,
    return
  }
  func.func @transform_0(%arg0: i32) -> (i32, i32, i32) {
    %c0_i32 = arith.constant 0 : i32
    %c0_i32_0 = arith.constant 0 : i32
    %c0_i32_1 = arith.constant 0 : i32
    return %arg0, %c0_i32, %c0_i32_0 : i32, i32, i32
  }
  func.func @transform_1(%arg0: i32) -> (i32, i32) {
    %c0_i32 = arith.constant 0 : i32
    %c0_i32_0 = arith.constant 0 : i32
    %c0_i32_1 = arith.constant 0 : i32
    return %c0_i32, %c0_i32_0 : i32, i32
  }
  func.func @transform_2(%arg0: i32) -> (i32, i32) {
    %c0_i32 = arith.constant 0 : i32
    %c0_i32_0 = arith.constant 0 : i32
    %c0_i32_1 = arith.constant 0 : i32
    return %c0_i32, %c0_i32_0 : i32, i32
  }
  func.func @transform_3(%arg0: i32) -> (i32, i32) {
    %c0_i32 = arith.constant 0 : i32
    %c0_i32_0 = arith.constant 0 : i32
    %c0_i32_1 = arith.constant 0 : i32
    return %c0_i32, %c0_i32_0 : i32, i32
  }
  func.func @transform_4(%arg0: i32) -> (i32, i32) {
    %c0_i32 = arith.constant 0 : i32
    %c0_i32_0 = arith.constant 0 : i32
    %c0_i32_1 = arith.constant 0 : i32
    return %c0_i32, %c0_i32_0 : i32, i32
  }
  func.func @transform_5(%arg0: i32) -> (i32, i32) {
    %c0_i32 = arith.constant 0 : i32
    %c0_i32_0 = arith.constant 0 : i32
    %c0_i32_1 = arith.constant 0 : i32
    return %c0_i32, %c0_i32_0 : i32, i32
  }
  func.func @transform_6(%arg0: i32) -> (i32, i32) {
    %c0_i32 = arith.constant 0 : i32
    %c0_i32_0 = arith.constant 0 : i32
    %c0_i32_1 = arith.constant 0 : i32
    return %c0_i32, %c0_i32_0 : i32, i32
  }
  func.func @transform_7(%arg0: i32) -> (i32, i32) {
    %c0_i32 = arith.constant 0 : i32
    %c0_i32_0 = arith.constant 0 : i32
    %c0_i32_1 = arith.constant 0 : i32
    return %c0_i32, %c0_i32_0 : i32, i32
  }
  func.func @transform_8(%arg0: i32) -> (i32, i32) {
    %c0_i32 = arith.constant 0 : i32
    %c0_i32_0 = arith.constant 0 : i32
    %c0_i32_1 = arith.constant 0 : i32
    return %c0_i32, %c0_i32_0 : i32, i32
  }
  func.func @transform_9(%arg0: i32) -> (i32, i32) {
    %c0_i32 = arith.constant 0 : i32
    %c0_i32_0 = arith.constant 0 : i32
    %c0_i32_1 = arith.constant 0 : i32
    return %c0_i32, %c0_i32_0 : i32, i32
  }
  func.func @transform_10(%arg0: i32) -> (i32, i32) {
    %c0_i32 = arith.constant 0 : i32
    %c0_i32_0 = arith.constant 0 : i32
    %c0_i32_1 = arith.constant 0 : i32
    return %c0_i32, %c0_i32_0 : i32, i32
  }
  func.func @transform_11(%arg0: i32) -> (i32, i32, i32) {
    %c0_i32 = arith.constant 0 : i32
    %c0_i32_0 = arith.constant 0 : i32
    %c0_i32_1 = arith.constant 0 : i32
    %c0_i32_2 = arith.constant 0 : i32
    return %c0_i32, %c0_i32_0, %c0_i32_1 : i32, i32, i32
  }
  func.func @transform_12(%arg0: i32) -> (i32, i32) {
    %c0_i32 = arith.constant 0 : i32
    %c0_i32_0 = arith.constant 0 : i32
    %c0_i32_1 = arith.constant 0 : i32
    return %c0_i32, %c0_i32_0 : i32, i32
  }
  func.func @transform_13(%arg0: i32) -> (i32, i32) {
    %c0_i32 = arith.constant 0 : i32
    %c0_i32_0 = arith.constant 0 : i32
    %c0_i32_1 = arith.constant 0 : i32
    return %c0_i32, %c0_i32_0 : i32, i32
  }
  func.func @transform_14(%arg0: i32) -> (i32, i32, i32) {
    %c0_i32 = arith.constant 0 : i32
    %c0_i32_0 = arith.constant 0 : i32
    %c0_i32_1 = arith.constant 0 : i32
    %c0_i32_2 = arith.constant 0 : i32
    return %c0_i32, %c0_i32_0, %c0_i32_1 : i32, i32, i32
  }
  func.func @transform_15(%arg0: i32) -> (i32, i32) {
    %c0_i32 = arith.constant 0 : i32
    %c0_i32_0 = arith.constant 0 : i32
    %c0_i32_1 = arith.constant 0 : i32
    return %c0_i32, %c0_i32_0 : i32, i32
  }
  func.func @transform_16(%arg0: i32) -> (i32, i32) {
    %c0_i32 = arith.constant 0 : i32
    %c0_i32_0 = arith.constant 0 : i32
    %c0_i32_1 = arith.constant 0 : i32
    return %c0_i32, %c0_i32_0 : i32, i32
  }
  func.func @transform_17(%arg0: i32) -> (i32, i32) {
    %c0_i32 = arith.constant 0 : i32
    %c0_i32_0 = arith.constant 0 : i32
    %c0_i32_1 = arith.constant 0 : i32
    return %c0_i32, %c0_i32_0 : i32, i32
  }
  func.func @transform_18(%arg0: i32) -> (i32, i32, i32) {
    %c0_i32 = arith.constant 0 : i32
    %c0_i32_0 = arith.constant 0 : i32
    %c0_i32_1 = arith.constant 0 : i32
    return %arg0, %c0_i32, %c0_i32_0 : i32, i32, i32
  }
}

</mosaic_0001>

<bundles_post_ra>
// kernel: autoencoder_forward.1
= control target key start
LH: loop header
LB: loop body
LE: loop exit
PB: predicated region body
PF: predicated region fallthrough
CT: control target
= control target key end

     0   :  { %s6003_s29 = smov 0   ;;  %s6923_s0 = inlined_call_operand.vmem [shape: bf16[2,9,256], index: 0, kind: input, shape index: {}]   ;;  %s6924_s1 = inlined_call_operand.vmem [shape: bf16[64,9], index: 1, kind: input, shape index: {}]   ;;  %s6925_s2 = inlined_call_operand.vmem [shape: f32[64,1], index: 2, kind: input, shape index: {}]   ;;  %s6926_s3 = inlined_call_operand.vmem [shape: bf16[64,144], index: 3, kind: input, shape index: {}]   ;;  %s6927_s4 = inlined_call_operand.vmem [shape: bf16[16,576], index: 4, kind: input, shape index: {}]   ;;  %s6928_s5 = inlined_call_operand.vmem [shape: f32[16,1], index: 5, kind: input, shape index: {}]   ;;  %s6929_s6 = inlined_call_operand.vmem [shape: bf16[16,36], index: 6, kind: input, shape index: {}]   ;;  %s6930_s7 = inlined_call_operand.vmem [shape: bf16[9,81], index: 7, kind: input, shape index: {}]   ;;  %s6931_s8 = inlined_call_operand.vmem [shape: bf16[16,144], index: 8, kind: input, shape index: {}]   ;;  %s6932_s9 = inlined_call_operand.vmem [shape: f32[16,1], index: 9, kind: input, shape index: {}]   ;;  %s6933_s10 = inlined_call_operand.vmem [shape: bf16[576,16], index: 10, kind: input, shape index: {}]   ;;  %s6934_s11 = inlined_call_operand.vmem [shape: bf16[9,9,25], index: 11, kind: input, shape index: {}]   ;;  %s6935_s12 = inlined_call_operand.vmem [shape: f32[64,1], index: 12, kind: input, shape index: {}]   ;;  %s6936_s13 = inlined_call_operand.vmem [shape: bf16[256,64], index: 13, kind: input, shape index: {}]   ;;  %s6937_s14 = inlined_call_operand.vmem [shape: bf16[16,25,196], index: 14, kind: input, shape index: {}]   ;;  %s6938_s15 = inlined_call_operand.vmem [shape: f32[16,1], index: 15, kind: input, shape index: {}]   ;;  %s6939_s16 = inlined_call_operand.vmem [shape: bf16[4,16], index: 16, kind: input, shape index: {}]   ;;  %s6940_s17 = inlined_call_operand.<no memory space> [shape: f32[1,1], index: 17, kind: input, shape index: {}]   ;;  %s6941_s18 = inlined_call_operand.vmem [shape: f32[2,4,196], index: 18, kind: output, shape index: {}]  }
   0x1   :  { %6944 = sst [smem:[#allocation3_spill]] %s6923_s0  ;;  %v23_v0 = vstv %s6940_s17 }
   0x2   :  { %6945 = sst [smem:[#allocation4_spill]] %s6924_s1  ;;  %24 = vst [vmem:[#allocation2] sm:$0x1] %v23_v0 }
   0x3   :  { %6946 = sst [smem:[#allocation5_spill]] %s6925_s2 }
   0x4 LB: > { %s4909_s30 = sadd.s32 4294967295, %s5884_s29   ;;  %p4913_p0 = scmp.ge.s32.totalorder %s5884_s29, 1  ;;  %s5884_s29 = sphi %s6003_s29, %s30_s29  }
   0x5   : > { %p514_p1 = scmp.lt.s32.totalorder %s5884_s29, 3 }
   0x7   : > { %p515_p2 = pnand %p4913_p0, %p514_p1 }
   0x8   : > { %p568_p3 = scmp.lt.s32.totalorder (!%p515_p2), %s4909_s30, 1  ;;  %s6947_s1 = sld [smem:[#allocation3_spill]] (!%p515_p2) }
   0x9   : > { %518 = sbr.rel (%p515_p2) target bundleno = 3214 (0xc8e), region = 92  ;;  %s6948_s2 = sld [smem:[#allocation5_spill]] (!%p515_p2) }
   0xa   : > { %s5888_s21 = smov (!%p515_p2), 64   ;;  %s5889_s26 = smov (!%p515_p2), 80  }
   0xb   : > { %s5890_s27 = smov (!%p515_p2), 112   ;;  %s5891_s28 = smov (!%p515_p2), 48  }
   0xc   : > { %s5892_s0 = smov (!%p515_p2), 16   ;;  %s5893_s19 = smov (!%p515_p2), 96  }
   0xd   : > { %s5894_s22 = smov (!%p515_p2), 32   ;;  %s5897_s25 = smov (!%p515_p2), 119  }
   0xe   : > { %vm630_vm0 = vcmask 1043456   ;;  %vm631_vm1 = vcmask 1044480   ;;  %v5886_v1 = vmov 0   ;;  %s6951_s30 = smov (!%p568_p3, %s4909_s30), 1  ;;  %v5887_v2 = vmov 65535  }
   0xf   : > { %672 = vmatprep.mubr.bf16.mxu0 %v5886_v1  ;;  %5674 = vset.pattern.permute.xlu0 %v5886_v1  ;;  %v632_v3 = vsel %vm630_vm0, 4294967295, %v5887_v2  ;;  %s5262_s17 = sshll.u32 %s6951_s30, 4  ;;  %v801_v5 = vld [vmem:[%s6948_s2] sm:$0xff]  ;;  %v802_v8 = vld [vmem:[%s6948_s2 + $0x8] sm:$0xff]  ;;  %v804_v9 = vld [vmem:[%s6948_s2 + $0x18] sm:$0xff]  ;;  %vm617_vm2 = vcmask 72704  }
  0x10   : > { %5675 = vset.pattern.permute.xlu1 %v5886_v1  ;;  %978 = vmatprep.mubr.bf16.mxu1 %v5886_v1  ;;  %s572_s20 = scalar_lea.vmem %s6947_s1, %s5262_s17  ;;  %v6022_v4 = vsel %vm631_vm1, %v632_v3, 0  ;;  %s6949_s17 = sld [smem:[#allocation4_spill]]  ;;  %v803_v13 = vld [vmem:[%s6948_s2 + $0x10] sm:$0xff]  ;;  %v806_v14 = vld [vmem:[%s6948_s2 + $0x28] sm:$0xff]  ;;  %v808_v15 = vld [vmem:[%s6948_s2 + $0x38] sm:$0xff]  ;;  %vm933_vm5 = vcmask 523264  }
  0x11   : > { %v5686_v6 = vld [vmem:[%s572_s20 + $0x4] ss:$8 sps:$4 sm:$0x1f]   ;;  %811 = vperm.xlu0 %5674, %v801_v5   ;;  %v5688_v7 = vld [vmem:[%s572_s20] ss:$8 sps:$4 sm:$0x1f]   ;;  %826 = vperm.xlu1 %5675, %v804_v9  }
  0x12   : > { %v638_v10 = vand.u32 %v5686_v6, %v6022_v4  ;;  %v635_v12 = vand.u32 %v5688_v7, %v6022_v4  ;;  %v805_v16 = vld [vmem:[%s6948_s2 + $0x20] sm:$0xff]  ;;  %v807_v18 = vld [vmem:[%s6948_s2 + $0x30] sm:$0xff]  ;;  %vm5896_vm12 = vmmov 0   ;;  %vm1299_vm15 = vcmask 130048   ;;  %s5902_s1 = smov 83   ;;  %s5903_s20 = smov 101  }
  0x13   : > { %v5693_v21 = vld [vmem:[%s6926_s3 + $0x34] ss:$8 sps:$4 sm:$0xff]   ;;  %v5695_v22 = vld [vmem:[%s6926_s3 + $0x30] ss:$8 sps:$4 sm:$0xff]   ;;  %v5696_v23 = vld [vmem:[%s6926_s3 + $0x24] ss:$8 sps:$4 sm:$0xff]  }
  0x14   : > { %654 = vmatprep.subr.bf16.mxu0 %v638_v10  ;;  %954 = vmatprep.subr.bf16.mxu1 %v5693_v21  ;;  %v5698_v24 = vld [vmem:[%s6926_s3 + $0x20] ss:$8 sps:$4 sm:$0xff]   ;;  %v5699_v25 = vld [vmem:[%s6926_s3 + $0x14] ss:$8 sps:$4 sm:$0xff]   ;;  %v5701_v26 = vld [vmem:[%s6926_s3 + $0x10] ss:$8 sps:$4 sm:$0xff]  }
  0x15   : > { %816 = vperm.xlu0 %5674, %v802_v8   ;;  %655 = vmatpush1.bf16.msra.mxu0 %v635_v12  ;;  %v5702_v28 = vld [vmem:[%s6926_s3 + $0x4] ss:$8 sps:$4 sm:$0xff]   ;;  %v5704_v30 = vld [vmem:[%s6926_s3] ss:$8 sps:$4 sm:$0xff]  }
  0x16   : > { %v5689_v11 = vld [vmem:[%s6949_s17] sm:$0xff]   ;;  %836 = vperm.xlu1 %5675, %v806_v14   ;;  %v5690_v17 = vld [vmem:[%s6949_s17 + $0x8] sm:$0xff]   ;;  %v5691_v19 = vld [vmem:[%s6949_s17 + $0x10] sm:$0xff]   ;;  %955 = vmatpush1.bf16.msra.mxu1 %v5695_v22 }
  0x17   : > { %v5692_v20 = vld [vmem:[%s6949_s17 + $0x18] sm:$0xff]   ;;  %956 = vmatprep.subr.bf16.mxu1 %v5696_v23 }
  0x18   : > { %4924 = vmatmul.mubr.msk.bf16.vlgmr.msra.gmra.mxu0 %vm617_vm2, %v5689_v11 }
  0x19   : > { %821 = vperm.xlu0 %5674, %v803_v13   ;;  %682 = vmatprep.mubr.bf16.mxu0 %v5886_v1 }
  0x1a   : > { %846 = vperm.xlu1 %5675, %v808_v15   ;;  %957 = vmatpush1.bf16.msra.mxu1 %v5698_v24 }
  0x1b   : > { %958 = vmatprep.subr.bf16.mxu1 %v5699_v25 }
  0x1d   : > { %831 = vperm.xlu0 %5674, %v805_v16  }
  0x1e   : > { %959 = vmatpush1.bf16.msra.mxu1 %v5701_v26 }
  0x1f   : > { %960 = vmatprep.subr.bf16.mxu1 %v5702_v28 }
  0x20   : > { %4925 = vmatmul.mubr.msk.bf16.gmra.mxu0 %vm617_vm2, %v5690_v17 }
  0x21   : > { %841 = vperm.xlu0 %5674, %v807_v18   ;;  %692 = vmatprep.mubr.bf16.mxu0 %v5886_v1 }
  0x22   : > { %961 = vmatpush1.bf16.msra.mxu1 %v5704_v30 }
  0x28   : > { %4926 = vmatmul.mubr.msk.bf16.gmra.mxu0 %vm617_vm2, %v5691_v19 }
  0x29   : > { %702 = vmatprep.mubr.bf16.mxu0 %v5886_v1 }
  0x30   : > { %4927 = vmatmul.mubr.msk.bf16.gmra.mxu0 %vm617_vm2, %v5692_v20 }
  0x8c   : > { %v812_v45 = vpop.permute.xlu0 %811  ;;  %v827_v47 = vpop.permute.xlu1 %826 }
  0x90   : > { %v817_v46 = vpop.permute.xlu0 %816 }
  0x91   : > { %v837_v49 = vpop.permute.xlu1 %836 }
  0x94   : > { %v822_v48 = vpop.permute.xlu0 %821 }
  0x95   : > { %v6133_v51 = vpop.permute.xlu1 %846 }
  0x98   : > { %v832_v50 = vpop.permute.xlu0 %831 }
  0x9c   : > { %v6135_v52 = vpop.permute.xlu0 %841 }
  0xd8   : > { %v674_v27 = vpop.f32.mrf.mxu0 }
  0xd9   : > { %721 = vrot.lane.b32.xlu1 %v674_v27, %s5888_s21 }
  0xda   : > { %v676_v29 = vpop.f32.mrf.mxu0 }
  0xdb   : > { %761 = vrot.lane.b32.xlu0 %v676_v29, %s5888_s21 }
  0xdc   : > { %v678_v31 = vpop.f32.mrf.mxu0 }
  0xdd   : > { %723 = vrot.lane.b32.xlu1 %v678_v31, %s5888_s21 }
  0xde   : > { %v680_v32 = vpop.f32.mrf.mxu0 }
  0xe0   : > { %v684_v33 = vpop.f32.mrf.mxu0 }
  0xe1   : > { %763 = vrot.lane.b32.xlu1 %v680_v32, %s5888_s21  ;;  %725 = vrot.lane.b32.xlu0 %v684_v33, %s5888_s21 }
  0xe2   : > { %v686_v34 = vpop.f32.mrf.mxu0 }
  0xe4   : > { %v688_v35 = vpop.f32.mrf.mxu0 }
  0xe5   : > { %765 = vrot.lane.b32.xlu0 %v686_v34, %s5888_s21  ;;  %727 = vrot.lane.b32.xlu1 %v688_v35, %s5888_s21 }
  0xe6   : > { %v690_v36 = vpop.f32.mrf.mxu0 }
  0xe8   : > { %v6100_v37 = vpop.f32.mrf.mxu0 }
  0xe9   : > { %767 = vrot.lane.b32.xlu1 %v690_v36, %s5888_s21  ;;  %729 = vrot.lane.b32.xlu0 %v6100_v37, %s5888_s21 }
  0xea   : > { %v6105_v38 = vpop.f32.mrf.mxu0 }
  0xec   : > { %v6107_v39 = vpop.f32.mrf.mxu0 }
  0xed   : > { %769 = vrot.lane.b32.xlu0 %v6105_v38, %s5888_s21  ;;  %731 = vrot.lane.b32.xlu1 %v6107_v39, %s5888_s21 }
  0xee   : > { %v6113_v40 = vpop.f32.mrf.mxu0 }
  0xf0   : > { %v6115_v41 = vpop.f32.mrf.mxu0 }
  0xf1   : > { %771 = vrot.lane.b32.xlu1 %v6113_v40, %s5888_s21  ;;  %733 = vrot.lane.b32.xlu0 %v6115_v41, %s5888_s21 }
  0xf2   : > { %v6121_v42 = vpop.f32.mrf.mxu0 }
  0xf4   : > { %v6123_v43 = vpop.f32.mrf.mxu0 }
  0xf5   : > { %773 = vrot.lane.b32.xlu0 %v6121_v42, %s5888_s21  ;;  %735 = vrot.lane.b32.xlu1 %v6123_v43, %s5888_s21 }
  0xf6   : > { %v6129_v44 = vpop.f32.mrf.mxu0 }
  0xf9   : > { %775 = vrot.lane.b32.xlu1 %v6129_v44, %s5888_s21 }
 0x14b   : > { %v722_v53 = vpop.permute.xlu1 %721 }
 0x14c   : > { %v745_v55 = vmax.f32 %v674_v27, %v722_v53 }
 0x14d   : > { %v762_v54 = vpop.permute.xlu0 %761 }
 0x14e   : > { %v785_v56 = vmax.f32 %v676_v29, %v762_v54 }
 0x14f   : > { %v724_v57 = vpop.permute.xlu1 %723 }
 0x150   : > { %v793_v58 = vmax.f32 %v745_v55, %v785_v56  ;;  %v746_v62 = vmax.f32 %v678_v31, %v724_v57 }
 0x152   : > { %v849_v59 = vadd.f32 %v812_v45, %v793_v58 }
 0x153   : > { %v764_v60 = vpop.permute.xlu1 %763  ;;  %v726_v61 = vpop.permute.xlu0 %725 }
 0x154   : > { %v786_v63 = vmax.f32 %v680_v32, %v764_v60  ;;  %v865_v2 = vmul.f32 0.01, %v849_v59  ;;  %vm857_vm3 = vcmp.ge.f32.partialorder %v849_v59, 0.0  ;;  %v747_v7 = vmax.f32 %v684_v33, %v726_v61 }
 0x156   : > { %v794_v0 = vmax.f32 %v746_v62, %v786_v63  ;;  %v873_v13 = vsel %vm857_vm3, %v849_v59, %v865_v2 }
 0x157   : > { %v766_v3 = vpop.permute.xlu0 %765  ;;  %v728_v5 = vpop.permute.xlu1 %727 }
 0x158   : > { %v850_v6 = vadd.f32 %v817_v46, %v794_v0  ;;  %v787_v8 = vmax.f32 %v686_v34, %v766_v3  ;;  %v748_v15 = vmax.f32 %v688_v35, %v728_v5 }
 0x15a   : > { %vm858_vm4 = vcmp.ge.f32.partialorder %v850_v6, 0.0  ;;  %v866_v9 = vmul.f32 0.01, %v850_v6  ;;  %v795_v10 = vmax.f32 %v747_v7, %v787_v8 }
 0x15b   : > { %v768_v11 = vpop.permute.xlu1 %767  ;;  %v730_v12 = vpop.permute.xlu0 %729 }
 0x15c   : > { %v851_v14 = vadd.f32 %v822_v48, %v795_v10  ;;  %v788_v16 = vmax.f32 %v690_v36, %v768_v11  ;;  %v874_v17 = vsel %vm858_vm4, %v850_v6, %v866_v9  ;;  %v749_v24 = vmax.f32 %v6100_v37, %v730_v12 }
 0x15d   : > { %v881_v18 = vpack.c.bf16 %v874_v17, %v873_v13  ;;  %v5710_v17 = vld [vmem:[%s6927_s4 + $0xc] ss:$20 sps:$4 sm:$0xff]  }
 0x15e   : > { %v796_v19 = vmax.f32 %v748_v15, %v788_v16  ;;  %v867_v22 = vmul.f32 0.01, %v851_v14  ;;  %vm859_vm6 = vcmp.ge.f32.partialorder %v851_v14, 0.0  ;;  %v5707_v16 = vld [vmem:[%s6927_s4 + $0x4] ss:$20 sps:$4 sm:$0xff]  }
 0x15f   : > { %4936 = vmatmul.mubr.msk.bf16.vlgmr.msra.gmra.mxu1 %vm933_vm5, %v881_v18  ;;  %v770_v20 = vpop.permute.xlu0 %769  ;;  %v732_v21 = vpop.permute.xlu1 %731  ;;  %1193 = vmatprep.mubr.bf16.mxu0 %v5707_v16  ;;  %v1122_v18 = vld [vmem:[%s6928_s5 + $0x8] sm:$0xff] }
 0x160   : > { %v852_v23 = vadd.f32 %v827_v47, %v796_v19  ;;  %v789_v25 = vmax.f32 %v6105_v38, %v770_v20  ;;  %988 = vmatprep.mubr.bf16.mxu1 %v5886_v1  ;;  %v750_v28 = vmax.f32 %v6107_v39, %v732_v21  ;;  %v875_v33 = vsel %vm859_vm6, %v851_v14, %v867_v22  ;;  %v1121_v19 = vld [vmem:[%s6928_s5] sm:$0xff] }
 0x162   : > { %vm860_vm7 = vcmp.ge.f32.partialorder %v852_v23, 0.0  ;;  %v868_v26 = vmul.f32 0.01, %v852_v23  ;;  %v797_v27 = vmax.f32 %v749_v24, %v789_v25 }
 0x163   : > { %v772_v29 = vpop.permute.xlu1 %771  ;;  %v734_v30 = vpop.permute.xlu0 %733 }
 0x164   : > { %v853_v31 = vadd.f32 %v832_v50, %v797_v27  ;;  %v790_v32 = vmax.f32 %v6113_v40, %v772_v29  ;;  %v876_v34 = vsel %vm860_vm7, %v852_v23, %v868_v26  ;;  %v751_v47 = vmax.f32 %v6115_v41, %v734_v30 }
 0x165   : > { %v882_v35 = vpack.c.bf16 %v876_v34, %v875_v33 }
 0x166   : > { %v798_v36 = vmax.f32 %v750_v28, %v790_v32  ;;  %v869_v45 = vmul.f32 0.01, %v853_v31  ;;  %vm861_vm8 = vcmp.ge.f32.partialorder %v853_v31, 0.0 }
 0x167   : > { %4937 = vmatmul.mubr.msk.bf16.gmra.mxu1 %vm933_vm5, %v882_v35  ;;  %v774_v37 = vpop.permute.xlu0 %773  ;;  %v736_v38 = vpop.permute.xlu1 %735 }
 0x168   : > { %v854_v46 = vadd.f32 %v837_v49, %v798_v36  ;;  %v791_v48 = vmax.f32 %v6121_v42, %v774_v37  ;;  %998 = vmatprep.mubr.bf16.mxu1 %v5886_v1  ;;  %v752_v50 = vmax.f32 %v6123_v43, %v736_v38  ;;  %v877_v56 = vsel %vm861_vm8, %v853_v31, %v869_v45 }
 0x16a   : > { %vm862_vm9 = vcmp.ge.f32.partialorder %v854_v46, 0.0  ;;  %v870_v39 = vmul.f32 0.01, %v854_v46  ;;  %v799_v40 = vmax.f32 %v751_v47, %v791_v48 }
 0x16b   : > { %v776_v53 = vpop.permute.xlu1 %775 }
 0x16c   : > { %v855_v54 = vadd.f32 %v6135_v52, %v799_v40  ;;  %v792_v55 = vmax.f32 %v6129_v44, %v776_v53  ;;  %v878_v57 = vsel %vm862_vm9, %v854_v46, %v870_v39  ;;  %v5705_v39 = vld [vmem:[%s6927_s4] ss:$20 sps:$4 sm:$0xff]   ;;  %v5895_v40 = vmov 0.0  }
 0x16d   : > { %v883_v49 = vpack.c.bf16 %v878_v57, %v877_v56 }
 0x16e   : > { %v800_v58 = vmax.f32 %v752_v50, %v792_v55  ;;  %v871_v41 = vmul.f32 0.01, %v855_v54  ;;  %vm863_vm10 = vcmp.ge.f32.partialorder %v855_v54, 0.0 }
 0x16f   : > { %4938 = vmatmul.mubr.msk.bf16.gmra.mxu1 %vm933_vm5, %v883_v49 }
 0x170   : > { %v856_v42 = vadd.f32 %v6133_v51, %v800_v58  ;;  %1008 = vmatprep.mubr.bf16.mxu1 %v5886_v1  ;;  %v879_v43 = vsel %vm863_vm10, %v855_v54, %v871_v41 }
 0x172   : > { %vm864_vm11 = vcmp.ge.f32.partialorder %v856_v42, 0.0  ;;  %v872_v59 = vmul.f32 0.01, %v856_v42 }
 0x174   : > { %v880_v60 = vsel %vm864_vm11, %v856_v42, %v872_v59  ;;  %v5708_v42 = vld [vmem:[%s6927_s4 + $0x8] ss:$20 sps:$4 sm:$0xff]  }
 0x175   : > { %v884_v61 = vpack.c.bf16 %v880_v60, %v879_v43  ;;  %v5711_v43 = vld [vmem:[%s6927_s4 + $0x10] ss:$20 sps:$4 sm:$0xff]  }
 0x176   : > { %v5712_v60 = vld [vmem:[%s6929_s6] sm:$0xff]  }
 0x177   : > { %4939 = vmatmul.mubr.msk.bf16.gmra.mxu1 %vm933_vm5, %v884_v61 }
 0x178   : > { %1234 = vmatprep.mubr.bf16.mxu1 %v5710_v17 }
 0x21f   : > { %v980_v44 = vpop.f32.mrf.mxu1 }
 0x221   : > { %v6154_v52 = vpop.f32.mrf.mxu1 }
 0x223   : > { %v984_v62 = vpop.f32.mrf.mxu1 }
 0x224   : > { %v6156_v63 = vpack.c.bf16 %v984_v62, %v980_v44 }
 0x225   : > { %v6158_v0 = vpop.f32.mrf.mxu1 }
 0x226   : > { %1055 = vrot.lane.b32.xlu0 %v6156_v63, %s5889_s26  ;;  %1031 = vrot.lane.b32.xlu1 %v6156_v63, %s5890_s27  ;;  %v1020_v59 = vpack.c.bf16 %v6158_v0, %v6154_v52 }
 0x227   : > { %v990_v51 = vpop.f32.mrf.mxu1 }
 0x229   : > { %v6162_v2 = vpop.f32.mrf.mxu1 }
 0x22b   : > { %v994_v3 = vpop.f32.mrf.mxu1 }
 0x22c   : > { %v6164_v5 = vpack.c.bf16 %v994_v3, %v990_v51 }
 0x22d   : > { %v6166_v6 = vpop.f32.mrf.mxu1 }
 0x22e   : > { %1057 = vrot.lane.b32.xlu0 %v6164_v5, %s5889_s26  ;;  %1033 = vrot.lane.b32.xlu1 %v6164_v5, %s5890_s27  ;;  %v1022_v49 = vpack.c.bf16 %v6166_v6, %v6162_v2 }
 0x22f   : > { %v1000_v7 = vpop.f32.mrf.mxu1 }
 0x231   : > { %v6170_v8 = vpop.f32.mrf.mxu1 }
 0x233   : > { %v1004_v9 = vpop.f32.mrf.mxu1 }
 0x234   : > { %v6172_v10 = vpack.c.bf16 %v1004_v9, %v1000_v7 }
 0x235   : > { %v6174_v11 = vpop.f32.mrf.mxu1 }
 0x236   : > { %1059 = vrot.lane.b32.xlu0 %v6172_v10, %s5889_s26  ;;  %1035 = vrot.lane.b32.xlu1 %v6172_v10, %s5890_s27  ;;  %v1024_v55 = vpack.c.bf16 %v6174_v11, %v6170_v8 }
 0x237   : > { %v1010_v12 = vpop.f32.mrf.mxu1 }
 0x239   : > { %v6178_v13 = vpop.f32.mrf.mxu1 }
 0x23b   : > { %v1014_v14 = vpop.f32.mrf.mxu1 }
 0x23c   : > { %v1025_v15 = vpack.c.bf16 %v1014_v14, %v1010_v12 }
 0x23d   : > { %v1016_v48 = vpop.f32.mrf.mxu1 }
 0x23e   : > { %1037 = vrot.lane.b32.xlu1 %v1025_v15, %s5890_s27  ;;  %1061 = vrot.lane.b32.xlu0 %v1025_v15, %s5889_s26  ;;  %v1026_v50 = vpack.c.bf16 %v1016_v48, %v6178_v13 }
 0x242   : > { %1083 = vrot.lane.b32.xlu1 %v6172_v10, %s5891_s28  ;;  %1107 = vrot.lane.b32.xlu0 %v6172_v10, %s5892_s0 }
 0x246   : > { %1105 = vrot.lane.b32.xlu1 %v6164_v5, %s5892_s0  ;;  %1081 = vrot.lane.b32.xlu0 %v6164_v5, %s5891_s28 }
 0x24a   : > { %1085 = vrot.lane.b32.xlu1 %v1025_v15, %s5891_s28  ;;  %1109 = vrot.lane.b32.xlu0 %v1025_v15, %s5892_s0 }
 0x24e   : > { %1047 = vrot.lane.b32.xlu1 %v6172_v10, %s5893_s19  ;;  %1049 = vrot.lane.b32.xlu0 %v1025_v15, %s5893_s19 }
 0x252   : > { %1079 = vrot.lane.b32.xlu1 %v6156_v63, %s5891_s28  ;;  %1103 = vrot.lane.b32.xlu0 %v6156_v63, %s5892_s0  ;;  %s5898_s28 = smov 110   ;;  %s5900_s0 = smov 65  }
 0x256   : > { %1097 = vrot.lane.b32.xlu1 %v1025_v15, %s5894_s22  ;;  %1045 = vrot.lane.b32.xlu0 %v6164_v5, %s5893_s19 }
 0x25a   : > { %1043 = vrot.lane.b32.xlu1 %v6156_v63, %s5893_s19  ;;  %1073 = vrot.lane.b32.xlu0 %v1025_v15, %s5888_s21  ;;  %s5901_s19 = smov 92  }
 0x25e   : > { %1071 = vrot.lane.b32.xlu1 %v6172_v10, %s5888_s21  ;;  %1095 = vrot.lane.b32.xlu0 %v6172_v10, %s5894_s22 }
 0x262   : > { %1069 = vrot.lane.b32.xlu1 %v6164_v5, %s5888_s21  ;;  %1093 = vrot.lane.b32.xlu0 %v6164_v5, %s5894_s22 }
 0x266   : > { %1067 = vrot.lane.b32.xlu1 %v6156_v63, %s5888_s21  ;;  %1091 = vrot.lane.b32.xlu0 %v6156_v63, %s5894_s22  ;;  %s5899_s21 = smov 74   ;;  %s5904_s22 = smov 56  }
 0x26a   : > { %1130 = vperm.xlu1 %5675, %v1122_v18   ;;  %1125 = vperm.xlu0 %5674, %v1121_v19  }
 0x298   : > { %v1056_v20 = vpop.permute.xlu0 %1055  ;;  %v1032_v21 = vpop.permute.xlu1 %1031 }
 0x2a0   : > { %v1058_v22 = vpop.permute.xlu0 %1057  ;;  %v1034_v23 = vpop.permute.xlu1 %1033 }
 0x2a8   : > { %v1060_v24 = vpop.permute.xlu0 %1059  ;;  %v1036_v25 = vpop.permute.xlu1 %1035 }
 0x2b0   : > { %v1062_v26 = vpop.permute.xlu0 %1061  ;;  %v1038_v27 = vpop.permute.xlu1 %1037 }
 0x2b1   : > { %5264 = vmatprep.subr.bf16.mxu0 %v1062_v26 }
 0x2b2   : > { %5265 = vmatpush3.bf16.msra.mxu0 %v1038_v27 }
 0x2b3   : > { %5266 = vmatprep.subr.bf16.mxu0 %v1060_v24 }
 0x2b4   : > { %v1108_v28 = vpop.permute.xlu0 %1107  ;;  %v1084_v29 = vpop.permute.xlu1 %1083 }
 0x2b6   : > { %5267 = vmatpush3.bf16.msra.mxu0 %v1036_v25 }
 0x2b7   : > { %5268 = vmatprep.subr.bf16.mxu0 %v1058_v22 }
 0x2b8   : > { %v1082_v30 = vpop.permute.xlu0 %1081  ;;  %v1106_v31 = vpop.permute.xlu1 %1105 }
 0x2ba   : > { %5269 = vmatpush3.bf16.msra.mxu0 %v1034_v23 }
 0x2bb   : > { %5270 = vmatprep.subr.bf16.mxu0 %v1056_v20 }
 0x2bc   : > { %v1110_v32 = vpop.permute.xlu0 %1109  ;;  %v1086_v33 = vpop.permute.xlu1 %1085 }
 0x2bd   : > { %5286 = vmatprep.subr.bf16.mxu1 %v1110_v32 }
 0x2be   : > { %5271 = vmatpush3.bf16.msra.mxu0 %v1032_v21  ;;  %5287 = vmatpush3.bf16.msra.mxu1 %v1086_v33 }
 0x2bf   : > { %5288 = vmatprep.subr.bf16.mxu1 %v1108_v28 }
 0x2c0   : > { %v1050_v34 = vpop.permute.xlu0 %1049  ;;  %v1048_v35 = vpop.permute.xlu1 %1047 }
 0x2c1   : > { %5272 = vmatprep.subr.bf16.mxu0 %v1050_v34 }
 0x2c2   : > { %5273 = vmatpush3.bf16.msra.mxu0 %v1025_v15  ;;  %5289 = vmatpush3.bf16.msra.mxu1 %v1084_v29 }
 0x2c3   : > { %5274 = vmatprep.subr.bf16.mxu0 %v1048_v35  ;;  %5290 = vmatprep.subr.bf16.mxu1 %v1106_v31 }
 0x2c4   : > { %v1104_v36 = vpop.permute.xlu0 %1103  ;;  %v1080_v37 = vpop.permute.xlu1 %1079 }
 0x2c6   : > { %5275 = vmatpush3.bf16.msra.mxu0 %v6172_v10  ;;  %5291 = vmatpush3.bf16.msra.mxu1 %v1082_v30  ;;  %v5713_v30 = vld [vmem:[%s6930_s7] sm:$0x1f]  }
 0x2c7   : > { %5292 = vmatprep.subr.bf16.mxu1 %v1104_v36  ;;  %v1376_v31 = vand.u32 %v5713_v30, %v6022_v4  ;;  %v5722_v30 = vld [vmem:[%s6933_s10 + $0x28] sm:$0xff]  }
 0x2c8   : > { %v1046_v38 = vpop.permute.xlu0 %1045  ;;  %v1098_v45 = vpop.permute.xlu1 %1097 }
 0x2c9   : > { %5276 = vmatprep.subr.bf16.mxu0 %v1046_v38 }
 0x2ca   : > { %5277 = vmatpush3.bf16.msra.mxu0 %v6164_v5  ;;  %5293 = vmatpush3.bf16.msra.mxu1 %v1080_v37 }
 0x2cb   : > { %5294 = vmatprep.subr.bf16.mxu1 %v1098_v45 }
 0x2cc   : > { %v1074_v46 = vpop.permute.xlu0 %1073  ;;  %v1044_v47 = vpop.permute.xlu1 %1043 }
 0x2cd   : > { %5278 = vmatprep.subr.bf16.mxu0 %v1044_v47 }
 0x2ce   : > { %5279 = vmatpush3.bf16.msra.mxu0 %v6156_v63  ;;  %5295 = vmatpush3.bf16.msra.mxu1 %v1074_v46 }
 0x2cf   : > { %5419 = vmatprep.subr.bf16.mxu0 %v5895_v40 }
 0x2d0   : > { %v1096_v53 = vpop.permute.xlu0 %1095  ;;  %v1072_v54 = vpop.permute.xlu1 %1071 }
 0x2d1   : > { %1194 = vmatmul.mubr.bf16.vlgmr.msra.gmra.mxu0 %v5705_v39  ;;  %5296 = vmatprep.subr.bf16.mxu1 %v1096_v53 }
 0x2d2   : > { %5297 = vmatpush3.bf16.msra.mxu1 %v1072_v54  ;;  %5420 = vmatpush3.bf16.msra.mxu0 %v1026_v50 }
 0x2d3   : > { %5421 = vmatprep.subr.bf16.mxu0 %v5895_v40  ;;  %5427 = vmatprep.mubr.msk.bf16.mxu0 %vm5896_vm12, %v5895_v40 }
 0x2d4   : > { %v1094_v56 = vpop.permute.xlu0 %1093  ;;  %v1070_v57 = vpop.permute.xlu1 %1069 }
 0x2d5   : > { %5298 = vmatprep.subr.bf16.mxu1 %v1094_v56  ;;  %v1448_v56 = vld [vmem:[%s6932_s9 + $0x8] sm:$0xff] }
 0x2d6   : > { %5299 = vmatpush3.bf16.msra.mxu1 %v1070_v57  ;;  %5422 = vmatpush3.bf16.msra.mxu0 %v1024_v55  ;;  %v1447_v57 = vld [vmem:[%s6932_s9] sm:$0xff] }
 0x2d7   : > { %5423 = vmatprep.subr.bf16.mxu0 %v5895_v40 }
 0x2d8   : > { %v1092_v58 = vpop.permute.xlu0 %1091  ;;  %v1068_v41 = vpop.permute.xlu1 %1067 }
 0x2d9   : > { %5300 = vmatprep.subr.bf16.mxu1 %v1092_v58  ;;  %v3089_v58 = vld [vmem:[%s6935_s12 + $0x30] sm:$0xff] }
 0x2da   : > { %5301 = vmatpush3.bf16.msra.mxu1 %v1068_v41  ;;  %5424 = vmatpush3.bf16.msra.mxu0 %v1022_v49  ;;  %v3090_v49 = vld [vmem:[%s6935_s12 + $0x38] sm:$0xff]  ;;  %v5714_v41 = vld [vmem:[%s6931_s8 + $0x4] ss:$8 sps:$4 sm:$0xff]  }
 0x2db   : > { %5425 = vmatprep.subr.bf16.mxu0 %v5895_v40  ;;  %5431 = vmatprep.subr.bf16.mxu1 %v5895_v40 }
 0x2dd   : > { %1235 = vmatmul.mubr.bf16.vlgmr.msra.gmra.mxu1 %v5708_v42  ;;  %v3088_v42 = vld [vmem:[%s6935_s12 + $0x28] sm:$0xff] }
 0x2de   : > { %5426 = vmatpush3.bf16.msra.mxu0 %v1020_v59  ;;  %5433 = vmatprep.mubr.msk.bf16.mxu1 %vm5896_vm12, %v5895_v40  ;;  %v3087_v59 = vld [vmem:[%s6935_s12 + $0x20] sm:$0xff] }
 0x2df   : > { %5437 = vmatprep.subr.bf16.mxu0 %v5895_v40  ;;  %5432 = vmatpush3.bf16.msra.mxu1 %v5712_v60  ;;  %v3085_v60 = vld [vmem:[%s6935_s12 + $0x10] sm:$0xff] }
 0x2e0   : > { %1471 = vmatprep.subr.bf16.mxu1 %v5886_v1 }
 0x2e1   : > { %5428 = vmatmul.mubr.msk.bf16.vlgmr.msra.gmra.mxu0 %vm933_vm5, %v5711_v43  ;;  %v3086_v43 = vld [vmem:[%s6935_s12 + $0x18] sm:$0xff] }
 0x2e2   : > { %5439 = vmatprep.mubr.msk.bf16.mxu0 %vm5896_vm12, %v5895_v40  ;;  %5438 = vmatpush3.bf16.msra.mxu0 %v1376_v31  ;;  %v5723_v31 = vld [vmem:[%s6933_s10 + $0x30] sm:$0xff]  }
 0x2e5   : > { %v1126_v51 = vpop.permute.xlu0 %1125  ;;  %v1131_v9 = vpop.permute.xlu1 %1130 }
 0x391   : > { %v5280_v61 = vpop.f32.mrf.mxu0 }
 0x393   : > { %v5281_v44 = vpop.f32.mrf.mxu0 }
 0x394   : > { %v5282_v62 = vadd.f32 %v5281_v44, %v5280_v61  ;;  %v3084_v61 = vld [vmem:[%s6935_s12 + $0x8] sm:$0xff]  ;;  %v3083_v44 = vld [vmem:[%s6935_s12] sm:$0xff] }
 0x395   : > { %v5283_v52 = vpop.f32.mrf.mxu0 }
 0x396   : > { %v1196_v3 = vadd.f32 %v5282_v62, %v1126_v51  ;;  %v4760_v62 = vld [vmem:[%s6938_s15] sm:$0xff] }
 0x397   : > { %v5284_v63 = vpop.f32.mrf.mxu0 }
 0x398   : > { %v5285_v5 = vadd.f32 %v5284_v63, %v5283_v52  ;;  %v4761_v52 = vld [vmem:[%s6938_s15 + $0x8] sm:$0xff]  ;;  %v5258_v63 = vld [vmem:[#allocation2] ss:$0 sm:$0xff] }
 0x39a   : > { %v1199_v13 = vadd.f32 %v5285_v5, %v1131_v9  ;;  %v5716_v9 = vld [vmem:[%s6931_s8] ss:$8 sps:$4 sm:$0xff]  }
 0x39d   : > { %v5302_v0 = vpop.f32.mrf.mxu1 }
 0x39f   : > { %v5303_v2 = vpop.f32.mrf.mxu1 }
 0x3a0   : > { %v5304_v6 = vadd.f32 %v5303_v2, %v5302_v0 }
 0x3a1   : > { %v5305_v7 = vpop.f32.mrf.mxu1  ;;  %v1277_v8 = vpop.f32.mrf.mxu0 }
 0x3a2   : > { %v1237_v10 = vadd.f32 %v5304_v6, %v1196_v3 }
 0x3a3   : > { %v5306_v11 = vpop.f32.mrf.mxu1  ;;  %v5429_v12 = vpop.f32.mrf.mxu0 }
 0x3a4   : > { %v1278_v14 = vadd.f32 %v1277_v8, %v1237_v10  ;;  %v5307_v15 = vadd.f32 %v5306_v11, %v5305_v7  ;;  %v5717_v10 = vld [vmem:[%s6933_s10] sm:$0xff]  }
 0x3a5   : > { %v1280_v16 = vpop.f32.mrf.mxu0 }
 0x3a6   : > { %v1240_v17 = vadd.f32 %v5307_v15, %v1199_v13  ;;  %v1286_v19 = vmul.f32 0.01, %v1278_v14  ;;  %vm1284_vm13 = vcmp.ge.f32.partialorder %v1278_v14, 0.0 }
 0x3a7   : > { %v5430_v18 = vpop.f32.mrf.mxu0 }
 0x3a8   : > { %v1281_v20 = vadd.f32 %v1280_v16, %v1240_v17  ;;  %v1288_v22 = vsel %vm1284_vm13, %v1278_v14, %v1286_v19 }
 0x3aa   : > { %vm1285_vm14 = vcmp.ge.f32.partialorder %v1281_v20, 0.0  ;;  %v1287_v21 = vmul.f32 0.01, %v1281_v20 }
 0x3ac   : > { %v1289_v23 = vsel %vm1285_vm14, %v1281_v20, %v1287_v21 }
 0x3ad   : > { %v1290_v24 = vpack.c.bf16 %v1289_v23, %v1288_v22 }
 0x3af   : > { %5434 = vmatmul.mubr.msk.bf16.vlgmr.msra.gmra.mxu1 %vm1299_vm15, %v1290_v24  ;;  %v5718_v24 = vld [vmem:[%s6933_s10 + $0x8] sm:$0xff]  }
 0x3b0   : > { %4952 = vmatprep.mubr.msk.bf16.mxu1 %vm1299_vm15, %v5714_v41  ;;  %v5743_v41 = vld [vmem:[%s6933_s10 + $0xd0] sm:$0xff]  }
 0x46f   : > { %v1337_v25 = vpop.f32.mrf.mxu1 }
 0x471   : > { %v5435_v26 = vpop.f32.mrf.mxu1 }
 0x472   : > { %v5720_v26 = vld [vmem:[%s6933_s10 + $0x18] sm:$0xff]  }
 0x473   : > { %v1340_v27 = vpop.f32.mrf.mxu1 }
 0x474   : > { %v5676_v28 = vpack.i.bf16 %v1340_v27, %v1337_v25 }
 0x475   : > { %v5436_v29 = vpop.f32.mrf.mxu1 }
 0x476   : > { %5677 = vrot.lane.b32.xlu0 %v5676_v28, %s5897_s25  ;;  %v5753_v28 = vld [vmem:[%s6934_s11 + $0x38] sm:$0x1f]  }
 0x477   : > { %v2908_v29 = vand.u32 %v5753_v28, %v6022_v4 }
 0x4e8   : > { %v5678_v32 = vpop.permute.xlu0 %5677 }
 0x4e9   : > { %v5680_v33 = vunpack.i.h.bf16 %v5678_v32  ;;  %v5679_v34 = vunpack.i.l.bf16 %v5678_v32  ;;  %v5724_v32 = vld [vmem:[%s6933_s10 + $0x38] sm:$0xff]  }
 0x4eb   : > { %v1353_v35 = vmax.f32 %v1340_v27, %v5680_v33  ;;  %v1352_v36 = vmax.f32 %v1337_v25, %v5679_v34  ;;  %v5719_v25 = vld [vmem:[%s6933_s10 + $0x10] sm:$0xff]   ;;  %v5721_v27 = vld [vmem:[%s6933_s10 + $0x20] sm:$0xff]   ;;  %v5726_v34 = vld [vmem:[%s6933_s10 + $0x48] sm:$0xff]  }
 0x4ec   : > { %v5725_v33 = vld [vmem:[%s6933_s10 + $0x40] sm:$0xff]  }
 0x4ed   : > { %v5681_v37 = vpack.i.bf16 %v1353_v35, %v1352_v36 }
 0x4ef   : > { %5682 = vrot.lane.b32.xlu1 %v5681_v37, %s5898_s28  ;;  %v5729_v37 = vld [vmem:[%s6933_s10 + $0x60] sm:$0xff]  }
 0x561   : > { %v5683_v38 = vpop.permute.xlu1 %5682 }
 0x562   : > { %v5685_v45 = vunpack.i.h.bf16 %v5683_v38  ;;  %v5684_v46 = vunpack.i.l.bf16 %v5683_v38  ;;  %v5730_v38 = vld [vmem:[%s6933_s10 + $0x68] sm:$0xff]  }
 0x564   : > { %v1363_v47 = vmax.f32 %v1353_v35, %v5685_v45  ;;  %v1362_v48 = vmax.f32 %v1352_v36, %v5684_v46  ;;  %v5727_v35 = vld [vmem:[%s6933_s10 + $0x50] sm:$0xff]   ;;  %v5728_v36 = vld [vmem:[%s6933_s10 + $0x58] sm:$0xff]  }
 0x565   : > { %v5731_v45 = vld [vmem:[%s6933_s10 + $0x70] sm:$0xff]   ;;  %v5732_v46 = vld [vmem:[%s6933_s10 + $0x78] sm:$0xff]  }
 0x566   : > { %v1364_v39 = vpack.c.bf16 %v1363_v47, %v1362_v48  ;;  %v5733_v47 = vld [vmem:[%s6933_s10 + $0x80] sm:$0xff]   ;;  %v5734_v48 = vld [vmem:[%s6933_s10 + $0x88] sm:$0xff]  }
 0x568   : > { %5440 = vmatmul.mubr.msk.bf16.vlgmr.msra.gmra.mxu0 %vm617_vm2, %v1364_v39  ;;  %v5735_v39 = vld [vmem:[%s6933_s10 + $0x90] sm:$0xff]  }
 0x569   : > { %5445 = vmatprep.mubr.msk.bf16.mxu0 %vm1299_vm15, %v5717_v10 }
 0x628   : > { %v1412_v40 = vpop.f32.mrf.mxu0 }
 0x62a   : > { %v5441_v50 = vpop.f32.mrf.mxu0 }
 0x62b   : > { %v5737_v50 = vld [vmem:[%s6933_s10 + $0xa0] sm:$0xff]  }
 0x62c   : > { %v1415_v53 = vpop.f32.mrf.mxu0 }
 0x62d   : > { %v6245_v54 = vpack.c.bf16 %v1415_v53, %v1412_v40  ;;  %v5736_v40 = vld [vmem:[%s6933_s10 + $0x98] sm:$0xff]   ;;  %v5738_v53 = vld [vmem:[%s6933_s10 + $0xa8] sm:$0xff]  }
 0x62e   : > { %v5442_v55 = vpop.f32.mrf.mxu0 }
 0x62f   : > { %1436 = vrot.lane.b32.xlu1 %v6245_v54, %s5899_s21  ;;  %1439 = vrot.lane.b32.xlu0 %v6245_v54, %s5900_s0  ;;  %v5754_v55 = vld [vmem:[%s6934_s11 + $0x8] sm:$0x1f]  }
 0x633   : > { %1430 = vrot.lane.b32.xlu1 %v6245_v54, %s5901_s19  ;;  %1433 = vrot.lane.b32.xlu0 %v6245_v54, %s5902_s1 }
 0x637   : > { %1424 = vrot.lane.b32.xlu1 %v6245_v54, %s5898_s28  ;;  %1427 = vrot.lane.b32.xlu0 %v6245_v54, %s5903_s20  ;;  %s5263_s28 = sshll.u32 %s6951_s30, 3 }
 0x638   : > { %s577_s19 = scalar_lea.vmem %s6941_s18, %s5263_s28 }
 0x63b   : > { %1442 = vrot.lane.b32.xlu1 %v6245_v54, %s5904_s22  ;;  %1421 = vrot.lane.b32.xlu0 %v6245_v54, %s5897_s25 }
 0x63f   : > { %1456 = vperm.xlu1 %5675, %v1448_v56   ;;  %1451 = vperm.xlu0 %5674, %v1447_v57   ;;  %v5740_v56 = vld [vmem:[%s6933_s10 + $0xb8] sm:$0xff]   ;;  %v2231_v57 = vand.u32 %v5754_v55, %v6022_v4 }
 0x643   : > { %3128 = vperm.xlu1 %5675, %v3090_v49   ;;  %3123 = vperm.xlu0 %5674, %v3089_v58   ;;  %v5741_v49 = vld [vmem:[%s6933_s10 + $0xc0] sm:$0xff]   ;;  %v5742_v58 = vld [vmem:[%s6933_s10 + $0xc8] sm:$0xff]  }
 0x647   : > { %3118 = vperm.xlu1 %5675, %v3088_v42   ;;  %3113 = vperm.xlu0 %5674, %v3087_v59   ;;  %v5755_v42 = vld [vmem:[%s6934_s11] sm:$0x1f]  }
 0x648   : > { %v2316_v59 = vand.u32 %v5755_v42, %v6022_v4 }
 0x64b   : > { %3108 = vperm.xlu1 %5675, %v3086_v43   ;;  %3103 = vperm.xlu0 %5674, %v3085_v60   ;;  %v5744_v43 = vld [vmem:[%s6933_s10 + $0xd8] sm:$0xff]   ;;  %v5745_v60 = vld [vmem:[%s6933_s10 + $0xe0] sm:$0xff]  }
 0x64f   : > { %3098 = vperm.xlu1 %5675, %v3084_v61   ;;  %3093 = vperm.xlu0 %5674, %v3083_v44   ;;  %v5746_v61 = vld [vmem:[%s6933_s10 + $0xe8] sm:$0xff]   ;;  %v5747_v44 = vld [vmem:[%s6933_s10 + $0xf0] sm:$0xff]  }
 0x653   : > { %4769 = vperm.xlu1 %5675, %v4761_v52   ;;  %4764 = vperm.xlu0 %5674, %v4760_v62   ;;  %v5748_v52 = vld [vmem:[%s6933_s10 + $0xf8] sm:$0xff]   ;;  %v5749_v62 = vld [vmem:[%s6933_s10 + $0x100] sm:$0xff]  }
 0x657   : > { %4798 = vperm.xlu0 %5674, %v5258_v63   ;;  %v5750_v63 = vld [vmem:[%s6933_s10 + $0x108] sm:$0xff]  }
 0x6a1   : > { %v1440_v0 = vpop.permute.xlu0 %1439  ;;  %v1437_v51 = vpop.permute.xlu1 %1436 }
 0x6a2   : > { %1472 = vmatpush1.bf16.msra.mxu1 %v1440_v0  ;;  %v5751_v0 = vld [vmem:[%s6933_s10 + $0x110] sm:$0xff]  }
 0x6a3   : > { %1473 = vmatprep.subr.bf16.mxu1 %v5886_v1 }
 0x6a5   : > { %v1434_v2 = vpop.permute.xlu0 %1433  ;;  %v1431_v3 = vpop.permute.xlu1 %1430 }
 0x6a6   : > { %1474 = vmatpush1.bf16.msra.mxu1 %v1437_v51  ;;  %v5752_v51 = vld [vmem:[%s6933_s10 + $0x118] sm:$0xff]  }
 0x6a7   : > { %1475 = vmatprep.subr.bf16.mxu1 %v5886_v1 }
 0x6a9   : > { %v1428_v5 = vpop.permute.xlu0 %1427  ;;  %v1425_v6 = vpop.permute.xlu1 %1424 }
 0x6aa   : > { %1476 = vmatpush1.bf16.msra.mxu1 %v1434_v2 }
 0x6ab   : > { %1477 = vmatprep.subr.bf16.mxu1 %v5886_v1 }
 0x6ad   : > { %v1422_v7 = vpop.permute.xlu0 %1421  ;;  %v1443_v8 = vpop.permute.xlu1 %1442 }
 0x6ae   : > { %1478 = vmatpush1.bf16.msra.mxu1 %v1431_v3 }
 0x6af   : > { %1479 = vmatprep.subr.bf16.mxu1 %v5886_v1 }
 0x6b2   : > { %1480 = vmatpush1.bf16.msra.mxu1 %v1428_v5 }
 0x6b3   : > { %1481 = vmatprep.subr.bf16.mxu1 %v5886_v1 }
 0x6b6   : > { %1482 = vmatpush1.bf16.msra.mxu1 %v1425_v6 }
 0x6b7   : > { %1483 = vmatprep.subr.bf16.mxu1 %v5886_v1 }
 0x6ba   : > { %1484 = vmatpush1.bf16.msra.mxu1 %v1422_v7  ;;  %v1452_v11 = vpop.permute.xlu0 %1451  ;;  %v1457_v15 = vpop.permute.xlu1 %1456 }
 0x6bb   : > { %1485 = vmatprep.subr.bf16.mxu1 %v5886_v1 }
 0x6be   : > { %1486 = vmatpush1.bf16.msra.mxu1 %v6245_v54  ;;  %v5739_v54 = vld [vmem:[%s6933_s10 + $0xb0] sm:$0xff]  }
 0x6bf   : > { %1501 = vmatprep.subr.bf16.mxu1 %v5886_v1 }
 0x6c2   : > { %1502 = vmatpush2.bf16.msra.mxu1 %v1443_v8 }
 0x6c3   : > { %5517 = vmatprep.subr.bf16.mxu1 %v2231_v57 }
 0x6c5   : > { %1504 = vmatmul.mubr.bf16.vlgmr.msra.gmra.mxu1 %v5716_v9 }
 0x6c6   : > { %5518 = vmatpush3.bf16.msra.mxu1 %v2231_v57 }
 0x6c7   : > { %5527 = vmatprep.subr.bf16.mxu1 %v2316_v59 }
 0x785   : > { %v1505_v12 = vpop.f32.mrf.mxu1 }
 0x786   : > { %v1506_v13 = vadd.f32 %v1505_v12, %v1452_v11 }
 0x787   : > { %v1507_v14 = vpop.f32.mrf.mxu1 }
 0x788   : > { %v1514_v17 = vmul.f32 0.01, %v1506_v13  ;;  %vm1512_vm1 = vcmp.ge.f32.partialorder %v1506_v13, 0.0  ;;  %v5756_v14 = vld [vmem:[%s6934_s11 + $0x10] sm:$0x1f]  }
 0x789   : > { %v1508_v16 = vpop.f32.mrf.mxu1 }
 0x78a   : > { %v1509_v18 = vadd.f32 %v1508_v16, %v1457_v15  ;;  %v1516_v21 = vsel %vm1512_vm1, %v1506_v13, %v1514_v17 }
 0x78b   : > { %v1510_v19 = vpop.f32.mrf.mxu1 }
 0x78c   : > { %vm1513_vm3 = vcmp.ge.f32.partialorder %v1509_v18, 0.0  ;;  %v1515_v20 = vmul.f32 0.01, %v1509_v18  ;;  %v2408_v19 = vand.u32 %v5756_v14, %v6022_v4 }
 0x78e   : > { %v1517_v22 = vsel %vm1513_vm3, %v1509_v18, %v1515_v20  ;;  %vm4851_vm3 = vcmask 556036  }
 0x78f   : > { %v1518_v23 = vpack.c.bf16 %v1517_v22, %v1516_v21 }
 0x791   : > { %5443 = vmatprep.subr.bf16.mxu0 %v1518_v23 }
 0x792   : > { %5444 = vmatpush3.bf16.msra.mxu0 %v1518_v23 }
 0x793   : > { %5587 = vmatprep.subr.bf16.mxu0 %v2908_v29 }
 0x795   : > { %5446 = vmatmul.mubr.msk.bf16.vlgmr.msra.gmra.mxu0 %vm1299_vm15, %v5718_v24 }
 0x796   : > { %5449 = vmatprep.mubr.msk.bf16.mxu0 %vm1299_vm15, %v5719_v25  ;;  %5588 = vmatpush3.bf16.msra.mxu0 %v2908_v29  ;;  %v5757_v29 = vld [vmem:[%s6934_s11 + $0x18] sm:$0x1f]  }
 0x79d   : > { %5450 = vmatmul.mubr.msk.bf16.gmra.mxu0 %vm1299_vm15, %v5720_v26 }
 0x79e   : > { %5453 = vmatprep.mubr.msk.bf16.mxu0 %vm1299_vm15, %v5721_v27 }
 0x7a5   : > { %5454 = vmatmul.mubr.msk.bf16.gmra.mxu0 %vm1299_vm15, %v5722_v30 }
 0x7a6   : > { %5457 = vmatprep.mubr.msk.bf16.mxu0 %vm1299_vm15, %v5723_v31 }
 0x7ad   : > { %5458 = vmatmul.mubr.msk.bf16.gmra.mxu0 %vm1299_vm15, %v5724_v32 }
 0x7ae   : > { %5461 = vmatprep.mubr.msk.bf16.mxu0 %vm1299_vm15, %v5725_v33  ;;  %v2508_v33 = vand.u32 %v5757_v29, %v6022_v4 }
 0x7b5   : > { %5462 = vmatmul.mubr.msk.bf16.gmra.mxu0 %vm1299_vm15, %v5726_v34 }
 0x7b6   : > { %5465 = vmatprep.mubr.msk.bf16.mxu0 %vm1299_vm15, %v5727_v35 }
 0x7bd   : > { %5466 = vmatmul.mubr.msk.bf16.gmra.mxu0 %vm1299_vm15, %v5728_v36 }
 0x7be   : > { %5469 = vmatprep.mubr.msk.bf16.mxu0 %vm1299_vm15, %v5729_v37 }
 0x7c5   : > { %5470 = vmatmul.mubr.msk.bf16.gmra.mxu0 %vm1299_vm15, %v5730_v38 }
 0x7c6   : > { %5473 = vmatprep.mubr.msk.bf16.mxu0 %vm1299_vm15, %v5731_v45 }
 0x7cd   : > { %5474 = vmatmul.mubr.msk.bf16.gmra.mxu0 %vm1299_vm15, %v5732_v46 }
 0x7ce   : > { %5477 = vmatprep.mubr.msk.bf16.mxu0 %vm1299_vm15, %v5733_v47 }
 0x7d5   : > { %5478 = vmatmul.mubr.msk.bf16.gmra.mxu0 %vm1299_vm15, %v5734_v48 }
 0x7d6   : > { %5481 = vmatprep.mubr.msk.bf16.mxu0 %vm1299_vm15, %v5735_v39  ;;  %v5758_v39 = vld [vmem:[%s6934_s11 + $0x20] sm:$0x1f]  }
 0x7dd   : > { %5482 = vmatmul.mubr.msk.bf16.gmra.mxu0 %vm1299_vm15, %v5736_v40 }
 0x7de   : > { %5485 = vmatprep.mubr.msk.bf16.mxu0 %vm1299_vm15, %v5737_v50 }
 0x7e5   : > { %5486 = vmatmul.mubr.msk.bf16.gmra.mxu0 %vm1299_vm15, %v5738_v53 }
 0x7e6   : > { %5489 = vmatprep.mubr.msk.bf16.mxu0 %vm1299_vm15, %v5739_v54  ;;  %v2608_v54 = vand.u32 %v5758_v39, %v6022_v4 }
 0x7ed   : > { %5490 = vmatmul.mubr.msk.bf16.gmra.mxu0 %vm1299_vm15, %v5740_v56 }
 0x7ee   : > { %5493 = vmatprep.mubr.msk.bf16.mxu0 %vm1299_vm15, %v5741_v49 }
 0x7f5   : > { %5494 = vmatmul.mubr.msk.bf16.gmra.mxu0 %vm1299_vm15, %v5742_v58 }
 0x7f6   : > { %5497 = vmatprep.mubr.msk.bf16.mxu0 %vm1299_vm15, %v5743_v41 }
 0x7fd   : > { %5498 = vmatmul.mubr.msk.bf16.gmra.mxu0 %vm1299_vm15, %v5744_v43 }
 0x7fe   : > { %5501 = vmatprep.mubr.msk.bf16.mxu0 %vm1299_vm15, %v5745_v60  ;;  %v5759_v60 = vld [vmem:[%s6934_s11 + $0x28] sm:$0x1f]  }
 0x805   : > { %5502 = vmatmul.mubr.msk.bf16.gmra.mxu0 %vm1299_vm15, %v5746_v61 }
 0x806   : > { %5505 = vmatprep.mubr.msk.bf16.mxu0 %vm1299_vm15, %v5747_v44 }
 0x80d   : > { %5506 = vmatmul.mubr.msk.bf16.gmra.mxu0 %vm1299_vm15, %v5748_v52 }
 0x80e   : > { %5509 = vmatprep.mubr.msk.bf16.mxu0 %vm1299_vm15, %v5749_v62  ;;  %v2708_v62 = vand.u32 %v5759_v60, %v6022_v4 }
 0x815   : > { %5510 = vmatmul.mubr.msk.bf16.gmra.mxu0 %vm1299_vm15, %v5750_v63 }
 0x816   : > { %5513 = vmatprep.mubr.msk.bf16.mxu0 %vm1299_vm15, %v5751_v0 }
 0x81d   : > { %5514 = vmatmul.mubr.msk.bf16.gmra.mxu0 %vm1299_vm15, %v5752_v51 }
 0x855   : > { %v5447_v2 = vpop.f32.mrf.mxu0 }
 0x857   : > { %v1913_v3 = vpop.f32.mrf.mxu0 }
 0x859   : > { %v5448_v5 = vpop.f32.mrf.mxu0 }
 0x85a   : > { %v2201_v31 = vpack.c.bf16 %v5448_v5, %v5447_v2 }
 0x85b   : > { %v1916_v6 = vpop.f32.mrf.mxu0 }
 0x85c   : > { %v2200_v26 = vpack.c.bf16 %v1916_v6, %v1913_v3 }
 0x85d   : > { %v5451_v7 = vpop.f32.mrf.mxu0 }
 0x85f   : > { %v1929_v8 = vpop.f32.mrf.mxu0 }
 0x861   : > { %v5452_v9 = vpop.f32.mrf.mxu0 }
 0x862   : > { %v2203_v38 = vpack.c.bf16 %v5452_v9, %v5451_v7  ;;  %v5760_v9 = vld [vmem:[%s6934_s11 + $0x30] sm:$0x1f]  }
 0x863   : > { %v1932_v10 = vpop.f32.mrf.mxu0 }
 0x864   : > { %v2202_v34 = vpack.c.bf16 %v1932_v10, %v1929_v8 }
 0x865   : > { %v5455_v11 = vpop.f32.mrf.mxu0 }
 0x867   : > { %v1945_v12 = vpop.f32.mrf.mxu0 }
 0x869   : > { %v5456_v13 = vpop.f32.mrf.mxu0 }
 0x86a   : > { %v2207_v17 = vpack.c.bf16 %v5456_v13, %v5455_v11  ;;  %v2808_v13 = vand.u32 %v5760_v9, %v6022_v4 }
 0x86b   : > { %v1948_v15 = vpop.f32.mrf.mxu0 }
 0x86c   : > { %v2206_v16 = vpack.c.bf16 %v1948_v15, %v1945_v12 }
 0x86d   : > { %v5459_v18 = vpop.f32.mrf.mxu0 }
 0x86e   : > { %5519 = vmatprep.mubr.msk.bf16.mxu1 %vm617_vm2, %v2206_v16 }
 0x86f   : > { %v1961_v20 = vpop.f32.mrf.mxu0  ;;  %5520 = vmatmul.mubr.msk.bf16.vlgmr.msra.gmra.mxu1 %vm617_vm2, %v2207_v17 }
 0x870   : > { %5528 = vmatpush3.bf16.msra.mxu1 %v2316_v59 }
 0x871   : > { %v5460_v21 = vpop.f32.mrf.mxu0  ;;  %5537 = vmatprep.subr.bf16.mxu1 %v2408_v19 }
 0x872   : > { %v2209_v24 = vpack.c.bf16 %v5460_v21, %v5459_v18 }
 0x873   : > { %v1964_v22 = vpop.f32.mrf.mxu0 }
 0x874   : > { %v2208_v23 = vpack.c.bf16 %v1964_v22, %v1961_v20 }
 0x875   : > { %v5463_v25 = vpop.f32.mrf.mxu0 }
 0x876   : > { %5523 = vmatprep.mubr.msk.bf16.mxu1 %vm617_vm2, %v2208_v23  ;;  %v5761_v23 = vld [vmem:[%s6934_s11 + $0x40] sm:$0x1f]  }
 0x877   : > { %v1977_v27 = vpop.f32.mrf.mxu0  ;;  %5524 = vmatmul.mubr.msk.bf16.gmra.mxu1 %vm617_vm2, %v2209_v24 }
 0x878   : > { %5529 = vmatprep.mubr.msk.bf16.mxu1 %vm617_vm2, %v2200_v26 }
 0x879   : > { %v5464_v28 = vpop.f32.mrf.mxu0 }
 0x87a   : > { %v2384_v50 = vpack.c.bf16 %v5464_v28, %v5463_v25 }
 0x87b   : > { %v1980_v30 = vpop.f32.mrf.mxu0 }
 0x87c   : > { %v2383_v46 = vpack.c.bf16 %v1980_v30, %v1977_v27  ;;  %v3008_v27 = vand.u32 %v5761_v23, %v6022_v4 }
 0x87d   : > { %v5467_v32 = vpop.f32.mrf.mxu0 }
 0x87f   : > { %v1993_v35 = vpop.f32.mrf.mxu0  ;;  %5530 = vmatmul.mubr.msk.bf16.vlgmr.msra.gmra.mxu1 %vm617_vm2, %v2201_v31 }
 0x880   : > { %5533 = vmatprep.mubr.msk.bf16.mxu1 %vm617_vm2, %v2202_v34  ;;  %5538 = vmatpush3.bf16.msra.mxu1 %v2408_v19 }
 0x881   : > { %v5468_v36 = vpop.f32.mrf.mxu0  ;;  %5547 = vmatprep.subr.bf16.mxu1 %v2508_v33 }
 0x882   : > { %v2386_v58 = vpack.c.bf16 %v5468_v36, %v5467_v32 }
 0x883   : > { %v1996_v37 = vpop.f32.mrf.mxu0 }
 0x884   : > { %v2385_v55 = vpack.c.bf16 %v1996_v37, %v1993_v35 }
 0x885   : > { %v5471_v45 = vpop.f32.mrf.mxu0 }
 0x887   : > { %v2009_v47 = vpop.f32.mrf.mxu0  ;;  %5534 = vmatmul.mubr.msk.bf16.gmra.mxu1 %vm617_vm2, %v2203_v38 }
 0x888   : > { %5539 = vmatprep.mubr.msk.bf16.mxu1 %vm617_vm2, %v2383_v46 }
 0x889   : > { %v5472_v48 = vpop.f32.mrf.mxu0 }
 0x88a   : > { %v2484_v44 = vpack.c.bf16 %v5472_v48, %v5471_v45 }
 0x88b   : > { %v2012_v40 = vpop.f32.mrf.mxu0 }
 0x88c   : > { %v2483_v42 = vpack.c.bf16 %v2012_v40, %v2009_v47 }
 0x88d   : > { %v5475_v53 = vpop.f32.mrf.mxu0 }
 0x88f   : > { %v2025_v56 = vpop.f32.mrf.mxu0  ;;  %5540 = vmatmul.mubr.msk.bf16.vlgmr.msra.gmra.mxu1 %vm617_vm2, %v2384_v50 }
 0x890   : > { %5543 = vmatprep.mubr.msk.bf16.mxu1 %vm617_vm2, %v2385_v55  ;;  %5548 = vmatpush3.bf16.msra.mxu1 %v2508_v33 }
 0x891   : > { %v5476_v57 = vpop.f32.mrf.mxu0  ;;  %5557 = vmatprep.subr.bf16.mxu1 %v2608_v54 }
 0x892   : > { %v2486_v3 = vpack.c.bf16 %v5476_v57, %v5475_v53 }
 0x893   : > { %v2028_v49 = vpop.f32.mrf.mxu0 }
 0x894   : > { %v2485_v63 = vpack.c.bf16 %v2028_v49, %v2025_v56 }
 0x895   : > { %v5479_v41 = vpop.f32.mrf.mxu0 }
 0x897   : > { %v2041_v59 = vpop.f32.mrf.mxu0  ;;  %5544 = vmatmul.mubr.msk.bf16.gmra.mxu1 %vm617_vm2, %v2386_v58 }
 0x898   : > { %5549 = vmatprep.mubr.msk.bf16.mxu1 %vm617_vm2, %v2483_v42 }
 0x899   : > { %v5480_v43 = vpop.f32.mrf.mxu0 }
 0x89a   : > { %v2584_v11 = vpack.c.bf16 %v5480_v43, %v5479_v41 }
 0x89b   : > { %v2044_v61 = vpop.f32.mrf.mxu0 }
 0x89c   : > { %v2583_v6 = vpack.c.bf16 %v2044_v61, %v2041_v59 }
 0x89d   : > { %v5483_v52 = vpop.f32.mrf.mxu0 }
 0x89f   : > { %v2057_v0 = vpop.f32.mrf.mxu0  ;;  %5550 = vmatmul.mubr.msk.bf16.vlgmr.msra.gmra.mxu1 %vm617_vm2, %v2484_v44 }
 0x8a0   : > { %5553 = vmatprep.mubr.msk.bf16.mxu1 %vm617_vm2, %v2485_v63  ;;  %5558 = vmatpush3.bf16.msra.mxu1 %v2608_v54 }
 0x8a1   : > { %v5484_v51 = vpop.f32.mrf.mxu0  ;;  %5567 = vmatprep.subr.bf16.mxu1 %v2708_v62 }
 0x8a2   : > { %v2586_v18 = vpack.c.bf16 %v5484_v51, %v5483_v52 }
 0x8a3   : > { %v2060_v2 = vpop.f32.mrf.mxu0 }
 0x8a4   : > { %v2585_v14 = vpack.c.bf16 %v2060_v2, %v2057_v0 }
 0x8a5   : > { %v5487_v5 = vpop.f32.mrf.mxu0 }
 0x8a7   : > { %v2073_v7 = vpop.f32.mrf.mxu0  ;;  %5554 = vmatmul.mubr.msk.bf16.gmra.mxu1 %vm617_vm2, %v2486_v3 }
 0x8a8   : > { %5559 = vmatprep.mubr.msk.bf16.mxu1 %vm617_vm2, %v2583_v6 }
 0x8a9   : > { %v5488_v8 = vpop.f32.mrf.mxu0 }
 0x8aa   : > { %v2684_v25 = vpack.c.bf16 %v5488_v8, %v5487_v5 }
 0x8ab   : > { %v2076_v10 = vpop.f32.mrf.mxu0 }
 0x8ac   : > { %v2683_v20 = vpack.c.bf16 %v2076_v10, %v2073_v7 }
 0x8ad   : > { %v5491_v12 = vpop.f32.mrf.mxu0 }
 0x8af   : > { %v2089_v15 = vpop.f32.mrf.mxu0  ;;  %5560 = vmatmul.mubr.msk.bf16.vlgmr.msra.gmra.mxu1 %vm617_vm2, %v2584_v11  ;;  %v5762_v11 = vld [vmem:[%s6936_s13] sm:$0xff]  }
 0x8b0   : > { %5563 = vmatprep.mubr.msk.bf16.mxu1 %vm617_vm2, %v2585_v14  ;;  %5568 = vmatpush3.bf16.msra.mxu1 %v2708_v62 }
 0x8b1   : > { %v5492_v16 = vpop.f32.mrf.mxu0  ;;  %5577 = vmatprep.subr.bf16.mxu1 %v2808_v13 }
 0x8b2   : > { %v2686_v32 = vpack.c.bf16 %v5492_v16, %v5491_v12 }
 0x8b3   : > { %v2092_v17 = vpop.f32.mrf.mxu0 }
 0x8b4   : > { %v2685_v28 = vpack.c.bf16 %v2092_v17, %v2089_v15 }
 0x8b5   : > { %v5495_v19 = vpop.f32.mrf.mxu0 }
 0x8b7   : > { %v2105_v21 = vpop.f32.mrf.mxu0  ;;  %5564 = vmatmul.mubr.msk.bf16.gmra.mxu1 %vm617_vm2, %v2586_v18 }
 0x8b8   : > { %5569 = vmatprep.mubr.msk.bf16.mxu1 %vm617_vm2, %v2683_v20 }
 0x8b9   : > { %v5496_v22 = vpop.f32.mrf.mxu0 }
 0x8ba   : > { %v2784_v45 = vpack.c.bf16 %v5496_v22, %v5495_v19 }
 0x8bb   : > { %v2108_v24 = vpop.f32.mrf.mxu0 }
 0x8bc   : > { %v2783_v34 = vpack.c.bf16 %v2108_v24, %v2105_v21 }
 0x8bd   : > { %v5499_v26 = vpop.f32.mrf.mxu0 }
 0x8bf   : > { %v2121_v29 = vpop.f32.mrf.mxu0  ;;  %5570 = vmatmul.mubr.msk.bf16.vlgmr.msra.gmra.mxu1 %vm617_vm2, %v2684_v25 }
 0x8c0   : > { %5573 = vmatprep.mubr.msk.bf16.mxu1 %vm617_vm2, %v2685_v28  ;;  %5578 = vmatpush3.bf16.msra.mxu1 %v2808_v13 }
 0x8c1   : > { %v5500_v30 = vpop.f32.mrf.mxu0  ;;  %5597 = vmatprep.subr.bf16.mxu1 %v3008_v27 }
 0x8c2   : > { %v2786_v54 = vpack.c.bf16 %v5500_v30, %v5499_v26 }
 0x8c3   : > { %v2124_v31 = vpop.f32.mrf.mxu0 }
 0x8c4   : > { %v2785_v48 = vpack.c.bf16 %v2124_v31, %v2121_v29 }
 0x8c5   : > { %v5503_v33 = vpop.f32.mrf.mxu0 }
 0x8c7   : > { %v2137_v35 = vpop.f32.mrf.mxu0  ;;  %5574 = vmatmul.mubr.msk.bf16.gmra.mxu1 %vm617_vm2, %v2686_v32 }
 0x8c8   : > { %5579 = vmatprep.mubr.msk.bf16.mxu1 %vm617_vm2, %v2783_v34 }
 0x8c9   : > { %v5504_v36 = vpop.f32.mrf.mxu0 }
 0x8ca   : > { %v2884_v46 = vpack.c.bf16 %v5504_v36, %v5503_v33 }
 0x8cb   : > { %v2140_v37 = vpop.f32.mrf.mxu0 }
 0x8cc   : > { %v2883_v38 = vpack.c.bf16 %v2140_v37, %v2137_v35 }
 0x8cd   : > { %v5507_v47 = vpop.f32.mrf.mxu0 }
 0x8ce   : > { %5589 = vmatprep.mubr.msk.bf16.mxu0 %vm617_vm2, %v2883_v38 }
 0x8cf   : > { %v2153_v39 = vpop.f32.mrf.mxu0  ;;  %5580 = vmatmul.mubr.msk.bf16.vlgmr.msra.gmra.mxu1 %vm617_vm2, %v2784_v45  ;;  %5590 = vmatmul.mubr.msk.bf16.vlgmr.msra.gmra.mxu0 %vm617_vm2, %v2884_v46 }
 0x8d0   : > { %5583 = vmatprep.mubr.msk.bf16.mxu1 %vm617_vm2, %v2785_v48  ;;  %5598 = vmatpush3.bf16.msra.mxu1 %v3008_v27 }
 0x8d1   : > { %v5508_v40 = vpop.f32.mrf.mxu0 }
 0x8d2   : > { %v2886_v55 = vpack.c.bf16 %v5508_v40, %v5507_v47 }
 0x8d3   : > { %v2156_v50 = vpop.f32.mrf.mxu0 }
 0x8d4   : > { %v2885_v53 = vpack.c.bf16 %v2156_v50, %v2153_v39 }
 0x8d5   : > { %v5511_v56 = vpop.f32.mrf.mxu0 }
 0x8d6   : > { %5593 = vmatprep.mubr.msk.bf16.mxu0 %vm617_vm2, %v2885_v53 }
 0x8d7   : > { %v2169_v57 = vpop.f32.mrf.mxu0  ;;  %5584 = vmatmul.mubr.msk.bf16.gmra.mxu1 %vm617_vm2, %v2786_v54  ;;  %5594 = vmatmul.mubr.msk.bf16.gmra.mxu0 %vm617_vm2, %v2886_v55 }
 0x8d8   : > { %5615 = vmatprep.mubr.msk.bf16.mxu0 %vm933_vm5, %v5762_v11 }
 0x8d9   : > { %v5512_v49 = vpop.f32.mrf.mxu0 }
 0x8da   : > { %v2984_v42 = vpack.c.bf16 %v5512_v49, %v5511_v56 }
 0x8db   : > { %v2172_v58 = vpop.f32.mrf.mxu0 }
 0x8dc   : > { %v2983_v41 = vpack.c.bf16 %v2172_v58, %v2169_v57 }
 0x8dd   : > { %v5515_v59 = vpop.f32.mrf.mxu0 }
 0x8de   : > { %5599 = vmatprep.mubr.msk.bf16.mxu1 %vm617_vm2, %v2983_v41 }
 0x8df   : > { %v2185_v43 = vpop.f32.mrf.mxu0  ;;  %5600 = vmatmul.mubr.msk.bf16.vlgmr.msra.gmra.mxu1 %vm617_vm2, %v2984_v42 }
 0x8e1   : > { %v5516_v60 = vpop.f32.mrf.mxu0 }
 0x8e2   : > { %v2986_v52 = vpack.c.bf16 %v5516_v60, %v5515_v59 }
 0x8e3   : > { %v2188_v61 = vpop.f32.mrf.mxu0 }
 0x8e4   : > { %v2985_v44 = vpack.c.bf16 %v2188_v61, %v2185_v43 }
 0x8e6   : > { %5603 = vmatprep.mubr.msk.bf16.mxu1 %vm617_vm2, %v2985_v44 }
 0x8e7   : > { %5604 = vmatmul.mubr.msk.bf16.gmra.mxu1 %vm617_vm2, %v2986_v52  ;;  %v5778_v52 = vld [vmem:[%s6937_s14 + $0x30] ss:$8 sps:$4 sm:$0x1f]  }
 0x8e8   : > { %3559 = vmatprep.mubr.bf16.mxu1 %v5886_v1 }
 0x92f   : > { %v5521_v62 = vpop.f32.mrf.mxu1 }
 0x931   : > { %v2267_v63 = vpop.f32.mrf.mxu1 }
 0x933   : > { %v5522_v0 = vpop.f32.mrf.mxu1 }
 0x935   : > { %v2270_v51 = vpop.f32.mrf.mxu1 }
 0x937   : > { %v5525_v2 = vpop.f32.mrf.mxu1 }
 0x939   : > { %v2283_v3 = vpop.f32.mrf.mxu1 }
 0x93b   : > { %v5526_v5 = vpop.f32.mrf.mxu1 }
 0x93d   : > { %v2286_v6 = vpop.f32.mrf.mxu1 }
 0x93f   : > { %v5531_v7 = vpop.f32.mrf.mxu1 }
 0x940   : > { %v2361_v8 = vadd.f32 %v5531_v7, %v5521_v62  ;;  %v5780_v62 = vld [vmem:[%s6937_s14 + $0x34] ss:$8 sps:$4 sm:$0x1f]  }
 0x941   : > { %v2352_v9 = vpop.f32.mrf.mxu1 }
 0x942   : > { %v2353_v10 = vadd.f32 %v2352_v9, %v2267_v63 }
 0x943   : > { %v5532_v12 = vpop.f32.mrf.mxu1 }
 0x944   : > { %v2364_v13 = vadd.f32 %v5532_v12, %v5522_v0  ;;  %v3525_v0 = vand.u32 %v5780_v62, %v6022_v4 }
 0x945   : > { %v2355_v14 = vpop.f32.mrf.mxu1 }
 0x946   : > { %v2356_v15 = vadd.f32 %v2355_v14, %v2270_v51  ;;  %v3522_v51 = vand.u32 %v5778_v52, %v6022_v4  ;;  %3539 = vmatprep.subr.bf16.mxu1 %v3525_v0 }
 0x947   : > { %v5535_v16 = vpop.f32.mrf.mxu1 }
 0x948   : > { %v2377_v17 = vadd.f32 %v5535_v16, %v5525_v2  ;;  %3540 = vmatpush1.bf16.msra.mxu1 %v3522_v51  ;;  %v6549_v16 = vpop.permute.xlu1 %3128 }
 0x949   : > { %v2368_v18 = vpop.f32.mrf.mxu1 }
 0x94a   : > { %v2369_v19 = vadd.f32 %v2368_v18, %v2283_v3 }
 0x94b   : > { %v5536_v20 = vpop.f32.mrf.mxu1 }
 0x94c   : > { %v2380_v21 = vadd.f32 %v5536_v20, %v5526_v5 }
 0x94d   : > { %v2371_v22 = vpop.f32.mrf.mxu1 }
 0x94e   : > { %v2372_v23 = vadd.f32 %v2371_v22, %v2286_v6 }
 0x94f   : > { %v5541_v24 = vpop.f32.mrf.mxu1 }
 0x950   : > { %v2477_v25 = vadd.f32 %v5541_v24, %v2361_v8 }
 0x951   : > { %v2444_v26 = vpop.f32.mrf.mxu1 }
 0x952   : > { %v2475_v27 = vadd.f32 %v2444_v26, %v2353_v10 }
 0x953   : > { %v5542_v28 = vpop.f32.mrf.mxu1 }
 0x954   : > { %v2478_v29 = vadd.f32 %v5542_v28, %v2364_v13  ;;  %v6547_v13 = vpop.permute.xlu0 %3123 }
 0x955   : > { %v2447_v30 = vpop.f32.mrf.mxu1 }
 0x956   : > { %v2476_v31 = vadd.f32 %v2447_v30, %v2356_v15 }
 0x957   : > { %v5545_v32 = vpop.f32.mrf.mxu1 }
 0x958   : > { %v2481_v33 = vadd.f32 %v5545_v32, %v2377_v17 }
 0x959   : > { %v2460_v34 = vpop.f32.mrf.mxu1 }
 0x95a   : > { %v6529_v35 = vadd.f32 %v2460_v34, %v2369_v19 }
 0x95b   : > { %v5546_v36 = vpop.f32.mrf.mxu1 }
 0x95c   : > { %v6531_v37 = vadd.f32 %v5546_v36, %v2380_v21  ;;  %v6551_v21 = vpop.permute.xlu0 %3113 }
 0x95d   : > { %v2463_v38 = vpop.f32.mrf.mxu1 }
 0x95e   : > { %v6533_v45 = vadd.f32 %v2463_v38, %v2372_v23 }
 0x95f   : > { %v5551_v46 = vpop.f32.mrf.mxu1 }
 0x960   : > { %v2577_v47 = vadd.f32 %v5551_v46, %v2477_v25  ;;  %v6553_v25 = vpop.permute.xlu1 %3118 }
 0x961   : > { %v2544_v48 = vpop.f32.mrf.mxu1 }
 0x962   : > { %v2575_v39 = vadd.f32 %v2544_v48, %v2475_v27 }
 0x963   : > { %v5552_v40 = vpop.f32.mrf.mxu1 }
 0x964   : > { %v2578_v50 = vadd.f32 %v5552_v40, %v2478_v29  ;;  %v3109_v52 = vpop.permute.xlu1 %3108 }
 0x965   : > { %v2547_v53 = vpop.f32.mrf.mxu1 }
 0x966   : > { %v2576_v54 = vadd.f32 %v2547_v53, %v2476_v31 }
 0x967   : > { %v5555_v55 = vpop.f32.mrf.mxu1 }
 0x968   : > { %v2581_v31 = vadd.f32 %v5555_v55, %v2481_v33 }
 0x969   : > { %v2560_v56 = vpop.f32.mrf.mxu1 }
 0x96a   : > { %v2579_v38 = vadd.f32 %v2560_v56, %v6529_v35 }
 0x96b   : > { %v5556_v57 = vpop.f32.mrf.mxu1 }
 0x96d   : > { %v6535_v49 = vpop.f32.mrf.mxu1 }
 0x96e   : > { %v2580_v55 = vadd.f32 %v6535_v49, %v6533_v45  ;;  %v3099_v49 = vpop.permute.xlu1 %3098 }
 0x96f   : > { %v5561_v58 = vpop.f32.mrf.mxu1 }
 0x970   : > { %v2677_v18 = vadd.f32 %v5561_v58, %v2577_v47  ;;  %v3104_v47 = vpop.permute.xlu0 %3103  ;;  %v2582_v58 = vadd.f32 %v5556_v57, %v6531_v37 }
 0x971   : > { %v2644_v41 = vpop.f32.mrf.mxu1 }
 0x972   : > { %v2675_v22 = vadd.f32 %v2644_v41, %v2575_v39 }
 0x973   : > { %v5562_v42 = vpop.f32.mrf.mxu1 }
 0x974   : > { %v2678_v26 = vadd.f32 %v5562_v42, %v2578_v50 }
 0x975   : > { %v2647_v59 = vpop.f32.mrf.mxu1 }
 0x976   : > { %v2676_v32 = vadd.f32 %v2647_v59, %v2576_v54 }
 0x977   : > { %v5565_v43 = vpop.f32.mrf.mxu1 }
 0x978   : > { %v2681_v48 = vadd.f32 %v5565_v43, %v2581_v31 }
 0x979   : > { %v2660_v60 = vpop.f32.mrf.mxu1 }
 0x97a   : > { %v2679_v41 = vadd.f32 %v2660_v60, %v2579_v38 }
 0x97b   : > { %v5566_v61 = vpop.f32.mrf.mxu1 }
 0x97c   : > { %v2682_v35 = vadd.f32 %v5566_v61, %v2582_v58 }
 0x97d   : > { %v6537_v44 = vpop.f32.mrf.mxu1 }
 0x97f   : > { %v5571_v63 = vpop.f32.mrf.mxu1 }
 0x980   : > { %v2777_v23 = vadd.f32 %v5571_v63, %v2677_v18 }
 0x981   : > { %v2744_v2 = vpop.f32.mrf.mxu1 }
 0x982   : > { %v2775_v27 = vadd.f32 %v2744_v2, %v2675_v22  ;;  %v2680_v2 = vadd.f32 %v6537_v44, %v2580_v55 }
 0x983   : > { %v5572_v3 = vpop.f32.mrf.mxu1 }
 0x984   : > { %v2778_v34 = vadd.f32 %v5572_v3, %v2678_v26 }
 0x985   : > { %v2747_v5 = vpop.f32.mrf.mxu1 }
 0x986   : > { %v2776_v40 = vadd.f32 %v2747_v5, %v2676_v32 }
 0x987   : > { %v5575_v6 = vpop.f32.mrf.mxu1 }
 0x988   : > { %v2781_v62 = vadd.f32 %v5575_v6, %v2681_v48  ;;  %v3094_v6 = vpop.permute.xlu0 %3093 }
 0x989   : > { %v2760_v7 = vpop.f32.mrf.mxu1 }
 0x98a   : > { %v2779_v56 = vadd.f32 %v2760_v7, %v2679_v41 }
 0x98b   : > { %v5576_v8 = vpop.f32.mrf.mxu1 }
 0x98c   : > { %v2782_v37 = vadd.f32 %v5576_v8, %v2682_v35 }
 0x98d   : > { %v2763_v9 = vpop.f32.mrf.mxu1 }
 0x98f   : > { %v5581_v10 = vpop.f32.mrf.mxu1  ;;  %v5591_v11 = vpop.f32.mrf.mxu0 }
 0x990   : > { %v2877_v28 = vadd.f32 %v5581_v10, %v2777_v23 }
 0x991   : > { %v2844_v12 = vpop.f32.mrf.mxu1  ;;  %v2944_v14 = vpop.f32.mrf.mxu0 }
 0x992   : > { %v2875_v36 = vadd.f32 %v2844_v12, %v2775_v27  ;;  %v2977_v39 = vadd.f32 %v5591_v11, %v2877_v28  ;;  %v2780_v12 = vadd.f32 %v2763_v9, %v2680_v2  ;;  %v5769_v2 = vld [vmem:[%s6936_s13 + $0x38] sm:$0xff]  }
 0x993   : > { %v5582_v15 = vpop.f32.mrf.mxu1  ;;  %v5592_v19 = vpop.f32.mrf.mxu0 }
 0x994   : > { %v2878_v53 = vadd.f32 %v5582_v15, %v2778_v34  ;;  %v2975_v63 = vadd.f32 %v2944_v14, %v2875_v36 }
 0x995   : > { %v2847_v17 = vpop.f32.mrf.mxu1  ;;  %v2947_v29 = vpop.f32.mrf.mxu0 }
 0x996   : > { %v2876_v33 = vadd.f32 %v2847_v17, %v2776_v40  ;;  %v2978_v43 = vadd.f32 %v5592_v19, %v2878_v53 }
 0x997   : > { %v5585_v20 = vpop.f32.mrf.mxu1  ;;  %v5595_v50 = vpop.f32.mrf.mxu0 }
 0x998   : > { %v2881_v0 = vadd.f32 %v5585_v20, %v2781_v62  ;;  %v2976_v10 = vadd.f32 %v2947_v29, %v2876_v33 }
 0x999   : > { %v2860_v24 = vpop.f32.mrf.mxu1  ;;  %v2960_v60 = vpop.f32.mrf.mxu0 }
 0x99a   : > { %v2879_v57 = vadd.f32 %v2860_v24, %v2779_v56  ;;  %v2981_v61 = vadd.f32 %v5595_v50, %v2881_v0  ;;  %v5767_v0 = vld [vmem:[%s6936_s13 + $0x28] sm:$0xff]  }
 0x99b   : > { %v5586_v30 = vpop.f32.mrf.mxu1  ;;  %v5596_v19 = vpop.f32.mrf.mxu0 }
 0x99c   : > { %v2882_v14 = vadd.f32 %v5586_v30, %v2782_v37  ;;  %v2979_v18 = vadd.f32 %v2960_v60, %v2879_v57  ;;  %v5770_v37 = vld [vmem:[%s6936_s13 + $0x40] sm:$0xff]   ;;  %v5771_v57 = vld [vmem:[%s6936_s13 + $0x48] sm:$0xff]   ;;  %v5772_v60 = vld [vmem:[%s6936_s13 + $0x50] sm:$0xff]  }
 0x99d   : > { %v2863_v46 = vpop.f32.mrf.mxu1  ;;  %v2963_v31 = vpop.f32.mrf.mxu0 }
 0x99e   : > { %v2880_v20 = vadd.f32 %v2863_v46, %v2780_v12  ;;  %v2982_v26 = vadd.f32 %v5596_v19, %v2882_v14  ;;  %v5781_v12 = vld [vmem:[%s6937_s14 + $0x20] ss:$8 sps:$4 sm:$0xff]   ;;  %v5783_v14 = vld [vmem:[%s6937_s14 + $0x24] ss:$8 sps:$4 sm:$0xff]  }
 0x99f   : > { %v5601_v42 = vpop.f32.mrf.mxu1  ;;  %3541 = vmatprep.subr.bf16.mxu1 %v5783_v14  ;;  %v5816_v19 = vld [vmem:[%s6937_s14 + $0x104] ss:$8 sps:$4 sm:$0xff]  }
 0x9a0   : > { %v3077_v54 = vadd.f32 %v5601_v42, %v2977_v39  ;;  %v2980_v36 = vadd.f32 %v2963_v31, %v2880_v20  ;;  %3542 = vmatpush1.bf16.msra.mxu1 %v5781_v12  ;;  %v5831_v20 = vld [vmem:[%s6937_s14 + $0x154] ss:$8 sps:$4 sm:$0x1f]   ;;  %v5790_v31 = vld [vmem:[%s6937_s14] ss:$8 sps:$4 sm:$0xff]  }
 0x9a1   : > { %v3044_v59 = vpop.f32.mrf.mxu1  ;;  %v5819_v14 = vld [vmem:[%s6937_s14 + $0xa4] ss:$8 sps:$4 sm:$0xff]  }
 0x9a2   : > { %v3075_v51 = vadd.f32 %v3044_v59, %v2975_v63  ;;  %v3133_v3 = vadd.f32 %v3104_v47, %v3077_v54  ;;  %v5765_v59 = vld [vmem:[%s6936_s13 + $0x18] sm:$0xff]  }
 0x9a3   : > { %v5602_v5 = vpop.f32.mrf.mxu1 }
 0x9a4   : > { %v3078_v11 = vadd.f32 %v5602_v5, %v2978_v43  ;;  %v3131_v15 = vadd.f32 %v3094_v6, %v3075_v51  ;;  %v3149_v44 = vmul.f32 0.01, %v3133_v3  ;;  %vm3141_vm4 = vcmp.ge.f32.partialorder %v3133_v3, 0.0  ;;  %v5766_v43 = vld [vmem:[%s6936_s13 + $0x20] sm:$0xff]   ;;  %v5768_v51 = vld [vmem:[%s6936_s13 + $0x30] sm:$0xff]   ;;  %v5775_v6 = vld [vmem:[%s6936_s13 + $0x68] sm:$0xff]  }
 0x9a5   : > { %v3047_v45 = vpop.f32.mrf.mxu1  ;;  %v5774_v5 = vld [vmem:[%s6936_s13 + $0x60] sm:$0xff]  }
 0x9a6   : > { %v3134_v7 = vadd.f32 %v3109_v52, %v3078_v11  ;;  %v3076_v17 = vadd.f32 %v3047_v45, %v2976_v10  ;;  %v3147_v27 = vmul.f32 0.01, %v3131_v15  ;;  %vm3139_vm7 = vcmp.ge.f32.partialorder %v3131_v15, 0.0  ;;  %v5776_v10 = vld [vmem:[%s6936_s13 + $0x70] sm:$0xff]   ;;  %v5777_v11 = vld [vmem:[%s6936_s13 + $0x78] sm:$0xff]  }
 0x9a7   : > { %v5605_v8 = vpop.f32.mrf.mxu1  ;;  %v3157_v47 = vsel %vm3141_vm4, %v3133_v3, %v3149_v44  ;;  %v5773_v3 = vld [vmem:[%s6936_s13 + $0x58] sm:$0xff]   ;;  %v4311_v44 = vand.u32 %v5831_v20, %v6022_v4 }
 0x9a8   : > { %vm3142_vm2 = vcmp.ge.f32.partialorder %v3134_v7, 0.0  ;;  %v3150_v22 = vmul.f32 0.01, %v3134_v7  ;;  %v3132_v23 = vadd.f32 %v3099_v49, %v3076_v17  ;;  %v3081_v24 = vadd.f32 %v5605_v8, %v2981_v61  ;;  %v5787_v49 = vld [vmem:[%s6937_s14 + $0x110] ss:$8 sps:$4 sm:$0x1f]  }
 0x9a9   : > { %v3060_v9 = vpop.f32.mrf.mxu1  ;;  %v3155_v50 = vsel %vm3139_vm7, %v3131_v15, %v3147_v27  ;;  %v5786_v15 = vld [vmem:[%s6937_s14 + $0x14] ss:$8 sps:$4 sm:$0x1f]   ;;  %v4148_v17 = vand.u32 %v5787_v49, %v6022_v4 }
 0x9aa   : > { %vm3140_vm6 = vcmp.ge.f32.partialorder %v3132_v23, 0.0  ;;  %v3148_v28 = vmul.f32 0.01, %v3132_v23  ;;  %v3137_v29 = vadd.f32 %v6547_v13, %v3081_v24  ;;  %v3079_v30 = vadd.f32 %v3060_v9, %v2979_v18  ;;  %v5789_v61 = vld [vmem:[%s6937_s14 + $0x114] ss:$8 sps:$4 sm:$0x1f]  }
 0x9ab   : > { %v5606_v32 = vpop.f32.mrf.mxu1  ;;  %v3158_v34 = vsel %vm3142_vm2, %v3134_v7, %v3150_v22  ;;  %v3595_v45 = vand.u32 %v5786_v15, %v6022_v4  ;;  %v4151_v7 = vand.u32 %v5789_v61, %v6022_v4  ;;  %v5814_v18 = vld [vmem:[%s6937_s14 + $0x100] ss:$8 sps:$4 sm:$0xff]   ;;  %v5784_v22 = vld [vmem:[%s6937_s14 + $0x10] ss:$8 sps:$4 sm:$0x1f]   ;;  %vm4852_vm2 = vmor %vm4851_vm3, %vm630_vm0 }
 0x9ac   : > { %v3135_v38 = vadd.f32 %v6551_v21, %v3079_v30  ;;  %v3082_v46 = vadd.f32 %v5606_v32, %v2982_v26  ;;  %v3164_v40 = vpack.c.bf16 %v3158_v34, %v3157_v47  ;;  %v3156_v39 = vsel %vm3140_vm6, %v3132_v23, %v3148_v28  ;;  %v5792_v9 = vld [vmem:[%s6937_s14 + $0x4] ss:$8 sps:$4 sm:$0xff]   ;;  %v5795_v28 = vld [vmem:[%s6937_s14 + $0x54] ss:$8 sps:$4 sm:$0x1f]  }
 0x9ad   : > { %v3063_v48 = vpop.f32.mrf.mxu1  ;;  %v3153_v53 = vmul.f32 0.01, %v3137_v29  ;;  %vm3145_vm8 = vcmp.ge.f32.partialorder %v3137_v29, 0.0  ;;  %v3163_v13 = vpack.c.bf16 %v3156_v39, %v3155_v50  ;;  %3609 = vmatprep.subr.bf16.mxu1 %v3595_v45  ;;  %v3592_v26 = vand.u32 %v5784_v22, %v6022_v4  ;;  %v5793_v32 = vld [vmem:[%s6937_s14 + $0x50] ss:$8 sps:$4 sm:$0x1f]  }
 0x9ae   : > { %v3138_v58 = vadd.f32 %v6549_v16, %v3082_v46  ;;  %v3080_v41 = vadd.f32 %v3063_v48, %v2980_v36  ;;  %v3151_v42 = vmul.f32 0.01, %v3135_v38  ;;  %vm3143_vm10 = vcmp.ge.f32.partialorder %v3135_v38, 0.0  ;;  %v5763_v16 = vld [vmem:[%s6936_s13 + $0x8] sm:$0xff]  }
 0x9af   : > { %v3161_v63 = vsel %vm3145_vm8, %v3137_v29, %v3153_v53  ;;  %v3671_v34 = vand.u32 %v5795_v28, %v6022_v4  ;;  %v3668_v46 = vand.u32 %v5793_v32, %v6022_v4  ;;  %v5798_v48 = vld [vmem:[%s6937_s14 + $0x44] ss:$8 sps:$4 sm:$0xff]   ;;  %v5796_v53 = vld [vmem:[%s6937_s14 + $0x40] ss:$8 sps:$4 sm:$0xff]  }
 0x9b0   : > { %vm3146_vm9 = vcmp.ge.f32.partialorder %v3138_v58, 0.0  ;;  %v3154_v52 = vmul.f32 0.01, %v3138_v58  ;;  %v3136_v62 = vadd.f32 %v6553_v25, %v3080_v41  ;;  %v3159_v55 = vsel %vm3143_vm10, %v3135_v38, %v3151_v42  ;;  %v5764_v25 = vld [vmem:[%s6936_s13 + $0x10] sm:$0xff]   ;;  %v5835_v22 = vld [vmem:[%s6937_s14 + $0x140] ss:$8 sps:$4 sm:$0xff]  }
 0x9b1   : > { %v5822_v15 = vld [vmem:[%s6937_s14 + $0xd4] ss:$8 sps:$4 sm:$0x1f]   ;;  %v5825_v28 = vld [vmem:[%s6937_s14 + $0xc4] ss:$8 sps:$4 sm:$0xff]  }
 0x9b2   : > { %vm3144_vm11 = vcmp.ge.f32.partialorder %v3136_v62, 0.0  ;;  %v3152_v21 = vmul.f32 0.01, %v3136_v62  ;;  %v3162_v33 = vsel %vm3146_vm9, %v3138_v58, %v3154_v52  ;;  %v5799_v58 = vld [vmem:[%s6937_s14 + $0x70] ss:$8 sps:$4 sm:$0x1f]  }
 0x9b3   : > { %v3166_v54 = vpack.c.bf16 %v3162_v33, %v3161_v63  ;;  %v3748_v42 = vand.u32 %v5799_v58, %v6022_v4  ;;  %v5807_v63 = vld [vmem:[%s6937_s14 + $0x94] ss:$8 sps:$4 sm:$0x1f]  }
 0x9b4   : > { %v3160_v35 = vsel %vm3144_vm11, %v3136_v62, %v3152_v21  ;;  %v5804_v21 = vld [vmem:[%s6937_s14 + $0x64] ss:$8 sps:$4 sm:$0xff]  }
 0x9b5   : > { %5607 = vmatprep.subr.bf16.mxu0 %v3166_v54  ;;  %v3165_v56 = vpack.c.bf16 %v3160_v35, %v3159_v55  ;;  %v5805_v55 = vld [vmem:[%s6937_s14 + $0x90] ss:$8 sps:$4 sm:$0x1f]  }
 0x9b6   : > { %5608 = vmatpush3.bf16.msra.mxu0 %v3166_v54  ;;  %v5802_v54 = vld [vmem:[%s6937_s14 + $0x60] ss:$8 sps:$4 sm:$0xff]  }
 0x9b7   : > { %5609 = vmatprep.subr.bf16.mxu0 %v3165_v56 }
 0x9ba   : > { %5610 = vmatpush3.bf16.msra.mxu0 %v3165_v56  ;;  %v3831_v56 = vand.u32 %v5807_v63, %v6022_v4 }
 0x9bb   : > { %5611 = vmatprep.subr.bf16.mxu0 %v3164_v40 }
 0x9be   : > { %5612 = vmatpush3.bf16.msra.mxu0 %v3164_v40  ;;  %v5801_v40 = vld [vmem:[%s6937_s14 + $0x74] ss:$8 sps:$4 sm:$0x1f]  }
 0x9bf   : > { %5613 = vmatprep.subr.bf16.mxu0 %v3163_v13  ;;  %v3751_v50 = vand.u32 %v5801_v40, %v6022_v4 }
 0x9c2   : > { %5614 = vmatpush3.bf16.msra.mxu0 %v3163_v13 }
 0x9c3   : > { %4165 = vmatprep.subr.bf16.mxu0 %v4151_v7  ;;  %v5837_v7 = vld [vmem:[%s6937_s14 + $0x144] ss:$8 sps:$4 sm:$0xff]  }
 0x9c5   : > { %5616 = vmatmul.mubr.msk.bf16.vlgmr.msra.gmra.mxu0 %vm933_vm5, %v5763_v16 }
 0x9c6   : > { %5619 = vmatprep.mubr.msk.bf16.mxu0 %vm933_vm5, %v5764_v25  ;;  %4166 = vmatpush1.bf16.msra.mxu0 %v4148_v17  ;;  %v3828_v25 = vand.u32 %v5805_v55, %v6022_v4  ;;  %v5843_v17 = vld [vmem:[%s6937_s14 + $0x194] ss:$8 sps:$4 sm:$0x1f]   ;;  %v5838_v55 = vld [vmem:[%s6937_s14 + $0x130] ss:$8 sps:$4 sm:$0x1f]  }
 0x9c7   : > { %4167 = vmatprep.subr.bf16.mxu0 %v5816_v19  ;;  %v5820_v19 = vld [vmem:[%s6937_s14 + $0xd0] ss:$8 sps:$4 sm:$0x1f]  }
 0x9ca   : > { %4168 = vmatpush1.bf16.msra.mxu0 %v5814_v18  ;;  %v5817_v18 = vld [vmem:[%s6937_s14 + $0xa0] ss:$8 sps:$4 sm:$0xff]  }
 0x9cb   : > { %4325 = vmatprep.subr.bf16.mxu0 %v4311_v44  ;;  %v3991_v44 = vand.u32 %v5822_v15, %v6022_v4  ;;  %v5864_v15 = vld [vmem:[%s6937_s14 + $0x1b4] ss:$8 sps:$4 sm:$0x1f]  }
 0x9cd   : > { %5620 = vmatmul.mubr.msk.bf16.gmra.mxu0 %vm933_vm5, %v5765_v59 }
 0x9ce   : > { %5623 = vmatprep.mubr.msk.bf16.mxu0 %vm933_vm5, %v5766_v43 }
 0x9d5   : > { %5624 = vmatmul.mubr.msk.bf16.gmra.mxu0 %vm933_vm5, %v5767_v0  ;;  %v5810_v0 = vld [vmem:[%s6937_s14 + $0x84] ss:$8 sps:$4 sm:$0xff]  }
 0x9d6   : > { %5627 = vmatprep.mubr.msk.bf16.mxu0 %vm933_vm5, %v5768_v51  ;;  %v5813_v51 = vld [vmem:[%s6937_s14 + $0xb4] ss:$8 sps:$4 sm:$0x1f]  }
 0x9dd   : > { %5628 = vmatmul.mubr.msk.bf16.gmra.mxu0 %vm933_vm5, %v5769_v2 }
 0x9de   : > { %5631 = vmatprep.mubr.msk.bf16.mxu0 %vm933_vm5, %v5770_v37  ;;  %v5808_v37 = vld [vmem:[%s6937_s14 + $0x80] ss:$8 sps:$4 sm:$0xff]  }
 0x9e5   : > { %5632 = vmatmul.mubr.msk.bf16.gmra.mxu0 %vm933_vm5, %v5771_v57  ;;  %v5811_v57 = vld [vmem:[%s6937_s14 + $0xb0] ss:$8 sps:$4 sm:$0x1f]  }
 0x9e6   : > { %5635 = vmatprep.mubr.msk.bf16.mxu0 %vm933_vm5, %v5772_v60 }
 0x9ed   : > { %5636 = vmatmul.mubr.msk.bf16.gmra.mxu0 %vm933_vm5, %v5773_v3  ;;  %v3911_v3 = vand.u32 %v5813_v51, %v6022_v4 }
 0x9ee   : > { %5639 = vmatprep.mubr.msk.bf16.mxu0 %vm933_vm5, %v5774_v5 }
 0x9f5   : > { %5640 = vmatmul.mubr.msk.bf16.gmra.mxu0 %vm933_vm5, %v5775_v6  ;;  %v5829_v6 = vld [vmem:[%s6937_s14 + $0x150] ss:$8 sps:$4 sm:$0x1f]  }
 0x9f6   : > { %5643 = vmatprep.mubr.msk.bf16.mxu0 %vm933_vm5, %v5776_v10  ;;  %v3908_v10 = vand.u32 %v5811_v57, %v6022_v4  ;;  %v4308_v49 = vand.u32 %v5829_v6, %v6022_v4  ;;  %v5852_v57 = vld [vmem:[%s6937_s14 + $0x174] ss:$8 sps:$4 sm:$0x1f]   ;;  %v5844_v6 = vld [vmem:[%s6937_s14 + $0x120] ss:$8 sps:$4 sm:$0xff]  }
 0x9fd   : > { %5644 = vmatmul.mubr.msk.bf16.gmra.mxu0 %vm933_vm5, %v5777_v11  ;;  %vm3517_vm5 = vcmask 203776  }
 0x9fe   : > { %4185 = vmatprep.mubr.bf16.mxu0 %v5886_v1 }
 0xa85   : > { %v5617_v8 = vpop.f32.mrf.mxu0 }
 0xa87   : > { %v3361_v23 = vpop.f32.mrf.mxu0 }
 0xa89   : > { %v5618_v24 = vpop.f32.mrf.mxu0 }
 0xa8a   : > { %v3493_v27 = vpack.c.bf16 %v5618_v24, %v5617_v8  ;;  %v4471_v24 = vand.u32 %v5843_v17, %v6022_v4  ;;  %v5870_v17 = vld [vmem:[%s6937_s14 + $0x1f4] ss:$8 sps:$4 sm:$0x1f]  }
 0xa8b   : > { %v3364_v29 = vpop.f32.mrf.mxu0 }
 0xa8c   : > { %5126 = vmatmul.mubr.msk.bf16.vlgmr.msra.gmra.mxu1 %vm3517_vm5, %v3493_v27  ;;  %v3488_v47 = vpack.c.bf16 %v3364_v29, %v3361_v23  ;;  %v5841_v23 = vld [vmem:[%s6937_s14 + $0x190] ss:$8 sps:$4 sm:$0x1f]   ;;  %v5828_v29 = vld [vmem:[%s6937_s14 + $0xf4] ss:$8 sps:$4 sm:$0x1f]  }
 0xa8d   : > { %v5621_v30 = vpop.f32.mrf.mxu0  ;;  %3610 = vmatpush1.bf16.msra.mxu1 %v3592_v26  ;;  %3629 = vmatprep.mubr.bf16.mxu1 %v5886_v1  ;;  %v3988_v26 = vand.u32 %v5820_v19, %v6022_v4  ;;  %v5868_v19 = vld [vmem:[%s6937_s14 + $0x1f0] ss:$8 sps:$4 sm:$0x1f]  }
 0xa8e   : > { %3611 = vmatprep.subr.bf16.mxu1 %v5792_v9 }
 0xa8f   : > { %v3377_v36 = vpop.f32.mrf.mxu0 }
 0xa91   : > { %v5622_v38 = vpop.f32.mrf.mxu0  ;;  %3612 = vmatpush1.bf16.msra.mxu1 %v5790_v31  ;;  %v4468_v31 = vand.u32 %v5841_v23, %v6022_v4  ;;  %v5871_v23 = vld [vmem:[%s6937_s14 + $0x1e0] ss:$8 sps:$4 sm:$0xff]  }
 0xa92   : > { %3685 = vmatprep.subr.bf16.mxu1 %v3671_v34  ;;  %v3720_v43 = vpack.c.bf16 %v5622_v38, %v5621_v30  ;;  %v5849_v34 = vld [vmem:[%s6937_s14 + $0x184] ss:$8 sps:$4 sm:$0xff]   ;;  %v5823_v38 = vld [vmem:[%s6937_s14 + $0xc0] ss:$8 sps:$4 sm:$0xff]  }
 0xa93   : > { %v3380_v39 = vpop.f32.mrf.mxu0 }
 0xa94   : > { %5131 = vmatmul.mubr.msk.bf16.vlgmr.msra.gmra.mxu1 %vm3517_vm5, %v3488_v47  ;;  %v3640_v62 = vpack.c.bf16 %v3380_v39, %v3377_v36  ;;  %v5855_v36 = vld [vmem:[%s6937_s14 + $0x1d4] ss:$8 sps:$4 sm:$0x1f]   ;;  %v5847_v39 = vld [vmem:[%s6937_s14 + $0x180] ss:$8 sps:$4 sm:$0xff]  }
 0xa95   : > { %3686 = vmatpush1.bf16.msra.mxu1 %v3668_v46  ;;  %3705 = vmatprep.mubr.bf16.mxu1 %v5886_v1  ;;  %v6687_v41 = vpop.f32.mrf.mxu0  ;;  %v5826_v46 = vld [vmem:[%s6937_s14 + $0xf0] ss:$8 sps:$4 sm:$0x1f]   ;;  %v4631_v58 = vand.u32 %v5855_v36, %v6022_v4 }
 0xa96   : > { %3687 = vmatprep.subr.bf16.mxu1 %v5798_v48  ;;  %v4071_v48 = vand.u32 %v5828_v29, %v6022_v4 }
 0xa97   : > { %v3393_v13 = vpop.f32.mrf.mxu0 }
 0xa99   : > { %3688 = vmatpush1.bf16.msra.mxu1 %v5796_v53  ;;  %v6691_v52 = vpop.f32.mrf.mxu0  ;;  %v5853_v53 = vld [vmem:[%s6937_s14 + $0x1d0] ss:$8 sps:$4 sm:$0x1f]  }
 0xa9a   : > { %3765 = vmatprep.subr.bf16.mxu1 %v3751_v50  ;;  %v3880_v9 = vpack.c.bf16 %v6691_v52, %v6687_v41  ;;  %v4068_v41 = vand.u32 %v5826_v46, %v6022_v4  ;;  %v5840_v52 = vld [vmem:[%s6937_s14 + $0x134] ss:$8 sps:$4 sm:$0x1f]  }
 0xa9b   : > { %v3396_v33 = vpop.f32.mrf.mxu0 }
 0xa9c   : > { %5140 = vmatmul.mubr.msk.bf16.vlgmr.msra.gmra.mxu1 %vm3517_vm5, %v3640_v62  ;;  %v3800_v12 = vpack.c.bf16 %v3396_v33, %v3393_v13  ;;  %v5861_v33 = vld [vmem:[%s6937_s14 + $0x1c4] ss:$8 sps:$4 sm:$0xff]  }
 0xa9d   : > { %3766 = vmatpush1.bf16.msra.mxu1 %v3748_v42  ;;  %3785 = vmatprep.mubr.bf16.mxu1 %v5886_v1  ;;  %v6707_v35 = vpop.f32.mrf.mxu0  ;;  %v5834_v42 = vld [vmem:[%s6937_s14 + $0xe4] ss:$8 sps:$4 sm:$0xff]  }
 0xa9e   : > { %3767 = vmatprep.subr.bf16.mxu1 %v5804_v21  ;;  %v4628_v21 = vand.u32 %v5853_v53, %v6022_v4 }
 0xa9f   : > { %v6710_v16 = vpop.f32.mrf.mxu0 }
 0xaa1   : > { %3768 = vmatpush1.bf16.msra.mxu1 %v5802_v54  ;;  %v6713_v59 = vpop.f32.mrf.mxu0  ;;  %v5832_v54 = vld [vmem:[%s6937_s14 + $0xe0] ss:$8 sps:$4 sm:$0xff]  }
 0xaa2   : > { %3845 = vmatprep.subr.bf16.mxu1 %v3831_v56 }
 0xaa3   : > { %v6721_v2 = vpop.f32.mrf.mxu0 }
 0xaa4   : > { %5149 = vmatmul.mubr.msk.bf16.vlgmr.msra.gmra.mxu1 %vm3517_vm5, %v3720_v43  ;;  %v3960_v13 = vpack.c.bf16 %v6721_v2, %v6710_v16  ;;  %v4231_v16 = vand.u32 %v5840_v52, %v6022_v4  ;;  %v5859_v43 = vld [vmem:[%s6937_s14 + $0x1c0] ss:$8 sps:$4 sm:$0xff]   ;;  %v4040_v2 = vpack.c.bf16 %v6713_v59, %v6707_v35  ;;  %v5850_v35 = vld [vmem:[%s6937_s14 + $0x170] ss:$8 sps:$4 sm:$0x1f]   ;;  %v4391_v59 = vand.u32 %v5852_v57, %v6022_v4 }
 0xaa5   : > { %3846 = vmatpush1.bf16.msra.mxu1 %v3828_v25  ;;  %3865 = vmatprep.mubr.bf16.mxu1 %v5886_v1  ;;  %v6731_v60 = vpop.f32.mrf.mxu0 }
 0xaa6   : > { %3847 = vmatprep.subr.bf16.mxu1 %v5810_v0  ;;  %v4228_v0 = vand.u32 %v5838_v55, %v6022_v4 }
 0xaa7   : > { %v3425_v5 = vpop.f32.mrf.mxu0 }
 0xaa9   : > { %3848 = vmatpush1.bf16.msra.mxu1 %v5808_v37  ;;  %v6738_v11 = vpop.f32.mrf.mxu0  ;;  %v5846_v37 = vld [vmem:[%s6937_s14 + $0x124] ss:$8 sps:$4 sm:$0xff]  }
 0xaaa   : > { %3925 = vmatprep.subr.bf16.mxu1 %v3911_v3 }
 0xaab   : > { %v3428_v45 = vpop.f32.mrf.mxu0 }
 0xaac   : > { %5158 = vmatmul.mubr.msk.bf16.vlgmr.msra.gmra.mxu1 %vm3517_vm5, %v3800_v12  ;;  %v4120_v61 = vpack.c.bf16 %v3428_v45, %v3425_v5  ;;  %v4200_v12 = vpack.c.bf16 %v6738_v11, %v6731_v60  ;;  %v5856_v45 = vld [vmem:[%s6937_s14 + $0x160] ss:$8 sps:$4 sm:$0xff]   ;;  %v5862_v60 = vld [vmem:[%s6937_s14 + $0x1b0] ss:$8 sps:$4 sm:$0x1f]   ;;  %v4551_v11 = vand.u32 %v5864_v15, %v6022_v4 }
 0xaad   : > { %3926 = vmatpush1.bf16.msra.mxu1 %v3908_v10  ;;  %3945 = vmatprep.mubr.bf16.mxu1 %v5886_v1  ;;  %v6761_v20 = vpop.f32.mrf.mxu0  ;;  %v4388_v10 = vand.u32 %v5850_v35, %v6022_v4 }
 0xaae   : > { %3927 = vmatprep.subr.bf16.mxu1 %v5819_v14  ;;  %5194 = vmatmul.mubr.msk.bf16.vlgmr.msra.gmra.mxu0 %vm3517_vm5, %v4120_v61  ;;  %v5858_v14 = vld [vmem:[%s6937_s14 + $0x164] ss:$8 sps:$4 sm:$0xff]  }
 0xaaf   : > { %v3441_v8 = vpop.f32.mrf.mxu0  ;;  %4326 = vmatpush1.bf16.msra.mxu0 %v4308_v49  ;;  %4345 = vmatprep.mubr.bf16.mxu0 %v5886_v1  ;;  %v4548_v49 = vand.u32 %v5862_v60, %v6022_v4 }
 0xab0   : > { %4327 = vmatprep.subr.bf16.mxu0 %v5837_v7  ;;  %v5867_v7 = vld [vmem:[%s6937_s14 + $0x1a4] ss:$8 sps:$4 sm:$0xff]  }
 0xab1   : > { %3928 = vmatpush1.bf16.msra.mxu1 %v5817_v18  ;;  %v6774_v27 = vpop.f32.mrf.mxu0  ;;  %v5865_v18 = vld [vmem:[%s6937_s14 + $0x1a0] ss:$8 sps:$4 sm:$0xff]  }
 0xab2   : > { %4005 = vmatprep.subr.bf16.mxu1 %v3991_v44  ;;  %v4360_v61 = vpack.c.bf16 %v6774_v27, %v6761_v20  ;;  %v4711_v20 = vand.u32 %v5870_v17, %v6022_v4  ;;  %v4708_v44 = vand.u32 %v5868_v19, %v6022_v4 }
 0xab3   : > { %v3444_v30 = vpop.f32.mrf.mxu0  ;;  %4328 = vmatpush1.bf16.msra.mxu0 %v5835_v22  ;;  %v5873_v22 = vld [vmem:[%s6937_s14 + $0x1e4] ss:$8 sps:$4 sm:$0xff]  }
 0xab4   : > { %5167 = vmatmul.mubr.msk.bf16.vlgmr.msra.gmra.mxu1 %vm3517_vm5, %v3880_v9  ;;  %v4280_v32 = vpack.c.bf16 %v3444_v30, %v3441_v8  ;;  %4485 = vmatprep.subr.bf16.mxu0 %v4471_v24 }
 0xab5   : > { %4006 = vmatpush1.bf16.msra.mxu1 %v3988_v26  ;;  %4025 = vmatprep.mubr.bf16.mxu1 %v5886_v1  ;;  %v6799_v47 = vpop.f32.mrf.mxu0 }
 0xab6   : > { %4007 = vmatprep.subr.bf16.mxu1 %v5825_v28  ;;  %5212 = vmatmul.mubr.msk.bf16.vlgmr.msra.gmra.mxu0 %vm3517_vm5, %v4280_v32 }
 0xab7   : > { %v3457_v40 = vpop.f32.mrf.mxu0  ;;  %4486 = vmatpush1.bf16.msra.mxu0 %v4468_v31  ;;  %4505 = vmatprep.mubr.bf16.mxu0 %v5886_v1 }
 0xab8   : > { %4487 = vmatprep.subr.bf16.mxu0 %v5849_v34 }
 0xab9   : > { %4008 = vmatpush1.bf16.msra.mxu1 %v5823_v38  ;;  %v6812_v50 = vpop.f32.mrf.mxu0 }
 0xaba   : > { %4085 = vmatprep.subr.bf16.mxu1 %v4071_v48  ;;  %v4520_v8 = vpack.c.bf16 %v6812_v50, %v6799_v47 }
 0xabb   : > { %v3460_v62 = vpop.f32.mrf.mxu0  ;;  %4488 = vmatpush1.bf16.msra.mxu0 %v5847_v39 }
 0xabc   : > { %5176 = vmatmul.mubr.msk.bf16.vlgmr.msra.gmra.mxu1 %vm3517_vm5, %v3960_v13  ;;  %v4440_v63 = vpack.c.bf16 %v3460_v62, %v3457_v40  ;;  %4645 = vmatprep.subr.bf16.mxu0 %v4631_v58 }
 0xabd   : > { %4086 = vmatpush1.bf16.msra.mxu1 %v4068_v41  ;;  %4105 = vmatprep.mubr.bf16.mxu1 %v5886_v1  ;;  %v6834_v56 = vpop.f32.mrf.mxu0 }
 0xabe   : > { %4087 = vmatprep.subr.bf16.mxu1 %v5834_v42  ;;  %5230 = vmatmul.mubr.msk.bf16.vlgmr.msra.gmra.mxu0 %vm3517_vm5, %v4440_v63 }
 0xabf   : > { %v3473_v25 = vpop.f32.mrf.mxu0  ;;  %4646 = vmatpush1.bf16.msra.mxu0 %v4628_v21  ;;  %4665 = vmatprep.mubr.bf16.mxu0 %v5886_v1 }
 0xac0   : > { %4647 = vmatprep.subr.bf16.mxu0 %v5861_v33 }
 0xac1   : > { %4088 = vmatpush1.bf16.msra.mxu1 %v5832_v54  ;;  %v5646_v51 = vpop.f32.mrf.mxu0 }
 0xac2   : > { %4245 = vmatprep.subr.bf16.mxu1 %v4231_v16  ;;  %v4680_v4 = vpack.c.bf16 %v5646_v51, %v6834_v56 }
 0xac3   : > { %v3476_v3 = vpop.f32.mrf.mxu0  ;;  %4648 = vmatpush1.bf16.msra.mxu0 %v5859_v43 }
 0xac4   : > { %5185 = vmatmul.mubr.msk.bf16.vlgmr.msra.gmra.mxu1 %vm3517_vm5, %v4040_v2  ;;  %v4600_v5 = vpack.c.bf16 %v3476_v3, %v3473_v25 }
 0xac5   : > { %4246 = vmatpush1.bf16.msra.mxu1 %v4228_v0  ;;  %4265 = vmatprep.mubr.bf16.mxu1 %v5886_v1 }
 0xac6   : > { %4247 = vmatprep.subr.bf16.mxu1 %v5846_v37  ;;  %5248 = vmatmul.mubr.msk.bf16.vlgmr.msra.gmra.mxu0 %vm3517_vm5, %v4600_v5 }
 0xac7   : > { %4836 = vmatprep.mubr.bf16.mxu0 %v5886_v1 }
 0xac9   : > { %4248 = vmatpush1.bf16.msra.mxu1 %v5844_v6 }
 0xaca   : > { %4405 = vmatprep.subr.bf16.mxu1 %v4391_v59 }
 0xacc   : > { %5203 = vmatmul.mubr.msk.bf16.vlgmr.msra.gmra.mxu1 %vm3517_vm5, %v4200_v12 }
 0xacd   : > { %4406 = vmatpush1.bf16.msra.mxu1 %v4388_v10  ;;  %4425 = vmatprep.mubr.bf16.mxu1 %v5886_v1 }
 0xace   : > { %4407 = vmatprep.subr.bf16.mxu1 %v5858_v14 }
 0xad1   : > { %4408 = vmatpush1.bf16.msra.mxu1 %v5856_v45 }
 0xad2   : > { %4565 = vmatprep.subr.bf16.mxu1 %v4551_v11 }
 0xad4   : > { %5221 = vmatmul.mubr.msk.bf16.vlgmr.msra.gmra.mxu1 %vm3517_vm5, %v4360_v61 }
 0xad5   : > { %4566 = vmatpush1.bf16.msra.mxu1 %v4548_v49  ;;  %4585 = vmatprep.mubr.bf16.mxu1 %v5886_v1 }
 0xad6   : > { %4567 = vmatprep.subr.bf16.mxu1 %v5867_v7 }
 0xad9   : > { %4568 = vmatpush1.bf16.msra.mxu1 %v5865_v18 }
 0xada   : > { %4725 = vmatprep.subr.bf16.mxu1 %v4711_v20 }
 0xadc   : > { %5239 = vmatmul.mubr.msk.bf16.vlgmr.msra.gmra.mxu1 %vm3517_vm5, %v4520_v8 }
 0xadd   : > { %4726 = vmatpush1.bf16.msra.mxu1 %v4708_v44  ;;  %4745 = vmatprep.mubr.bf16.mxu1 %v5886_v1 }
 0xade   : > { %4727 = vmatprep.subr.bf16.mxu1 %v5873_v22 }
 0xae1   : > { %4728 = vmatpush1.bf16.msra.mxu1 %v5871_v23 }
 0xae4   : > { %5257 = vmatmul.mubr.msk.bf16.vlgmr.msra.gmra.mxu1 %vm3517_vm5, %v4680_v4 }
 0xb4c   : > { %v3561_v24 = vpop.f32.mrf.mxu1 }
 0xb4e   : > { %v3563_v26 = vpop.f32.mrf.mxu1 }
 0xb50   : > { %v3565_v27 = vpop.f32.mrf.mxu1 }
 0xb52   : > { %v3567_v9 = vpop.f32.mrf.mxu1 }
 0xb54   : > { %v3631_v28 = vpop.f32.mrf.mxu1 }
 0xb55   : > { %v3632_v43 = vadd.f32 %v3631_v28, %v3561_v24 }
 0xb56   : > { %v3633_v29 = vpop.f32.mrf.mxu1 }
 0xb57   : > { %v3634_v0 = vadd.f32 %v3633_v29, %v3563_v26 }
 0xb58   : > { %v3635_v30 = vpop.f32.mrf.mxu1 }
 0xb59   : > { %v3636_v2 = vadd.f32 %v3635_v30, %v3565_v27 }
 0xb5a   : > { %v3637_v31 = vpop.f32.mrf.mxu1 }
 0xb5b   : > { %v3638_v10 = vadd.f32 %v3637_v31, %v3567_v9 }
 0xb5c   : > { %v3707_v32 = vpop.f32.mrf.mxu1 }
 0xb5d   : > { %v3716_v37 = vadd.f32 %v3707_v32, %v3632_v43 }
 0xb5e   : > { %v3709_v34 = vpop.f32.mrf.mxu1 }
 0xb5f   : > { %v3717_v57 = vadd.f32 %v3709_v34, %v3634_v0 }
 0xb60   : > { %v3711_v36 = vpop.f32.mrf.mxu1 }
 0xb61   : > { %v3718_v6 = vadd.f32 %v3711_v36, %v3636_v2 }
 0xb62   : > { %v3713_v38 = vpop.f32.mrf.mxu1 }
 0xb63   : > { %v3719_v11 = vadd.f32 %v3713_v38, %v3638_v10 }
 0xb64   : > { %v3787_v46 = vpop.f32.mrf.mxu1 }
 0xb65   : > { %v3796_v35 = vadd.f32 %v3787_v46, %v3716_v37 }
 0xb66   : > { %v3789_v1 = vpop.f32.mrf.mxu1 }
 0xb67   : > { %v3797_v59 = vadd.f32 %v3789_v1, %v3717_v57 }
 0xb68   : > { %v3791_v47 = vpop.f32.mrf.mxu1 }
 0xb69   : > { %v3798_v14 = vadd.f32 %v3791_v47, %v3718_v6 }
 0xb6a   : > { %v3793_v48 = vpop.f32.mrf.mxu1 }
 0xb6b   : > { %v3799_v18 = vadd.f32 %v3793_v48, %v3719_v11 }
 0xb6c   : > { %v3867_v40 = vpop.f32.mrf.mxu1 }
 0xb6d   : > { %v3876_v15 = vadd.f32 %v3867_v40, %v3796_v35 }
 0xb6e   : > { %v3869_v39 = vpop.f32.mrf.mxu1  ;;  %v4187_v53 = vpop.f32.mrf.mxu0 }
 0xb6f   : > { %v3877_v45 = vadd.f32 %v3869_v39, %v3797_v59 }
 0xb70   : > { %v3871_v58 = vpop.f32.mrf.mxu1  ;;  %v4189_v41 = vpop.f32.mrf.mxu0 }
 0xb71   : > { %v3878_v61 = vadd.f32 %v3871_v58, %v3798_v14 }
 0xb72   : > { %v3873_v50 = vpop.f32.mrf.mxu1  ;;  %v4191_v42 = vpop.f32.mrf.mxu0 }
 0xb73   : > { %v3879_v23 = vadd.f32 %v3873_v50, %v3799_v18 }
 0xb74   : > { %v3947_v13 = vpop.f32.mrf.mxu1  ;;  %v4193_v21 = vpop.f32.mrf.mxu0 }
 0xb75   : > { %v3956_v7 = vadd.f32 %v3947_v13, %v3876_v15 }
 0xb76   : > { %v3949_v52 = vpop.f32.mrf.mxu1  ;;  %v4347_v54 = vpop.f32.mrf.mxu0 }
 0xb77   : > { %v3957_v17 = vadd.f32 %v3949_v52, %v3877_v45 }
 0xb78   : > { %v3951_v62 = vpop.f32.mrf.mxu1  ;;  %v4349_v16 = vpop.f32.mrf.mxu0 }
 0xb79   : > { %v3958_v20 = vadd.f32 %v3951_v62, %v3878_v61 }
 0xb7a   : > { %v3953_v63 = vpop.f32.mrf.mxu1  ;;  %v4351_v3 = vpop.f32.mrf.mxu0 }
 0xb7b   : > { %v3959_v9 = vadd.f32 %v3953_v63, %v3879_v23 }
 0xb7c   : > { %v4027_v33 = vpop.f32.mrf.mxu1  ;;  %v4353_v60 = vpop.f32.mrf.mxu0 }
 0xb7d   : > { %v4036_v44 = vadd.f32 %v4027_v33, %v3956_v7 }
 0xb7e   : > { %v4029_v55 = vpop.f32.mrf.mxu1  ;;  %v4507_v22 = vpop.f32.mrf.mxu0 }
 0xb7f   : > { %v4037_v8 = vadd.f32 %v4029_v55, %v3957_v17  ;;  %v4765_v17 = vpop.permute.xlu0 %4764 }
 0xb80   : > { %v4031_v56 = vpop.f32.mrf.mxu1  ;;  %v4509_v30 = vpop.f32.mrf.mxu0 }
 0xb81   : > { %v4038_v24 = vadd.f32 %v4031_v56, %v3958_v20  ;;  %v4770_v20 = vpop.permute.xlu1 %4769 }
 0xb82   : > { %v4033_v25 = vpop.f32.mrf.mxu1  ;;  %v4511_v40 = vpop.f32.mrf.mxu0 }
 0xb83   : > { %v4039_v31 = vadd.f32 %v4033_v25, %v3959_v9 }
 0xb84   : > { %v4107_v51 = vpop.f32.mrf.mxu1  ;;  %v4513_v62 = vpop.f32.mrf.mxu0 }
 0xb85   : > { %v4116_v26 = vadd.f32 %v4107_v51, %v4036_v44 }
 0xb86   : > { %v4109_v5 = vpop.f32.mrf.mxu1 }
 0xb87   : > { %v4117_v27 = vadd.f32 %v4109_v5, %v4037_v8  ;;  %v4196_v34 = vadd.f32 %v4187_v53, %v4116_v26 }
 0xb88   : > { %v4111_v12 = vpop.f32.mrf.mxu1 }
 0xb89   : > { %v4118_v29 = vadd.f32 %v4111_v12, %v4038_v24  ;;  %v4197_v36 = vadd.f32 %v4189_v41, %v4117_v27  ;;  %v4667_v41 = vpop.f32.mrf.mxu0 }
 0xb8a   : > { %v4113_v49 = vpop.f32.mrf.mxu1 }
 0xb8b   : > { %v4119_v38 = vadd.f32 %v4113_v49, %v4039_v31  ;;  %v4198_v48 = vadd.f32 %v4191_v42, %v4118_v29  ;;  %v4669_v6 = vpop.f32.mrf.mxu0 }
 0xb8c   : > { %v4267_v19 = vpop.f32.mrf.mxu1 }
 0xb8d   : > { %v4276_v1 = vadd.f32 %v4267_v19, %v4196_v34  ;;  %v4199_v50 = vadd.f32 %v4193_v21, %v4119_v38  ;;  %v4671_v14 = vpop.f32.mrf.mxu0 }
 0xb8e   : > { %v4269_v4 = vpop.f32.mrf.mxu1 }
 0xb8f   : > { %v4277_v47 = vadd.f32 %v4269_v4, %v4197_v36  ;;  %v4356_v52 = vadd.f32 %v4347_v54, %v4276_v1  ;;  %v4673_v18 = vpop.f32.mrf.mxu0  ;;  %v4799_v1 = vpop.permute.xlu0 %4798 }
 0xb90   : > { %v4271_v28 = vpop.f32.mrf.mxu1 }
 0xb91   : > { %v4278_v58 = vadd.f32 %v4271_v28, %v4198_v48  ;;  %v4357_v63 = vadd.f32 %v4349_v16, %v4277_v47 }
 0xb92   : > { %v4273_v32 = vpop.f32.mrf.mxu1 }
 0xb93   : > { %v4279_v33 = vadd.f32 %v4273_v32, %v4199_v50  ;;  %v4358_v43 = vadd.f32 %v4351_v3, %v4278_v58 }
 0xb94   : > { %v4427_v46 = vpop.f32.mrf.mxu1 }
 0xb95   : > { %v4436_v56 = vadd.f32 %v4427_v46, %v4356_v52  ;;  %v4359_v51 = vadd.f32 %v4353_v60, %v4279_v33  ;;  %v4790_v46 = vld [vmem:[%s6939_s16] sm:$0x3] }
 0xb96   : > { %v4429_v39 = vpop.f32.mrf.mxu1 }
 0xb97   : > { %v4437_v25 = vadd.f32 %v4429_v39, %v4357_v63  ;;  %v4516_v37 = vadd.f32 %v4507_v22, %v4436_v56 }
 0xb98   : > { %v4431_v13 = vpop.f32.mrf.mxu1 }
 0xb99   : > { %v4438_v0 = vadd.f32 %v4431_v13, %v4358_v43  ;;  %v4517_v42 = vadd.f32 %v4509_v30, %v4437_v25 }
 0xb9a   : > { %v4433_v55 = vpop.f32.mrf.mxu1 }
 0xb9b   : > { %v4439_v57 = vadd.f32 %v4433_v55, %v4359_v51  ;;  %v4518_v54 = vadd.f32 %v4511_v40, %v4438_v0 }
 0xb9c   : > { %v4587_v53 = vpop.f32.mrf.mxu1 }
 0xb9d   : > { %v4596_v21 = vadd.f32 %v4587_v53, %v4516_v37  ;;  %v4519_v10 = vadd.f32 %v4513_v62, %v4439_v57 }
 0xb9e   : > { %v4589_v2 = vpop.f32.mrf.mxu1 }
 0xb9f   : > { %v4597_v35 = vadd.f32 %v4589_v2, %v4517_v42  ;;  %v4676_v15 = vadd.f32 %v4667_v41, %v4596_v21 }
 0xba0   : > { %v4591_v5 = vpop.f32.mrf.mxu1 }
 0xba1   : > { %v4598_v16 = vadd.f32 %v4591_v5, %v4518_v54  ;;  %v4677_v3 = vadd.f32 %v4669_v6, %v4597_v35 }
 0xba2   : > { %v4593_v59 = vpop.f32.mrf.mxu1 }
 0xba3   : > { %v4599_v45 = vadd.f32 %v4593_v59, %v4519_v10  ;;  %v4678_v61 = vadd.f32 %v4671_v14, %v4598_v16 }
 0xba4   : > { %v4747_v12 = vpop.f32.mrf.mxu1 }
 0xba5   : > { %v4756_v49 = vadd.f32 %v4747_v12, %v4676_v15  ;;  %v4679_v8 = vadd.f32 %v4673_v18, %v4599_v45 }
 0xba6   : > { %v4749_v11 = vpop.f32.mrf.mxu1 }
 0xba7   : > { %v4757_v60 = vadd.f32 %v4749_v11, %v4677_v3  ;;  %v4772_v23 = vadd.f32 %v4765_v17, %v4756_v49 }
 0xba8   : > { %v4751_v7 = vpop.f32.mrf.mxu1 }
 0xba9   : > { %v4758_v19 = vadd.f32 %v4751_v7, %v4678_v61  ;;  %v4773_v44 = vadd.f32 %v4765_v17, %v4757_v60  ;;  %v4780_v28 = vmul.f32 0.01, %v4772_v23  ;;  %vm4776_vm14 = vcmp.ge.f32.partialorder %v4772_v23, 0.0 }
 0xbaa   : > { %v4753_v22 = vpop.f32.mrf.mxu1 }
 0xbab   : > { %v4774_v4 = vadd.f32 %v4770_v20, %v4758_v19  ;;  %v4759_v24 = vadd.f32 %v4753_v22, %v4679_v8  ;;  %v4781_v27 = vmul.f32 0.01, %v4773_v44  ;;  %vm4777_vm13 = vcmp.ge.f32.partialorder %v4773_v44, 0.0 }
 0xbac   : > { %v4784_v34 = vsel %vm4776_vm14, %v4772_v23, %v4780_v28 }
 0xbad   : > { %v4782_v26 = vmul.f32 0.01, %v4774_v4  ;;  %vm4778_vm12 = vcmp.ge.f32.partialorder %v4774_v4, 0.0  ;;  %v4775_v9 = vadd.f32 %v4770_v20, %v4759_v24  ;;  %v4785_v31 = vsel %vm4777_vm13, %v4773_v44, %v4781_v27 }
 0xbaf   : > { %vm4779_vm1 = vcmp.ge.f32.partialorder %v4775_v9, 0.0  ;;  %v4783_v29 = vmul.f32 0.01, %v4775_v9  ;;  %v4786_v30 = vsel %vm4778_vm12, %v4774_v4, %v4782_v26 }
 0xbb0   : > { %v4788_v38 = vpack.c.bf16 %v4786_v30, %v4784_v34 }
 0xbb1   : > { %v4787_v32 = vsel %vm4779_vm1, %v4775_v9, %v4783_v29 }
 0xbb2   : > { %v4789_v36 = vpack.c.bf16 %v4787_v32, %v4785_v31 }
 0xbb4   : > { %4818 = vmatprep.subr.bf16.mxu0 %v4789_v36 }
 0xbb5   : > { %4819 = vmatpush1.bf16.msra.mxu0 %v4788_v38 }
 0xbb8   : > { %5259 = vmatmul.mubr.msk.bf16.vlgmr.msra.gmra.mxu0 %vm1299_vm15, %v4790_v46 }
 0xc78   : > { %v4838_v47 = vpop.f32.mrf.mxu0 }
 0xc79   : > { %v4839_v48 = vadd.f32 %v4838_v47, %v4799_v1 }
 0xc7a   : > { %v4840_v40 = vpop.f32.mrf.mxu0 }
 0xc7b   : > { %v4841_v39 = vadd.f32 %v4840_v40, %v4799_v1  ;;  %5874 = vtanh.f32 %v4839_v48 }
 0xc7c   : > { %v4842_v58 = vpop.f32.mrf.mxu0 }
 0xc7d   : > { %5876 = vtanh.f32 %v4841_v39 }
 0xc7e   : > { %v4843_v50 = vpop.f32.mrf.mxu0 }
 0xc88   : > { %v5875_v13 = vpop.eup %5874 }
 0xc8a   : > { %v5877_v52 = vpop.eup %5876 }
 0xc8b   : > { %v4849_v62 = vcombine.low %v5875_v13, %v5877_v52 }
 0xc8d   : > { %4853 = vst.msk [vmem:[%s577_s19] sm:$0xff] %vm4852_vm2, %v4849_v62 }
 0xc8e PF: > { %s30_s29 = sadd.s32 1, %s5884_s29  }
 0xc8f   : > { %p27_p4 = scmp.ge.s32.totalorder %s30_s29, 4  }
 0xc91   :  { %29 = sbr.rel (!%p27_p4) target bundleno = 4 (0x4), region = 145 }

</bundles_post_ra>
